<compile_context>
chip_gen: v7x
topology: tpu7x:2x2x1
jax: 0.10.0
libtpu: 0.0.40
codegen_flags: <defaults>
</compile_context>

<pallas_src>
import functools

import jax
import jax.numpy as jnp
import numpy as np
from jax import lax
from jax.experimental import pallas as pl
from jax.experimental.pallas import tpu as pltpu


def _round_up(x, m):
    return (x + m - 1) // m * m


def _vmem_capacity_bytes():
    try:
        return int(pltpu.get_tpu_info().vmem_capacity_bytes)
    except Exception:
        return 64 * 1024 * 1024  # conservative (v7x-sized) fallback


# ----------------------------------------------------------------------------
# Fused Bottleneck kernel
# ----------------------------------------------------------------------------
def _bottleneck_kernel(x_ref, halo_ref, w1_ref, b1_ref, w2_ref, b2_ref,
                       w3_ref, b3_ref, o_ref, pbuf_ref, *, chunk_rows, stack_kw):
    # x_ref:    (1, T, W, C)       current row tile of the input (also residual)
    # halo_ref: (1, 2r, W, C)      r rows above + r rows below this tile
    # w1_ref:   (C, P)  b1: (1, P)           (BN1 scale folded into w1)
    # w2_ref:   (3,3P,P) or (9,P,P); b2:(1,P) (BN2 scale folded into w2)
    # w3_ref:   (P, C)  b3: (1, C)           (BN3 scale folded into w3)
    # o_ref:    (1, T, W, C)
    # pbuf_ref: VMEM (T+2r+1, Wpp, P)  W-padded conv1 output (+1 overflow row),
    #           Wpp = round_up(W+2r, sublane pack)
    i = pl.program_id(1)
    nt = pl.num_programs(1)
    _, T, W, C = x_ref.shape
    r = halo_ref.shape[1] // 2
    P = w1_ref.shape[1]
    T2 = T + 2 * r
    Tp1, Wpp, _ = pbuf_ref.shape
    f32 = jnp.float32
    cdt = pbuf_ref.dtype

    def conv1(v, rows):  # v: (rows, W, C) -> (rows, W, P) in f32
        y = jnp.dot(v.reshape(rows * W, C), w1_ref[...],
                    preferred_element_type=f32)
        y = jnp.maximum(y + b1_ref[...], 0.0)
        return y.reshape(rows, W, P)

    xt = x_ref[0]        # (T, W, C)
    hv = halo_ref[0]     # (2r, W, C)

    # ---- stage conv1+bn1+relu output into the W-padded VMEM buffer ---------
    # left / right zero-pad columns (conv2's zero padding in conv1-output space)
    pbuf_ref[:, :r, :] = jnp.zeros((Tp1, r, P), cdt)
    pbuf_ref[:, r + W:, :] = jnp.zeros((Tp1, Wpp - r - W, P), cdt)
    # spare overflow row: only ever read for discarded (w >= W) output columns
    pbuf_ref[T2:, r:r + W, :] = jnp.zeros((Tp1 - T2, W, P), cdt)

    # Halo rows outside the image must be zeros of conv1-OUTPUT space
    # (conv1(0) != 0 because of the BN bias), hence the masking.
    top_ok = jnp.where(i > 0, 1.0, 0.0).astype(f32)
    bot_ok = jnp.where(i < nt - 1, 1.0, 0.0).astype(f32)
    pbuf_ref[:r, r:r + W, :] = (conv1(hv[:r], r) * top_ok).astype(cdt)
    pbuf_ref[r + T:T2, r:r + W, :] = (conv1(hv[r:], r) * bot_ok).astype(cdt)
    pbuf_ref[r:r + T, r:r + W, :] = conv1(xt, T).astype(cdt)

    # ---- conv2 (3x3, dil=rate)+bn2+relu, conv3 (1x1)+bn3, residual, relu ----
    # Flatten the padded buffer once (a view, since Wpp is sublane-aligned).
    # Each tap is a row-shifted OPERAND slice of the same flat buffer; all taps
    # accumulate into a per-chunk value (no scratch read-modify-write).
    p2 = pbuf_ref[...].reshape(Tp1 * Wpp, P)

    for t0 in range(0, T, chunk_rows):
        tc = min(chunk_rows, T - t0)
        L = tc * Wpp
        base = t0 * Wpp
        acc = jnp.zeros((L, P), f32)
        if stack_kw:
            # stack the 3 kw taps -> (L, 3P) x (3P, P) to fill the MXU at small P
            for kh in range(3):
                off = base + kh * r * Wpp
                op = jnp.concatenate(
                    [p2[off + kw * r: off + kw * r + L, :] for kw in range(3)],
                    axis=1)
                acc = acc + jnp.dot(op, w2_ref[kh], preferred_element_type=f32)
        else:
            for k in range(9):
                kh, kw = divmod(k, 3)
                off = base + kh * r * Wpp + kw * r
                acc = acc + jnp.dot(p2[off:off + L, :], w2_ref[k],
                                    preferred_element_type=f32)
        y2 = jnp.maximum(acc + b2_ref[...], 0.0)                     # (L, P) f32
        # drop the padded columns BEFORE conv3 (no wasted MXU rows / f32 temp)
        y2 = y2.reshape(tc, Wpp, P)[:, :W, :].reshape(tc * W, P)
        y3 = jnp.dot(y2.astype(cdt), w3_ref[...], preferred_element_type=f32)
        y3 = y3 + b3_ref[...]                                        # (tc*W, C)
        res = xt[t0:t0 + tc].reshape(tc * W, C).astype(f32)
        out = jnp.maximum(y3 + res, 0.0).reshape(tc, W, C)
        o_ref[0, t0:t0 + tc] = out.astype(o_ref.dtype)


# ----------------------------------------------------------------------------
# Tile-size selection (VMEM-budget driven; counts temporaries + double buffers)
# ----------------------------------------------------------------------------
def _choose_tile_h(N, H, W, C, P, r, itemsize, budget_bytes):
    sub = 8 if itemsize >= 4 else 16
    Wpp = _round_up(W + 2 * r, sub)
    divs = [T for T in range(H, 0, -1) if H % T == 0 and (T >= r or T == H)]

    def est(T):
        T2 = T + 2 * r
        tc = min(T, max(1, -(-256 // Wpp)))
        w_bytes = (C * P + 9 * P * P + P * C + 2 * P + C) * itemsize
        return (4 * T * W * C * itemsize            # x + out tiles (double buffered)
                + 4 * r * W * C * itemsize          # halo rows (double buffered)
                + 2 * w_bytes                       # weights / biases (double buffered)
                + 2 * (T2 + 1) * Wpp * P * itemsize  # pbuf scratch + relayout copy
                + tc * Wpp * P * (8 + 4 * itemsize)  # conv2 acc / operands / y2
                + tc * W * C * 8)                    # y3 f32 + out temporaries

    fitting = [T for T in divs if est(T) <= budget_bytes]
    if not fitting:
        return divs[-1]
    best = fitting[0]
    # Prefer an even total grid (keeps both v7x TensorCores busy) if it costs < 2x tile.
    if (N * (H // best)) % 2 == 1:
        for T in fitting:
            if (N * (H // T)) % 2 == 0 and 2 * T >= best:
                return T
    return best


# ----------------------------------------------------------------------------
# Bottleneck forward (NHWC — preferred entry point, no boundary transposes)
# ----------------------------------------------------------------------------
def bottleneck_forward_nhwc(x_nhwc, params, *, stride=1, rate=1,
                            compute_dtype=jnp.bfloat16, tile_h=None,
                            chunk_rows=None, stack_kw=None):
    assert stride == 1, "stride>1 requires the downsample branch (not implemented)"
    assert rate >= 1
    N, H, W, C = x_nhwc.shape
    P = params["w1f"].shape[1]
    assert C == P * 4, "identity residual requires inplanes == planes*4"

    cdt = jnp.dtype(compute_dtype) if compute_dtype is not None else jnp.dtype(x_nhwc.dtype)
    r = rate
    itemsize = cdt.itemsize
    sub = 8 if itemsize >= 4 else 16
    Wpp = _round_up(W + 2 * r, sub)

    # generation-aware VMEM budgeting (64 MiB on v7x, 128 MiB on v5e/v6e)
    vmem_cap = _vmem_capacity_bytes()
    vmem_limit = int(min(vmem_cap - 8 * 1024 * 1024, vmem_cap * 0.90))
    budget = int(vmem_limit * 0.75)

    T = tile_h if tile_h is not None else _choose_tile_h(
        N, H, W, C, P, r, itemsize, budget)
    assert H % T == 0 and (T >= r or H == T)
    nt = H // T

    if chunk_rows is None:
        by_rows = -(-256 // Wpp)                          # ~256 flattened rows per dot
        by_bytes = max(1, (1 << 20) // (Wpp * P * 4))     # keep f32 acc ~<= 1 MiB
        chunk_rows = int(max(1, min(T, by_rows, by_bytes)))
    if stack_kw is None:
        stack_kw = P < 256

    x = x_nhwc.astype(cdt)

    # Per-tile halo rows (r above + r below each tile), zeros at the image border.
    # Only 2*rate*nt rows total -- tiny vs. padding the whole tensor.
    xr = x.reshape(N, nt, T, W, C)
    zrow = jnp.zeros((N, 1, r, W, C), cdt)
    if nt > 1:
        top = jnp.concatenate([zrow, xr[:, :-1, T - r:]], axis=1)
        bot = jnp.concatenate([xr[:, 1:, :r], zrow], axis=1)
    else:
        top, bot = zrow, zrow
    halo = jnp.concatenate([top, bot], axis=2).reshape(N, nt * 2 * r, W, C)

    w1 = params["w1f"].astype(cdt)
    w3 = params["w3f"].astype(cdt)
    b1, b2, b3 = params["b1"], params["b2"], params["b3"]   # f32 biases
    if stack_kw:
        w2 = params["w2f"].reshape(3, 3 * P, P).astype(cdt)
        w2_spec = pl.BlockSpec((3, 3 * P, P), lambda n, i: (0, 0, 0))
    else:
        w2 = params["w2f"].astype(cdt)
        w2_spec = pl.BlockSpec((9, P, P), lambda n, i: (0, 0, 0))

    T2 = T + 2 * r
    kernel = functools.partial(_bottleneck_kernel,
                               chunk_rows=chunk_rows, stack_kw=stack_kw)
    out = pl.pallas_call(
        kernel,
        out_shape=jax.ShapeDtypeStruct((N, H, W, C), x_nhwc.dtype),
        grid=(N, nt),
        in_specs=[
            pl.BlockSpec((1, T, W, C), lambda n, i: (n, i, 0, 0)),
            pl.BlockSpec((1, 2 * r, W, C), lambda n, i: (n, i, 0, 0)),
            pl.BlockSpec((C, P), lambda n, i: (0, 0)),
            pl.BlockSpec((1, P), lambda n, i: (0, 0)),
            w2_spec,
            pl.BlockSpec((1, P), lambda n, i: (0, 0)),
            pl.BlockSpec((P, C), lambda n, i: (0, 0)),
            pl.BlockSpec((1, C), lambda n, i: (0, 0)),
        ],
        out_specs=pl.BlockSpec((1, T, W, C), lambda n, i: (n, i, 0, 0)),
        scratch_shapes=[
            pltpu.VMEM((T2 + 1, Wpp, P), cdt),   # W-padded conv1 output (+1 row)
        ],
        compiler_params=pltpu.CompilerParams(
            dimension_semantics=("parallel", "parallel"),
            vmem_limit_bytes=vmem_limit,
        ),
    )(x, halo, w1, b1, w2, b2, w3, b3)
    return out


# ----------------------------------------------------------------------------
# Bottleneck forward (NCHW / PyTorch-layout convenience wrapper)
# ----------------------------------------------------------------------------
def bottleneck_forward(x_nchw, params, **kwargs):
    # NOTE: prefer bottleneck_forward_nhwc in an NHWC end-to-end model; these two
    # full-tensor transposes are pure HBM boundary traffic.
    x = jnp.transpose(x_nchw, (0, 2, 3, 1))
    out = bottleneck_forward_nhwc(x, params, **kwargs)
    return jnp.transpose(out, (0, 3, 1, 2))


# ----------------------------------------------------------------------------
# Deterministic parameter construction (BN scale folded into conv weights)
# ----------------------------------------------------------------------------
def make_params(key, inplanes, planes, dtype=jnp.float32, eps=1e-5):
    ks = jax.random.split(key, 6)
    outp = planes * 4
    w1_oihw = 0.1 * jax.random.normal(ks[0], (planes, inplanes, 1, 1), dtype)
    w2_oihw = 0.1 * jax.random.normal(ks[1], (planes, planes, 3, 3), dtype)
    w3_oihw = 0.1 * jax.random.normal(ks[2], (outp, planes, 1, 1), dtype)

    def bn_params(k, c):
        k1, k2, k3, k4 = jax.random.split(k, 4)
        g = 1.0 + 0.1 * jax.random.normal(k1, (c,), dtype)
        b = 0.1 * jax.random.normal(k2, (c,), dtype)
        m = 0.1 * jax.random.normal(k3, (c,), dtype)
        v = 1.0 + 0.1 * jnp.abs(jax.random.normal(k4, (c,), dtype))
        return g, b, m, v

    bn1 = bn_params(ks[3], planes)
    bn2 = bn_params(ks[4], planes)
    bn3 = bn_params(ks[5], outp)

    def fold(bn):
        g, b, m, v = bn
        s = g / jnp.sqrt(v + eps)
        return s, b - m * s

    s1, b1 = fold(bn1)
    s2, b2 = fold(bn2)
    s3, b3 = fold(bn3)

    # BN scale folded into the (bias-free) conv weights; BN bias kept separate.
    w1f = jnp.transpose(w1_oihw[:, :, 0, 0], (1, 0)) * s1[None, :]            # (Cin, P)
    w2f = (jnp.transpose(w2_oihw, (2, 3, 1, 0)).reshape(9, planes, planes)
           * s2[None, None, :])                                               # (9, P, P)
    w3f = jnp.transpose(w3_oihw[:, :, 0, 0], (1, 0)) * s3[None, :]            # (P, 4P)

    return {
        "w1_oihw": w1_oihw, "w2_oihw": w2_oihw, "w3_oihw": w3_oihw,
        "bn1": bn1, "bn2": bn2, "bn3": bn3,
        "w1f": w1f, "w2f": w2f, "w3f": w3f,
        "b1": b1.reshape(1, -1), "b2": b2.reshape(1, -1), "b3": b3.reshape(1, -1),
    }


# ----------------------------------------------------------------------------
# Pure-JAX reference (eval-mode BatchNorm) for correctness checking
# ----------------------------------------------------------------------------
def ref_bottleneck(x, p, *, rate=1, eps=1e-5):
    def bn(y, stats):
        g, b, m, v = stats
        return (y - m[None, :, None, None]) * (
            g[None, :, None, None] / jnp.sqrt(v[None, :, None, None] + eps)
        ) + b[None, :, None, None]

    dn = ("NCHW", "OIHW", "NCHW")
    prec = lax.Precision.HIGHEST
    out = lax.conv_general_dilated(x, p["w1_oihw"], (1, 1), "VALID",
                                   dimension_numbers=dn, precision=prec)
    out = jax.nn.relu(bn(out, p["bn1"]))
    out = lax.conv_general_dilated(out, p["w2_oihw"], (1, 1),
                                   [(rate, rate), (rate, rate)],
                                   rhs_dilation=(rate, rate),
                                   dimension_numbers=dn, precision=prec)
    out = jax.nn.relu(bn(out, p["bn2"]))
    out = lax.conv_general_dilated(out, p["w3_oihw"], (1, 1), "VALID",
                                   dimension_numbers=dn, precision=prec)
    out = bn(out, p["bn3"])
    return jax.nn.relu(out + x)


# ----------------------------------------------------------------------------
if __name__ == "__main__":
    N, inplanes, planes, H, W = 2, 16, 4, 16, 16   # inplanes == planes * expansion

    key = jax.random.PRNGKey(0)
    kx, kp = jax.random.split(key)
    params = make_params(kp, inplanes, planes)
    x = jax.random.normal(kx, (N, inplanes, H, W), jnp.float32)

    ref = jax.block_until_ready(ref_bottleneck(x, params, rate=1))

    # f32 compute, single spatial tile, kw-stacked conv2 taps (planes < 256)
    out = jax.block_until_ready(
        bottleneck_forward(x, params, rate=1, compute_dtype=jnp.float32))
    np.testing.assert_allclose(np.asarray(out), np.asarray(ref), rtol=5e-3, atol=5e-3)

    # f32, 4 spatial tiles with dilation rate=2, per-tap conv2 path
    # (exercises halo gather + boundary masking + operand-sliced taps)
    out2 = jax.block_until_ready(
        bottleneck_forward(x, params, rate=2, tile_h=4,
                           compute_dtype=jnp.float32, stack_kw=False))
    ref2 = jax.block_until_ready(ref_bottleneck(x, params, rate=2))
    np.testing.assert_allclose(np.asarray(out2), np.asarray(ref2), rtol=5e-3, atol=5e-3)

    # default bf16 compute (f32 accumulation), 2 tiles, uneven row chunks
    out3 = jax.block_until_ready(
        bottleneck_forward(x, params, rate=1, tile_h=8, chunk_rows=3))
    np.testing.assert_allclose(np.asarray(out3), np.asarray(ref), rtol=1e-1, atol=1e-1)

    print("KERNEL_OK")
</pallas_src>

<mosaic_0001>
module attributes {stable_mosaic.version = 11 : i64} {
  func.func @_bottleneck_kernel(%arg0: i32, %arg1: i32, %arg2: memref<1x16x16x16xf32, #tpu.memory_space<vmem>>, %arg3: memref<1x2x16x16xf32, #tpu.memory_space<vmem>>, %arg4: memref<16x4xf32, #tpu.memory_space<vmem>>, %arg5: memref<1x4xf32, #tpu.memory_space<vmem>>, %arg6: memref<3x12x4xf32, #tpu.memory_space<vmem>>, %arg7: memref<1x4xf32, #tpu.memory_space<vmem>>, %arg8: memref<4x16xf32, #tpu.memory_space<vmem>>, %arg9: memref<1x16xf32, #tpu.memory_space<vmem>>, %arg10: memref<1x16x16x16xf32, #tpu.memory_space<vmem>>, %arg11: memref<19x24x4xf32, #tpu.memory_space<vmem>>) attributes {dimension_semantics = [#tpu.dimension_semantics<parallel>, #tpu.dimension_semantics<parallel>], iteration_bounds = array<i64: 2, 1>, scalar_prefetch = 0 : i64, scratch_operands = 1 : i64, tpu.core_type = #tpu.core_type<tc>, window_params = [{transform_indices = @transform_0, window_bounds = array<i64: 1, 16, 16, 16>}, {transform_indices = @transform_1, window_bounds = array<i64: 1, 2, 16, 16>}, {pipeline_mode = #tpu.pipeline_mode<synchronous>, transform_indices = @transform_2, window_bounds = array<i64: 16, 4>}, {pipeline_mode = #tpu.pipeline_mode<synchronous>, transform_indices = @transform_3, window_bounds = array<i64: 1, 4>}, {pipeline_mode = #tpu.pipeline_mode<synchronous>, transform_indices = @transform_4, window_bounds = array<i64: 3, 12, 4>}, {pipeline_mode = #tpu.pipeline_mode<synchronous>, transform_indices = @transform_5, window_bounds = array<i64: 1, 4>}, {pipeline_mode = #tpu.pipeline_mode<synchronous>, transform_indices = @transform_6, window_bounds = array<i64: 4, 16>}, {pipeline_mode = #tpu.pipeline_mode<synchronous>, transform_indices = @transform_7, window_bounds = array<i64: 1, 16>}, {transform_indices = @transform_8, window_bounds = array<i64: 1, 16, 16, 16>}]} {
    %c0 = arith.constant 0 : index
    %c0_0 = arith.constant 0 : index
    %c0_1 = arith.constant 0 : index
    %c0_2 = arith.constant 0 : index
    %0 = vector.load %arg2[%c0, %c0_0, %c0_1, %c0_2] : memref<1x16x16x16xf32, #tpu.memory_space<vmem>>, vector<1x16x16x16xf32>
    %1 = vector.shape_cast %0 : vector<1x16x16x16xf32> to vector<16x16x16xf32>
    %c0_3 = arith.constant 0 : index
    %c0_4 = arith.constant 0 : index
    %c0_5 = arith.constant 0 : index
    %c0_6 = arith.constant 0 : index
    %2 = vector.load %arg3[%c0_3, %c0_4, %c0_5, %c0_6] : memref<1x2x16x16xf32, #tpu.memory_space<vmem>>, vector<1x2x16x16xf32>
    %3 = vector.shape_cast %2 : vector<1x2x16x16xf32> to vector<2x16x16xf32>
    %cst = arith.constant 0.000000e+00 : f32
    %4 = vector.broadcast %cst : f32 to vector<19x1x4xf32>
    %c0_7 = arith.constant 0 : index
    %c0_8 = arith.constant 0 : index
    %c0_9 = arith.constant 0 : index
    %5 = vector.load %arg11[%c0_7, %c0_8, %c0_9] : memref<19x24x4xf32, #tpu.memory_space<vmem>>, vector<19x1x4xf32>
    tpu.vector_store %arg11[%c0_7, %c0_8, %c0_9], %4 {strides = array<i32>} : memref<19x24x4xf32, #tpu.memory_space<vmem>>, vector<19x1x4xf32>,
    %cst_10 = arith.constant 0.000000e+00 : f32
    %6 = vector.broadcast %cst_10 : f32 to vector<19x7x4xf32>
    %c0_11 = arith.constant 0 : index
    %c17 = arith.constant 17 : index
    %c0_12 = arith.constant 0 : index
    %7 = vector.load %arg11[%c0_11, %c17, %c0_12] : memref<19x24x4xf32, #tpu.memory_space<vmem>>, vector<19x7x4xf32>
    tpu.vector_store %arg11[%c0_11, %c17, %c0_12], %6 {strides = array<i32>} : memref<19x24x4xf32, #tpu.memory_space<vmem>>, vector<19x7x4xf32>,
    %cst_13 = arith.constant 0.000000e+00 : f32
    %8 = vector.broadcast %cst_13 : f32 to vector<1x16x4xf32>
    %c18 = arith.constant 18 : index
    %c1 = arith.constant 1 : index
    %c0_14 = arith.constant 0 : index
    %9 = vector.load %arg11[%c18, %c1, %c0_14] : memref<19x24x4xf32, #tpu.memory_space<vmem>>, vector<1x16x4xf32>
    tpu.vector_store %arg11[%c18, %c1, %c0_14], %8 {strides = array<i32>} : memref<19x24x4xf32, #tpu.memory_space<vmem>>, vector<1x16x4xf32>,
    %c0_i32 = arith.constant 0 : i32
    %10 = arith.cmpi sgt, %arg1, %c0_i32 : i32
    %cst_15 = arith.constant 1.000000e+00 : f32
    %cst_16 = arith.constant 0.000000e+00 : f32
    %11 = arith.select %10, %cst_15, %cst_16 : f32
    %c0_i32_17 = arith.constant 0 : i32
    %12 = arith.cmpi slt, %arg1, %c0_i32_17 : i32
    %cst_18 = arith.constant 1.000000e+00 : f32
    %cst_19 = arith.constant 0.000000e+00 : f32
    %13 = arith.select %12, %cst_18, %cst_19 : f32
    %14 = vector.extract_strided_slice %3 {offsets = [0, 0, 0], sizes = [1, 16, 16], strides = [1, 1, 1]} : vector<2x16x16xf32> to vector<1x16x16xf32>
    %15 = vector.shape_cast %14 : vector<1x16x16xf32> to vector<16x16xf32>
    %c0_20 = arith.constant 0 : index
    %c0_21 = arith.constant 0 : index
    %16 = vector.load %arg4[%c0_20, %c0_21] : memref<16x4xf32, #tpu.memory_space<vmem>>, vector<16x4xf32>
    %cst_22 = arith.constant dense<0.000000e+00> : vector<16x4xf32>
    %17 = tpu.matmul %15, %16, %cst_22 {dimension_numbers = #tpu.dot_dimension_numbers<[1], [0], [0], [1], [0, 0, 1, 1], [], []>} : vector<16x16xf32>, vector<16x4xf32>, vector<16x4xf32> -> vector<16x4xf32>
    %c0_23 = arith.constant 0 : index
    %c0_24 = arith.constant 0 : index
    %18 = vector.load %arg5[%c0_23, %c0_24] : memref<1x4xf32, #tpu.memory_space<vmem>>, vector<1x4xf32>
    %19 = vector.broadcast %18 : vector<1x4xf32> to vector<16x4xf32>
    %20 = arith.addf %17, %19 : vector<16x4xf32>
    %cst_25 = arith.constant 0.000000e+00 : f32
    %21 = vector.broadcast %cst_25 : f32 to vector<16x4xf32>
    %22 = arith.maximumf %20, %21 : vector<16x4xf32>
    %23 = vector.shape_cast %22 : vector<16x4xf32> to vector<1x16x4xf32>
    %24 = vector.broadcast %11 : f32 to vector<1x16x4xf32>
    %25 = arith.mulf %23, %24 : vector<1x16x4xf32>
    %c0_26 = arith.constant 0 : index
    %c1_27 = arith.constant 1 : index
    %c0_28 = arith.constant 0 : index
    %26 = vector.load %arg11[%c0_26, %c1_27, %c0_28] : memref<19x24x4xf32, #tpu.memory_space<vmem>>, vector<1x16x4xf32>
    tpu.vector_store %arg11[%c0_26, %c1_27, %c0_28], %25 {strides = array<i32>} : memref<19x24x4xf32, #tpu.memory_space<vmem>>, vector<1x16x4xf32>,
    %27 = vector.extract_strided_slice %3 {offsets = [1, 0, 0], sizes = [1, 16, 16], strides = [1, 1, 1]} : vector<2x16x16xf32> to vector<1x16x16xf32>
    %28 = vector.shape_cast %27 : vector<1x16x16xf32> to vector<16x16xf32>
    %c0_29 = arith.constant 0 : index
    %c0_30 = arith.constant 0 : index
    %29 = vector.load %arg4[%c0_29, %c0_30] : memref<16x4xf32, #tpu.memory_space<vmem>>, vector<16x4xf32>
    %cst_31 = arith.constant dense<0.000000e+00> : vector<16x4xf32>
    %30 = tpu.matmul %28, %29, %cst_31 {dimension_numbers = #tpu.dot_dimension_numbers<[1], [0], [0], [1], [0, 0, 1, 1], [], []>} : vector<16x16xf32>, vector<16x4xf32>, vector<16x4xf32> -> vector<16x4xf32>
    %c0_32 = arith.constant 0 : index
    %c0_33 = arith.constant 0 : index
    %31 = vector.load %arg5[%c0_32, %c0_33] : memref<1x4xf32, #tpu.memory_space<vmem>>, vector<1x4xf32>
    %32 = vector.broadcast %31 : vector<1x4xf32> to vector<16x4xf32>
    %33 = arith.addf %30, %32 : vector<16x4xf32>
    %cst_34 = arith.constant 0.000000e+00 : f32
    %34 = vector.broadcast %cst_34 : f32 to vector<16x4xf32>
    %35 = arith.maximumf %33, %34 : vector<16x4xf32>
    %36 = vector.shape_cast %35 : vector<16x4xf32> to vector<1x16x4xf32>
    %37 = vector.broadcast %13 : f32 to vector<1x16x4xf32>
    %38 = arith.mulf %36, %37 : vector<1x16x4xf32>
    %c17_35 = arith.constant 17 : index
    %c1_36 = arith.constant 1 : index
    %c0_37 = arith.constant 0 : index
    %39 = vector.load %arg11[%c17_35, %c1_36, %c0_37] : memref<19x24x4xf32, #tpu.memory_space<vmem>>, vector<1x16x4xf32>
    tpu.vector_store %arg11[%c17_35, %c1_36, %c0_37], %38 {strides = array<i32>} : memref<19x24x4xf32, #tpu.memory_space<vmem>>, vector<1x16x4xf32>,
    %40 = vector.shape_cast %1 : vector<16x16x16xf32> to vector<256x16xf32>
    %c0_38 = arith.constant 0 : index
    %c0_39 = arith.constant 0 : index
    %41 = vector.load %arg4[%c0_38, %c0_39] : memref<16x4xf32, #tpu.memory_space<vmem>>, vector<16x4xf32>
    %cst_40 = arith.constant dense<0.000000e+00> : vector<256x4xf32>
    %42 = tpu.matmul %40, %41, %cst_40 {dimension_numbers = #tpu.dot_dimension_numbers<[1], [0], [0], [1], [0, 0, 1, 1], [], []>} : vector<256x16xf32>, vector<16x4xf32>, vector<256x4xf32> -> vector<256x4xf32>
    %c0_41 = arith.constant 0 : index
    %c0_42 = arith.constant 0 : index
    %43 = vector.load %arg5[%c0_41, %c0_42] : memref<1x4xf32, #tpu.memory_space<vmem>>, vector<1x4xf32>
    %44 = vector.broadcast %43 : vector<1x4xf32> to vector<256x4xf32>
    %45 = arith.addf %42, %44 : vector<256x4xf32>
    %cst_43 = arith.constant 0.000000e+00 : f32
    %46 = vector.broadcast %cst_43 : f32 to vector<256x4xf32>
    %47 = arith.maximumf %45, %46 : vector<256x4xf32>
    %48 = vector.shape_cast %47 : vector<256x4xf32> to vector<16x16x4xf32>
    %c1_44 = arith.constant 1 : index
    %c1_45 = arith.constant 1 : index
    %c0_46 = arith.constant 0 : index
    %49 = vector.load %arg11[%c1_44, %c1_45, %c0_46] : memref<19x24x4xf32, #tpu.memory_space<vmem>>, vector<16x16x4xf32>
    tpu.vector_store %arg11[%c1_44, %c1_45, %c0_46], %48 {strides = array<i32>} : memref<19x24x4xf32, #tpu.memory_space<vmem>>, vector<16x16x4xf32>,
    %c0_47 = arith.constant 0 : index
    %c0_48 = arith.constant 0 : index
    %c0_49 = arith.constant 0 : index
    %50 = vector.load %arg11[%c0_47, %c0_48, %c0_49] : memref<19x24x4xf32, #tpu.memory_space<vmem>>, vector<19x24x4xf32>
    %51 = vector.shape_cast %50 : vector<19x24x4xf32> to vector<456x4xf32>
    %cst_50 = arith.constant 0.000000e+00 : f32
    %52 = vector.broadcast %cst_50 : f32 to vector<264x4xf32>
    %53 = vector.extract_strided_slice %51 {offsets = [0, 0], sizes = [264, 4], strides = [1, 1]} : vector<456x4xf32> to vector<264x4xf32>
    %54 = vector.extract_strided_slice %51 {offsets = [1, 0], sizes = [264, 4], strides = [1, 1]} : vector<456x4xf32> to vector<264x4xf32>
    %55 = vector.extract_strided_slice %51 {offsets = [2, 0], sizes = [264, 4], strides = [1, 1]} : vector<456x4xf32> to vector<264x4xf32>
    %56 = tpu.concatenate %53, %54, %55 in 1 : vector<264x4xf32>, vector<264x4xf32>, vector<264x4xf32> -> vector<264x12xf32>
    %c0_51 = arith.constant 0 : index
    %c0_52 = arith.constant 0 : index
    %c0_53 = arith.constant 0 : index
    %57 = vector.load %arg6[%c0_51, %c0_52, %c0_53] : memref<3x12x4xf32, #tpu.memory_space<vmem>>, vector<1x12x4xf32>
    %58 = vector.shape_cast %57 : vector<1x12x4xf32> to vector<12x4xf32>
    %cst_54 = arith.constant dense<0.000000e+00> : vector<264x4xf32>
    %59 = tpu.matmul %56, %58, %cst_54 {dimension_numbers = #tpu.dot_dimension_numbers<[1], [0], [0], [1], [0, 0, 1, 1], [], []>} : vector<264x12xf32>, vector<12x4xf32>, vector<264x4xf32> -> vector<264x4xf32>
    %60 = arith.addf %52, %59 : vector<264x4xf32>
    %61 = vector.extract_strided_slice %51 {offsets = [24, 0], sizes = [264, 4], strides = [1, 1]} : vector<456x4xf32> to vector<264x4xf32>
    %62 = vector.extract_strided_slice %51 {offsets = [25, 0], sizes = [264, 4], strides = [1, 1]} : vector<456x4xf32> to vector<264x4xf32>
    %63 = vector.extract_strided_slice %51 {offsets = [26, 0], sizes = [264, 4], strides = [1, 1]} : vector<456x4xf32> to vector<264x4xf32>
    %64 = tpu.concatenate %61, %62, %63 in 1 : vector<264x4xf32>, vector<264x4xf32>, vector<264x4xf32> -> vector<264x12xf32>
    %c1_55 = arith.constant 1 : index
    %c0_56 = arith.constant 0 : index
    %c0_57 = arith.constant 0 : index
    %65 = vector.load %arg6[%c1_55, %c0_56, %c0_57] : memref<3x12x4xf32, #tpu.memory_space<vmem>>, vector<1x12x4xf32>
    %66 = vector.shape_cast %65 : vector<1x12x4xf32> to vector<12x4xf32>
    %cst_58 = arith.constant dense<0.000000e+00> : vector<264x4xf32>
    %67 = tpu.matmul %64, %66, %cst_58 {dimension_numbers = #tpu.dot_dimension_numbers<[1], [0], [0], [1], [0, 0, 1, 1], [], []>} : vector<264x12xf32>, vector<12x4xf32>, vector<264x4xf32> -> vector<264x4xf32>
    %68 = arith.addf %60, %67 : vector<264x4xf32>
    %69 = vector.extract_strided_slice %51 {offsets = [48, 0], sizes = [264, 4], strides = [1, 1]} : vector<456x4xf32> to vector<264x4xf32>
    %70 = vector.extract_strided_slice %51 {offsets = [49, 0], sizes = [264, 4], strides = [1, 1]} : vector<456x4xf32> to vector<264x4xf32>
    %71 = vector.extract_strided_slice %51 {offsets = [50, 0], sizes = [264, 4], strides = [1, 1]} : vector<456x4xf32> to vector<264x4xf32>
    %72 = tpu.concatenate %69, %70, %71 in 1 : vector<264x4xf32>, vector<264x4xf32>, vector<264x4xf32> -> vector<264x12xf32>
    %c2 = arith.constant 2 : index
    %c0_59 = arith.constant 0 : index
    %c0_60 = arith.constant 0 : index
    %73 = vector.load %arg6[%c2, %c0_59, %c0_60] : memref<3x12x4xf32, #tpu.memory_space<vmem>>, vector<1x12x4xf32>
    %74 = vector.shape_cast %73 : vector<1x12x4xf32> to vector<12x4xf32>
    %cst_61 = arith.constant dense<0.000000e+00> : vector<264x4xf32>
    %75 = tpu.matmul %72, %74, %cst_61 {dimension_numbers = #tpu.dot_dimension_numbers<[1], [0], [0], [1], [0, 0, 1, 1], [], []>} : vector<264x12xf32>, vector<12x4xf32>, vector<264x4xf32> -> vector<264x4xf32>
    %76 = arith.addf %68, %75 : vector<264x4xf32>
    %c0_62 = arith.constant 0 : index
    %c0_63 = arith.constant 0 : index
    %77 = vector.load %arg7[%c0_62, %c0_63] : memref<1x4xf32, #tpu.memory_space<vmem>>, vector<1x4xf32>
    %78 = vector.broadcast %77 : vector<1x4xf32> to vector<264x4xf32>
    %79 = arith.addf %76, %78 : vector<264x4xf32>
    %cst_64 = arith.constant 0.000000e+00 : f32
    %80 = vector.broadcast %cst_64 : f32 to vector<264x4xf32>
    %81 = arith.maximumf %79, %80 : vector<264x4xf32>
    %82 = vector.shape_cast %81 : vector<264x4xf32> to vector<11x24x4xf32>
    %83 = vector.extract_strided_slice %82 {offsets = [0, 0, 0], sizes = [11, 16, 4], strides = [1, 1, 1]} : vector<11x24x4xf32> to vector<11x16x4xf32>
    %84 = vector.shape_cast %83 : vector<11x16x4xf32> to vector<176x4xf32>
    %c0_65 = arith.constant 0 : index
    %c0_66 = arith.constant 0 : index
    %85 = vector.load %arg8[%c0_65, %c0_66] : memref<4x16xf32, #tpu.memory_space<vmem>>, vector<4x16xf32>
    %cst_67 = arith.constant dense<0.000000e+00> : vector<176x16xf32>
    %86 = tpu.matmul %84, %85, %cst_67 {dimension_numbers = #tpu.dot_dimension_numbers<[1], [0], [0], [1], [0, 0, 1, 1], [], []>} : vector<176x4xf32>, vector<4x16xf32>, vector<176x16xf32> -> vector<176x16xf32>
    %c0_68 = arith.constant 0 : index
    %c0_69 = arith.constant 0 : index
    %87 = vector.load %arg9[%c0_68, %c0_69] : memref<1x16xf32, #tpu.memory_space<vmem>>, vector<1x16xf32>
    %88 = vector.broadcast %87 : vector<1x16xf32> to vector<176x16xf32>
    %89 = arith.addf %86, %88 : vector<176x16xf32>
    %90 = vector.extract_strided_slice %1 {offsets = [0, 0, 0], sizes = [11, 16, 16], strides = [1, 1, 1]} : vector<16x16x16xf32> to vector<11x16x16xf32>
    %91 = vector.shape_cast %90 : vector<11x16x16xf32> to vector<176x16xf32>
    %92 = arith.addf %89, %91 : vector<176x16xf32>
    %cst_70 = arith.constant 0.000000e+00 : f32
    %93 = vector.broadcast %cst_70 : f32 to vector<176x16xf32>
    %94 = arith.maximumf %92, %93 : vector<176x16xf32>
    %95 = vector.shape_cast %94 : vector<176x16xf32> to vector<11x16x16xf32>
    %c0_71 = arith.constant 0 : index
    %c0_72 = arith.constant 0 : index
    %c0_73 = arith.constant 0 : index
    %c0_74 = arith.constant 0 : index
    %96 = vector.load %arg10[%c0_71, %c0_72, %c0_73, %c0_74] : memref<1x16x16x16xf32, #tpu.memory_space<vmem>>, vector<1x11x16x16xf32>
    %97 = vector.shape_cast %96 : vector<1x11x16x16xf32> to vector<11x16x16xf32>
    %98 = vector.shape_cast %95 : vector<11x16x16xf32> to vector<1x11x16x16xf32>
    tpu.vector_store %arg10[%c0_71, %c0_72, %c0_73, %c0_74], %98 {strides = array<i32>} : memref<1x16x16x16xf32, #tpu.memory_space<vmem>>, vector<1x11x16x16xf32>,
    %cst_75 = arith.constant 0.000000e+00 : f32
    %99 = vector.broadcast %cst_75 : f32 to vector<120x4xf32>
    %100 = vector.extract_strided_slice %51 {offsets = [264, 0], sizes = [120, 4], strides = [1, 1]} : vector<456x4xf32> to vector<120x4xf32>
    %101 = vector.extract_strided_slice %51 {offsets = [265, 0], sizes = [120, 4], strides = [1, 1]} : vector<456x4xf32> to vector<120x4xf32>
    %102 = vector.extract_strided_slice %51 {offsets = [266, 0], sizes = [120, 4], strides = [1, 1]} : vector<456x4xf32> to vector<120x4xf32>
    %103 = tpu.concatenate %100, %101, %102 in 1 : vector<120x4xf32>, vector<120x4xf32>, vector<120x4xf32> -> vector<120x12xf32>
    %c0_76 = arith.constant 0 : index
    %c0_77 = arith.constant 0 : index
    %c0_78 = arith.constant 0 : index
    %104 = vector.load %arg6[%c0_76, %c0_77, %c0_78] : memref<3x12x4xf32, #tpu.memory_space<vmem>>, vector<1x12x4xf32>
    %105 = vector.shape_cast %104 : vector<1x12x4xf32> to vector<12x4xf32>
    %cst_79 = arith.constant dense<0.000000e+00> : vector<120x4xf32>
    %106 = tpu.matmul %103, %105, %cst_79 {dimension_numbers = #tpu.dot_dimension_numbers<[1], [0], [0], [1], [0, 0, 1, 1], [], []>} : vector<120x12xf32>, vector<12x4xf32>, vector<120x4xf32> -> vector<120x4xf32>
    %107 = arith.addf %99, %106 : vector<120x4xf32>
    %108 = vector.extract_strided_slice %51 {offsets = [288, 0], sizes = [120, 4], strides = [1, 1]} : vector<456x4xf32> to vector<120x4xf32>
    %109 = vector.extract_strided_slice %51 {offsets = [289, 0], sizes = [120, 4], strides = [1, 1]} : vector<456x4xf32> to vector<120x4xf32>
    %110 = vector.extract_strided_slice %51 {offsets = [290, 0], sizes = [120, 4], strides = [1, 1]} : vector<456x4xf32> to vector<120x4xf32>
    %111 = tpu.concatenate %108, %109, %110 in 1 : vector<120x4xf32>, vector<120x4xf32>, vector<120x4xf32> -> vector<120x12xf32>
    %c1_80 = arith.constant 1 : index
    %c0_81 = arith.constant 0 : index
    %c0_82 = arith.constant 0 : index
    %112 = vector.load %arg6[%c1_80, %c0_81, %c0_82] : memref<3x12x4xf32, #tpu.memory_space<vmem>>, vector<1x12x4xf32>
    %113 = vector.shape_cast %112 : vector<1x12x4xf32> to vector<12x4xf32>
    %cst_83 = arith.constant dense<0.000000e+00> : vector<120x4xf32>
    %114 = tpu.matmul %111, %113, %cst_83 {dimension_numbers = #tpu.dot_dimension_numbers<[1], [0], [0], [1], [0, 0, 1, 1], [], []>} : vector<120x12xf32>, vector<12x4xf32>, vector<120x4xf32> -> vector<120x4xf32>
    %115 = arith.addf %107, %114 : vector<120x4xf32>
    %116 = vector.extract_strided_slice %51 {offsets = [312, 0], sizes = [120, 4], strides = [1, 1]} : vector<456x4xf32> to vector<120x4xf32>
    %117 = vector.extract_strided_slice %51 {offsets = [313, 0], sizes = [120, 4], strides = [1, 1]} : vector<456x4xf32> to vector<120x4xf32>
    %118 = vector.extract_strided_slice %51 {offsets = [314, 0], sizes = [120, 4], strides = [1, 1]} : vector<456x4xf32> to vector<120x4xf32>
    %119 = tpu.concatenate %116, %117, %118 in 1 : vector<120x4xf32>, vector<120x4xf32>, vector<120x4xf32> -> vector<120x12xf32>
    %c2_84 = arith.constant 2 : index
    %c0_85 = arith.constant 0 : index
    %c0_86 = arith.constant 0 : index
    %120 = vector.load %arg6[%c2_84, %c0_85, %c0_86] : memref<3x12x4xf32, #tpu.memory_space<vmem>>, vector<1x12x4xf32>
    %121 = vector.shape_cast %120 : vector<1x12x4xf32> to vector<12x4xf32>
    %cst_87 = arith.constant dense<0.000000e+00> : vector<120x4xf32>
    %122 = tpu.matmul %119, %121, %cst_87 {dimension_numbers = #tpu.dot_dimension_numbers<[1], [0], [0], [1], [0, 0, 1, 1], [], []>} : vector<120x12xf32>, vector<12x4xf32>, vector<120x4xf32> -> vector<120x4xf32>
    %123 = arith.addf %115, %122 : vector<120x4xf32>
    %c0_88 = arith.constant 0 : index
    %c0_89 = arith.constant 0 : index
    %124 = vector.load %arg7[%c0_88, %c0_89] : memref<1x4xf32, #tpu.memory_space<vmem>>, vector<1x4xf32>
    %125 = vector.broadcast %124 : vector<1x4xf32> to vector<120x4xf32>
    %126 = arith.addf %123, %125 : vector<120x4xf32>
    %cst_90 = arith.constant 0.000000e+00 : f32
    %127 = vector.broadcast %cst_90 : f32 to vector<120x4xf32>
    %128 = arith.maximumf %126, %127 : vector<120x4xf32>
    %129 = vector.shape_cast %128 : vector<120x4xf32> to vector<5x24x4xf32>
    %130 = vector.extract_strided_slice %129 {offsets = [0, 0, 0], sizes = [5, 16, 4], strides = [1, 1, 1]} : vector<5x24x4xf32> to vector<5x16x4xf32>
    %131 = vector.shape_cast %130 : vector<5x16x4xf32> to vector<80x4xf32>
    %c0_91 = arith.constant 0 : index
    %c0_92 = arith.constant 0 : index
    %132 = vector.load %arg8[%c0_91, %c0_92] : memref<4x16xf32, #tpu.memory_space<vmem>>, vector<4x16xf32>
    %cst_93 = arith.constant dense<0.000000e+00> : vector<80x16xf32>
    %133 = tpu.matmul %131, %132, %cst_93 {dimension_numbers = #tpu.dot_dimension_numbers<[1], [0], [0], [1], [0, 0, 1, 1], [], []>} : vector<80x4xf32>, vector<4x16xf32>, vector<80x16xf32> -> vector<80x16xf32>
    %c0_94 = arith.constant 0 : index
    %c0_95 = arith.constant 0 : index
    %134 = vector.load %arg9[%c0_94, %c0_95] : memref<1x16xf32, #tpu.memory_space<vmem>>, vector<1x16xf32>
    %135 = vector.broadcast %134 : vector<1x16xf32> to vector<80x16xf32>
    %136 = arith.addf %133, %135 : vector<80x16xf32>
    %137 = vector.extract_strided_slice %1 {offsets = [11, 0, 0], sizes = [5, 16, 16], strides = [1, 1, 1]} : vector<16x16x16xf32> to vector<5x16x16xf32>
    %138 = vector.shape_cast %137 : vector<5x16x16xf32> to vector<80x16xf32>
    %139 = arith.addf %136, %138 : vector<80x16xf32>
    %cst_96 = arith.constant 0.000000e+00 : f32
    %140 = vector.broadcast %cst_96 : f32 to vector<80x16xf32>
    %141 = arith.maximumf %139, %140 : vector<80x16xf32>
    %142 = vector.shape_cast %141 : vector<80x16xf32> to vector<5x16x16xf32>
    %c0_97 = arith.constant 0 : index
    %c11 = arith.constant 11 : index
    %c0_98 = arith.constant 0 : index
    %c0_99 = arith.constant 0 : index
    %143 = vector.load %arg10[%c0_97, %c11, %c0_98, %c0_99] : memref<1x16x16x16xf32, #tpu.memory_space<vmem>>, vector<1x5x16x16xf32>
    %144 = vector.shape_cast %143 : vector<1x5x16x16xf32> to vector<5x16x16xf32>
    %145 = vector.shape_cast %142 : vector<5x16x16xf32> to vector<1x5x16x16xf32>
    tpu.vector_store %arg10[%c0_97, %c11, %c0_98, %c0_99], %145 {strides = array<i32>} : memref<1x16x16x16xf32, #tpu.memory_space<vmem>>, vector<1x5x16x16xf32>,
    return
  }
  func.func @transform_0(%arg0: i32, %arg1: i32) -> (i32, i32, i32, i32) {
    %c0_i32 = arith.constant 0 : i32
    %c0_i32_0 = arith.constant 0 : i32
    %c0_i32_1 = arith.constant 0 : i32
    return %arg0, %arg1, %c0_i32, %c0_i32_0 : i32, i32, i32, i32
  }
  func.func @transform_1(%arg0: i32, %arg1: i32) -> (i32, i32, i32, i32) {
    %c0_i32 = arith.constant 0 : i32
    %c0_i32_0 = arith.constant 0 : i32
    %c0_i32_1 = arith.constant 0 : i32
    return %arg0, %arg1, %c0_i32, %c0_i32_0 : i32, i32, i32, i32
  }
  func.func @transform_2(%arg0: i32, %arg1: i32) -> (i32, i32) {
    %c0_i32 = arith.constant 0 : i32
    %c0_i32_0 = arith.constant 0 : i32
    %c0_i32_1 = arith.constant 0 : i32
    return %c0_i32, %c0_i32_0 : i32, i32
  }
  func.func @transform_3(%arg0: i32, %arg1: i32) -> (i32, i32) {
    %c0_i32 = arith.constant 0 : i32
    %c0_i32_0 = arith.constant 0 : i32
    %c0_i32_1 = arith.constant 0 : i32
    return %c0_i32, %c0_i32_0 : i32, i32
  }
  func.func @transform_4(%arg0: i32, %arg1: i32) -> (i32, i32, i32) {
    %c0_i32 = arith.constant 0 : i32
    %c0_i32_0 = arith.constant 0 : i32
    %c0_i32_1 = arith.constant 0 : i32
    %c0_i32_2 = arith.constant 0 : i32
    return %c0_i32, %c0_i32_0, %c0_i32_1 : i32, i32, i32
  }
  func.func @transform_5(%arg0: i32, %arg1: i32) -> (i32, i32) {
    %c0_i32 = arith.constant 0 : i32
    %c0_i32_0 = arith.constant 0 : i32
    %c0_i32_1 = arith.constant 0 : i32
    return %c0_i32, %c0_i32_0 : i32, i32
  }
  func.func @transform_6(%arg0: i32, %arg1: i32) -> (i32, i32) {
    %c0_i32 = arith.constant 0 : i32
    %c0_i32_0 = arith.constant 0 : i32
    %c0_i32_1 = arith.constant 0 : i32
    return %c0_i32, %c0_i32_0 : i32, i32
  }
  func.func @transform_7(%arg0: i32, %arg1: i32) -> (i32, i32) {
    %c0_i32 = arith.constant 0 : i32
    %c0_i32_0 = arith.constant 0 : i32
    %c0_i32_1 = arith.constant 0 : i32
    return %c0_i32, %c0_i32_0 : i32, i32
  }
  func.func @transform_8(%arg0: i32, %arg1: i32) -> (i32, i32, i32, i32) {
    %c0_i32 = arith.constant 0 : i32
    %c0_i32_0 = arith.constant 0 : i32
    %c0_i32_1 = arith.constant 0 : i32
    return %arg0, %arg1, %c0_i32, %c0_i32_0 : i32, i32, i32, i32
  }
}

</mosaic_0001>

<bundles_post_ra>
// kernel: tpu_custom_call.1
= control target key start
LH: loop header
LB: loop body
LE: loop exit
PB: predicated region body
PF: predicated region fallthrough
CT: control target
= control target key end

     0   :  { %13 = vsyncpa [#allocation4], 0  ;;  %s7228_s0 = inlined_call_operand.hbm [shape: f32[2,16,16,16], index: 0, kind: input, shape index: {}]   ;;  %s7229_s1 = inlined_call_operand.vmem [shape: f32[2,2,16,16], index: 1, kind: input, shape index: {}]   ;;  %s7230_s2 = inlined_call_operand.vmem [shape: f32[16,4], index: 2, kind: input, shape index: {}]   ;;  %s7231_s3 = inlined_call_operand.vmem [shape: f32[1,4], index: 3, kind: input, shape index: {}]   ;;  %s7232_s4 = inlined_call_operand.vmem [shape: f32[3,12,4], index: 4, kind: input, shape index: {}]   ;;  %s7233_s5 = inlined_call_operand.vmem [shape: f32[1,4], index: 5, kind: input, shape index: {}]   ;;  %s7234_s6 = inlined_call_operand.vmem [shape: f32[4,16], index: 6, kind: input, shape index: {}]   ;;  %s7235_s7 = inlined_call_operand.vmem [shape: f32[1,16], index: 7, kind: input, shape index: {}]   ;;  %s7236_s8 = inlined_call_operand.hbm [shape: f32[2,16,16,16], index: 8, kind: output, shape index: {}]  }
   0x1   :  { %15 = vsyncpa [#allocation4 + $0x1], 0 }
   0x2   :  { %16 = vsyncpa [#allocation5], 0 }
   0x3   :  { %18 = vsyncpa [#allocation5 + $0x1], 0  ;;  %s5210_s27 = smov 0   ;;  %s5212_s28 = smov 0  }
   0x4   :  { %s5214_s29 = smov 0   ;;  %s5216_s30 = smov 0  }
   0x5   :  { %s5218_s9 = smov 0   ;;  %s5220_s10 = smov 0  }
   0x6 LB: > { %s3820_s11 = sadd.s32 4294967295, %s5152_s10   ;;  %s3821_s12 = sadd.s32 4294967294, %s5152_s10   ;;  %s5152_s10 = sphi %s5220_s10, %s24_s10   ;;  %s5148_s9 = sphi %s5218_s9, %s7271_s9   ;;  %s5144_s30 = sphi %s5216_s30, %s7270_s30   ;;  %s5140_s29 = sphi %s5214_s29, %s7269_s29   ;;  %s5136_s28 = sphi %s5212_s28, %s7268_s28   ;;  %s5132_s27 = sphi %s5210_s27, %s7267_s27  }
   0x7   : > { %s36_s13 = sadd.s32 1, %s5148_s9  ;;  %s45_s14 = sadd.s32 1, %s5140_s29 }
   0x8   : > { %p38_p0 = scmp.ge.s32.totalorder %s36_s13, 2  ;;  %p52_p1 = scmp.ne.s32.totalorder %s5140_s29, %s5136_s28 }
   0x9   : > { %p53_p2 = scmp.eq.s32.totalorder %s5152_s10, 0  ;;  %p58_p3 = scmp.ne.s32.totalorder %s5136_s28, %s5132_s27 }
   0xa   : > { %s7273_s13 = smov (%p38_p0, %s36_s13), 0  ;;  %p59_p5 = scmp.eq.s32.totalorder %s3820_s11, 0 }
   0xb   : > { %p5251_p4 = por %p53_p2, %p52_p1  ;;  %s40_s16 = ssub.s32 %s5148_s9, %s7273_s13 }
   0xc   : > { %p238_p6 = scmp.eq.s32.totalorder %s3820_s11, 1  ;;  %p43_p7 = scmp.eq.s32.totalorder %s40_s16, 0 }
   0xd   : > { %p5257_p8 = por %p59_p5, %p58_p3  ;;  %p244_p10 = scmp.eq.s32.totalorder %s3821_s12, 1 }
   0xe   : > { %p5261_p9 = por %p238_p6, %p52_p1  ;;  %p4941_p13 = scmp.lt.s32.totalorder %s5152_s10, 2 }
   0xf   : > { %s5266_s19 = scalar_select %p43_p7, %s5140_s29, %s45_s14  }
  0x10   : > { %s7248_s18 = scalar_select %p5261_p9, 1, 0 }
  0x11   : > { %p5268_p11 = por %p244_p10, %p58_p3  ;;  %s282_s21 = sand.u32 1, %s5140_s29  }
  0x12   : > { %s3824_s22 = sshll.u32 %s282_s21, 8  ;;  %s4082_s23 = sshll.u32 %s5148_s9, 12 }
  0x13   : > { %s7249_s20 = scalar_select %p5268_p11, 1, 0 }
  0x14   : > { %s5279_s26 = scalar_lea.hbm %s7228_s0, %s4082_s23  ;;  %s286_s11 = scalar_lea.vmem [#allocation3], %s3824_s22 }
  0x15   : > { %s296_s12 = sshll.u32 %s286_s11, 4  ;;  %p5285_p0 = pnand %p4941_p13, %p5251_p4  ;;  %s5281_s12 = int_to_ptr.vmem [resolvable:$true] %s296_s12 }
  0x16   : > { %s5290_s16 = scalar_lea.sflag [#allocation4], %s282_s21  ;;  %s5040_s23 = scalar_lea.hbm %s5279_s26, 4096 }
  0x17   : > { %p5041_p2 = scmp.ne.s32.totalorder %s5279_s26, %s5040_s23  ;;  %p5042_p3 = pneg %p5285_p0 }
  0x18   : > { %s5045_s15 = scalar_lea.hbm %s7228_s0, 8192  ;;  %p5046_p4 = scmp.lt.u32.totalorder %s5279_s26, %s7228_s0 }
  0x19   : > { %p5043_p5 = pnand %p5042_p3, %p5041_p2  ;;  %p5047_p7 = scmp.lt.u32.totalorder %s5045_s15, %s5040_s23 }
  0x1a   : > { %p5049_p13 = scmp.lt.u32.totalorder %s5040_s23, %s5279_s26 }
  0x1b   : > { %p5044_p6 = pneg %p5043_p5  ;;  %p5048_p10 = por %p5047_p7, %p5046_p4 }
  0x1d   : > { %p5050_p12 = por %p5049_p13, %p5048_p10 }
  0x1f   : > { %p5051_p1 = pnand %p5050_p12, %p5044_p6 }
  0x21   : > { %5054 = shalt.err (!%p5051_p1)
}
  0x22   : > { %s5055_s21 = scalar_lea.vmem %s5281_s12, 4096  ;;  %s5154_s22 = smov [#allocation3]  }
  0x23   : > { %p5056_p2 = scmp.ne.s32.totalorder %s5281_s12, %s5055_s21  ;;  %s5060_s24 = sshll.u32 %s5154_s22, 4  ;;  %s5061_s24 = int_to_ptr.vmem [resolvable:$false] %s5060_s24 }
  0x24   : > { %s5062_s25 = scalar_lea.vmem %s5061_s24, 8192  ;;  %p5063_p9 = scmp.lt.s32.totalorder %s5281_s12, %s5061_s24 }
  0x25   : > { %p5058_p5 = pnand %p5056_p2, %p5042_p3  ;;  %p5064_p4 = scmp.lt.s32.totalorder %s5062_s25, %s5055_s21 }
  0x27   : > { %p5059_p11 = pneg %p5058_p5  ;;  %p5065_p7 = por %p5064_p4, %p5063_p9 }
  0x29   : > { %p5066_p10 = pnand %p5065_p7, %p5059_p11 }
  0x2b   : > { %5069 = shalt.err (!%p5066_p10)
}
  0x2c   : > { %s5155_s23 = smov 128   ;;  %s5156_s15 = smov 8  }
  0x2d   : > { %4936 = dma.hbm_to_vmem [thread:$0]  (!%p5285_p0), %s5279_s26, 4096, %s5281_s12, %s5290_s16, %s5155_s23, %s5155_s23, %s5156_s15  }
  0x2e   : > { %p318_p12 = scmp.lt.s32.totalorder %s5152_s10, 3  ;;  %p7251_p1 = scmp.ge.s32.totalorder %s5152_s10, 1 }
  0x30   : > { %p319_p3 = pnand %p7251_p1, %p318_p12 }
  0x32   : > { %322 = sbr.rel (%p319_p3) target bundleno = 1464 (0x5b8), region = 52 }
  0x39   : > { %s5322_s11 = sand.u32 1, %s5136_s28  }
  0x3a   : > { %s3828_s21 = sshll.u32 %s5322_s11, 8  ;;  %s325_s22 = scalar_lea.sflag [#allocation4], %s5322_s11 }
  0x3b   : > { %s5328_s24 = scalar_lea.vmem [#allocation3], %s3828_s21 }
  0x3c   : > { %5123 = dma.done.wait (%p5257_p8), %s325_s22, 4096  }
  0x3d   : > { %5125 = vsyncadd (%p5257_p8), %s325_s22, 4294963200  ;;  %vm461_vm0 = vcmask 31744   ;;  %p373_p9 = scmp.lt.s32.totalorder %s5144_s30, 1  ;;  %v7240_v0 = vmov 0.0   ;;  %vm477_vm1 = vcmask 130048   ;;  %v468_v1 = vld [vmem:[%s7230_s2] sm:$0xff] }
  0x3e   : > { %462 = vst.msk [vmem:[#allocation2 + $0x1b1] sm:$0xff] %vm461_vm0, %v7240_v0  ;;  %v469_v2 = vld [vmem:[%s7230_s2 + $0x8] sm:$0xff]  ;;  %v385_v7 = vld [vmem:[%s5328_s24 + $0x8] sm:$0xff]  ;;  %v386_v8 = vld [vmem:[%s5328_s24 + $0x10] sm:$0xff]  ;;  %vm440_vm2 = vcmask 30720   ;;  %vm420_vm3 = vcmask 24576  }
  0x3f   : > { %s374_s26 = scalar_select %p373_p9, %s5144_s30, 1  ;;  %v4891_v4 = vpack.c.bf16 %v469_v2, %v468_v1  ;;  %v384_v6 = vld [vmem:[%s5328_s24] sm:$0xff]  ;;  %v387_v12 = vld [vmem:[%s5328_s24 + $0x18] sm:$0xff]  ;;  %v413_v14 = vld [vmem:[%s5328_s24 + $0xe8] sm:$0xff]  ;;  %442 = vst.msk [vmem:[#allocation2 + $0x29] sm:$0x7f] %vm440_vm2, %v7240_v0 }
  0x40   : > { %v412_v11 = vld [vmem:[%s5328_s24 + $0xe0] sm:$0xff]  ;;  %v414_v15 = vld [vmem:[%s5328_s24 + $0xf0] sm:$0xff]  ;;  %v389_v16 = vld [vmem:[%s5328_s24 + $0x28] sm:$0xff]  ;;  %441 = vst.msk [vmem:[#allocation2 + $0x11] sm:$0x7f] %vm440_vm2, %v7240_v0  ;;  %v7238_v45 = vmov 0.0|0.0  }
  0x41   : > { %s4083_s12 = sshll.u32 %s374_s26, 5  ;;  %4892 = vmatprep.subr.bf16.mxu0 %v4891_v4  ;;  %4896 = vmatprep.subr.bf16.mxu1 %v4891_v4  ;;  %v388_v13 = vld [vmem:[%s5328_s24 + $0x20] sm:$0xff]  ;;  %v390_v17 = vld [vmem:[%s5328_s24 + $0x30] sm:$0xff]  ;;  %v415_v18 = vld [vmem:[%s5328_s24 + $0xf8] sm:$0xff]  ;;  %443 = vst.msk [vmem:[#allocation2 + $0x41] sm:$0x7f] %vm440_vm2, %v7240_v0 }
  0x42   : > { %s381_s25 = scalar_lea.vmem %s7229_s1, %s4083_s12  ;;  %4894 = vmatpush3.bf16.msra.mxu0 %v4891_v4  ;;  %4898 = vmatpush3.bf16.msra.mxu1 %v4891_v4  ;;  %v391_v19 = vld [vmem:[%s5328_s24 + $0x38] sm:$0xff]  ;;  %v392_v20 = vld [vmem:[%s5328_s24 + $0x40] sm:$0xff]  ;;  %v393_v21 = vld [vmem:[%s5328_s24 + $0x48] sm:$0xff]  ;;  %444 = vst.msk [vmem:[#allocation2 + $0x59] sm:$0x7f] %vm440_vm2, %v7240_v0  ;;  %vm1693_vm4 = vcmask 1043456  }
  0x43   : > { %v416_v3 = vld [vmem:[%s381_s25] sm:$0xff]  ;;  %v417_v5 = vld [vmem:[%s381_s25 + $0x8] sm:$0xff]  ;;  %4900 = vmatprep.subr.bf16.mxu0 %v4891_v4  ;;  %4927 = vmatprep.subr.bf16.mxu1 %v4891_v4  ;;  %v418_v9 = vld [vmem:[%s381_s25 + $0x10] sm:$0xff]  ;;  %445 = vst.msk [vmem:[#allocation2 + $0x71] sm:$0x7f] %vm440_vm2, %v7240_v0  ;;  %vm5159_vm5 = vmmov 1  }
  0x44   : > { %4321 = vmatprep.mubr.msk.f32.mxu0 %vm477_vm1, %v416_v3  ;;  %4328 = vmatprep.mubr.msk.f32.mxu1 %vm477_vm1, %v418_v9  ;;  %v419_v10 = vld [vmem:[%s381_s25 + $0x18] sm:$0xff]  ;;  %v395_v23 = vld [vmem:[%s5328_s24 + $0x58] sm:$0xff]  ;;  %v396_v24 = vld [vmem:[%s5328_s24 + $0x60] sm:$0xff]  ;;  %446 = vst.msk [vmem:[#allocation2 + $0x89] sm:$0x7f] %vm440_vm2, %v7240_v0  ;;  %vm5160_vm7 = vmmov 0  }
  0x45   : > { %4322 = vmatmul.mubr.msk.f32.vlgmr.msra.gmra.mrb[0].mxu0 %vm477_vm1, %v417_v5  ;;  %4329 = vmatmul.mubr.msk.f32.vlgmr.msra.gmra.mrb[0].mxu1 %vm477_vm1, %v419_v10  ;;  %v394_v22 = vld [vmem:[%s5328_s24 + $0x50] sm:$0xff]  ;;  %v397_v25 = vld [vmem:[%s5328_s24 + $0x68] sm:$0xff]  ;;  %v399_v27 = vld [vmem:[%s5328_s24 + $0x78] sm:$0xff]  ;;  %447 = vst.msk [vmem:[#allocation2 + $0xa1] sm:$0x7f] %vm440_vm2, %v7240_v0  ;;  %vm1148_vm8 = vcmask 1046528  }
  0x46   : > { %4902 = vmatpush3.bf16.msra.mxu0 %v4891_v4  ;;  %4335 = vmatprep.mubr.msk.f32.mxu0 %vm477_vm1, %v384_v6  ;;  %v398_v26 = vld [vmem:[%s5328_s24 + $0x70] sm:$0xff]  ;;  %v400_v28 = vld [vmem:[%s5328_s24 + $0x80] sm:$0xff]  ;;  %v401_v29 = vld [vmem:[%s5328_s24 + $0x88] sm:$0xff]  ;;  %448 = vst.msk [vmem:[#allocation2 + $0xb9] sm:$0x7f] %vm440_vm2, %v7240_v0  ;;  %s5161_s15 = smov 4  }
  0x47   : > { %4928 = vmatpush3.bf16.msra.mxu1 %v4891_v4  ;;  %4377 = vmatprep.mubr.msk.f32.mxu1 %vm477_vm1, %v412_v11  ;;  %v402_v30 = vld [vmem:[%s5328_s24 + $0x90] sm:$0xff]  ;;  %v403_v31 = vld [vmem:[%s5328_s24 + $0x98] sm:$0xff]  ;;  %v404_v32 = vld [vmem:[%s5328_s24 + $0xa0] sm:$0xff]  ;;  %449 = vst.msk [vmem:[#allocation2 + $0xd1] sm:$0x7f] %vm440_vm2, %v7240_v0  ;;  %vm1315_vm9 = vcmask 1045504  }
  0x48   : > { %v405_v33 = vld [vmem:[%s5328_s24 + $0xa8] sm:$0xff]  ;;  %v406_v34 = vld [vmem:[%s5328_s24 + $0xb0] sm:$0xff]  ;;  %v407_v35 = vld [vmem:[%s5328_s24 + $0xb8] sm:$0xff]  ;;  %450 = vst.msk [vmem:[#allocation2 + $0xe9] sm:$0x7f] %vm440_vm2, %v7240_v0  ;;  %4903 = vmatprep.subr.bf16.mxu1 %v7238_v45  ;;  %4907 = vmatprep.subr.bf16.mxu0 %v7238_v45  ;;  %s5162_s17 = smov 8  }
  0x49   : > { %4336 = vmatmul.mubr.msk.f32.vlgmr.msra.gmra.mrb[2].mxu0 %vm477_vm1, %v385_v7  ;;  %v408_v36 = vld [vmem:[%s5328_s24 + $0xc0] sm:$0xff]  ;;  %v409_v37 = vld [vmem:[%s5328_s24 + $0xc8] sm:$0xff]  ;;  %v410_v38 = vld [vmem:[%s5328_s24 + $0xd0] sm:$0xff]  ;;  %451 = vst.msk [vmem:[#allocation2 + $0x101] sm:$0x7f] %vm440_vm2, %v7240_v0  ;;  %vm1515_vm10 = vcmask 64512  }
  0x4a   : > { %4338 = vmatprep.mubr.msk.f32.mxu0 %vm477_vm1, %v386_v8  ;;  %4378 = vmatmul.mubr.msk.f32.vlgmr.msra.gmra.mrb[2].mxu1 %vm477_vm1, %v413_v14  ;;  %v411_v39 = vld [vmem:[%s5328_s24 + $0xd8] sm:$0xff]  ;;  %452 = vst.msk [vmem:[#allocation2 + $0x119] sm:$0x7f] %vm440_vm2, %v7240_v0  ;;  %453 = vst.msk [vmem:[#allocation2 + $0x131] sm:$0x7f] %vm440_vm2, %v7240_v0  ;;  %v3871_v52 = vld [vmem:[%s7232_s4 + $0x10] sm:$0xff] }
  0x4b   : > { %4380 = vmatprep.mubr.msk.f32.mxu1 %vm477_vm1, %v414_v15  ;;  %454 = vst.msk [vmem:[#allocation2 + $0x149] sm:$0x7f] %vm440_vm2, %v7240_v0  ;;  %455 = vst.msk [vmem:[#allocation2 + $0x161] sm:$0x7f] %vm440_vm2, %v7240_v0  ;;  %v5492_v40 = vld [vmem:[%s7231_s3] ss:$0 sm:$0xff] }
  0x4c   : > { %456 = vst.msk [vmem:[#allocation2 + $0x179] sm:$0x7f] %vm440_vm2, %v7240_v0  ;;  %457 = vst.msk [vmem:[#allocation2 + $0x191] sm:$0x7f] %vm440_vm2, %v7240_v0  ;;  %v3872_v53 = vld [vmem:[%s7232_s4 + $0x18] sm:$0xf] }
  0x4d   : > { %4339 = vmatmul.mubr.msk.f32.gmra.mrb[4].mxu0 %vm477_vm1, %v387_v12  ;;  %458 = vst.msk [vmem:[#allocation2 + $0x1a9] sm:$0x7f] %vm440_vm2, %v7240_v0  ;;  %v4904_v56 = vpack.c.bf16 %v3872_v53, %v3871_v52  ;;  %vm5508_vm6 = vmpackc.low %vm1693_vm4, %vm5159_vm5  ;;  %vm1593_vm11 = vcmask 97280   ;;  %s4084_s23 = sshll.u32 %s5144_s30, 12  ;;  %s3696_s30 = scalar_lea.sflag [#allocation5], %s5322_s11 }
  0x4e   : > { %4341 = vmatprep.mubr.msk.f32.mxu0 %vm477_vm1, %v388_v13  ;;  %4381 = vmatmul.mubr.msk.f32.gmra.mrb[4].mxu1 %vm477_vm1, %v415_v18  ;;  %422 = vst.msk [vmem:[#allocation2 + $0x18] sm:$0x1] %vm420_vm3, %v7240_v0  ;;  %421 = vst.msk [vmem:[#allocation2] sm:$0x1] %vm420_vm3, %v7240_v0  ;;  %p7264_p11 = scmp.ne.s32.totalorder %s7248_s18, 0 }
  0x4f   : > { %423 = vst.msk [vmem:[#allocation2 + $0x30] sm:$0x1] %vm420_vm3, %v7240_v0  ;;  %424 = vst.msk [vmem:[#allocation2 + $0x48] sm:$0x1] %vm420_vm3, %v7240_v0  ;;  %4906 = vmatpush3.bf16.msk.msra.mxu1 %vm5508_vm6, %v4904_v56  ;;  %4387 = vmatprep.mubr.msk.f32.mxu1 %vm5160_vm7, %v7240_v0 }
  0x50   : > { %425 = vst.msk [vmem:[#allocation2 + $0x60] sm:$0x1] %vm420_vm3, %v7240_v0  ;;  %426 = vst.msk [vmem:[#allocation2 + $0x78] sm:$0x1] %vm420_vm3, %v7240_v0  ;;  %4911 = vmatprep.subr.bf16.mxu1 %v7238_v45 }
  0x51   : > { %4342 = vmatmul.mubr.msk.f32.gmra.mrb[6].mxu0 %vm477_vm1, %v389_v16  ;;  %427 = vst.msk [vmem:[#allocation2 + $0x90] sm:$0x1] %vm420_vm3, %v7240_v0  ;;  %428 = vst.msk [vmem:[#allocation2 + $0xa8] sm:$0x1] %vm420_vm3, %v7240_v0 }
  0x52   : > { %4344 = vmatprep.mubr.msk.f32.mxu0 %vm477_vm1, %v390_v17  ;;  %429 = vst.msk [vmem:[#allocation2 + $0xc0] sm:$0x1] %vm420_vm3, %v7240_v0  ;;  %430 = vst.msk [vmem:[#allocation2 + $0xd8] sm:$0x1] %vm420_vm3, %v7240_v0 }
  0x53   : > { %431 = vst.msk [vmem:[#allocation2 + $0xf0] sm:$0x1] %vm420_vm3, %v7240_v0  ;;  %432 = vst.msk [vmem:[#allocation2 + $0x108] sm:$0x1] %vm420_vm3, %v7240_v0 }
  0x54   : > { %433 = vst.msk [vmem:[#allocation2 + $0x120] sm:$0x1] %vm420_vm3, %v7240_v0  ;;  %434 = vst.msk [vmem:[#allocation2 + $0x138] sm:$0x1] %vm420_vm3, %v7240_v0 }
  0x55   : > { %4345 = vmatmul.mubr.msk.f32.gmra.mrb[8].mxu0 %vm477_vm1, %v391_v19  ;;  %435 = vst.msk [vmem:[#allocation2 + $0x150] sm:$0x1] %vm420_vm3, %v7240_v0  ;;  %436 = vst.msk [vmem:[#allocation2 + $0x168] sm:$0x1] %vm420_vm3, %v7240_v0 }
  0x56   : > { %4347 = vmatprep.mubr.msk.f32.mxu0 %vm477_vm1, %v392_v20  ;;  %437 = vst.msk [vmem:[#allocation2 + $0x180] sm:$0x1] %vm420_vm3, %v7240_v0  ;;  %438 = vst.msk [vmem:[#allocation2 + $0x198] sm:$0x1] %vm420_vm3, %v7240_v0 }
  0x57   : > { %439 = vst.msk [vmem:[#allocation2 + $0x1b0] sm:$0x1] %vm420_vm3, %v7240_v0 }
  0x59   : > { %4348 = vmatmul.mubr.msk.f32.gmra.mrb[10].mxu0 %vm477_vm1, %v393_v21 }
  0x5a   : > { %4350 = vmatprep.mubr.msk.f32.mxu0 %vm477_vm1, %v394_v22 }
  0x5d   : > { %4351 = vmatmul.mubr.msk.f32.gmra.mrb[12].mxu0 %vm477_vm1, %v395_v23 }
  0x5e   : > { %4353 = vmatprep.mubr.msk.f32.mxu0 %vm477_vm1, %v396_v24 }
  0x61   : > { %4354 = vmatmul.mubr.msk.f32.gmra.mrb[14].mxu0 %vm477_vm1, %v397_v25 }
  0x62   : > { %4356 = vmatprep.mubr.msk.f32.mxu0 %vm477_vm1, %v398_v26 }
  0x65   : > { %4357 = vmatmul.mubr.msk.f32.gmra.mrb[16].mxu0 %vm477_vm1, %v399_v27 }
  0x66   : > { %4359 = vmatprep.mubr.msk.f32.mxu0 %vm477_vm1, %v400_v28 }
  0x69   : > { %4360 = vmatmul.mubr.msk.f32.gmra.mrb[18].mxu0 %vm477_vm1, %v401_v29 }
  0x6a   : > { %4362 = vmatprep.mubr.msk.f32.mxu0 %vm477_vm1, %v402_v30 }
  0x6d   : > { %4363 = vmatmul.mubr.msk.f32.gmra.mrb[20].mxu0 %vm477_vm1, %v403_v31 }
  0x6e   : > { %4365 = vmatprep.mubr.msk.f32.mxu0 %vm477_vm1, %v404_v32 }
  0x71   : > { %4366 = vmatmul.mubr.msk.f32.gmra.mrb[22].mxu0 %vm477_vm1, %v405_v33 }
  0x72   : > { %4368 = vmatprep.mubr.msk.f32.mxu0 %vm477_vm1, %v406_v34 }
  0x75   : > { %4369 = vmatmul.mubr.msk.f32.gmra.mrb[24].mxu0 %vm477_vm1, %v407_v35 }
  0x76   : > { %4371 = vmatprep.mubr.msk.f32.mxu0 %vm477_vm1, %v408_v36 }
  0x79   : > { %4372 = vmatmul.mubr.msk.f32.gmra.mrb[26].mxu0 %vm477_vm1, %v409_v37 }
  0x7a   : > { %4374 = vmatprep.mubr.msk.f32.mxu0 %vm477_vm1, %v410_v38 }
  0x7d   : > { %4375 = vmatmul.mubr.msk.f32.gmra.mrb[28].mxu0 %vm477_vm1, %v411_v39 }
  0x7e   : > { %4490 = vmatprep.mubr.msk.f32.mxu0 %vm5160_vm7, %v7240_v0 }
 0x118   : > { %v4323_v41 = vpop.f32.mrb[0].mxu0 }
 0x119   : > { %v556_v42 = vadd.f32 %v4323_v41, %v5492_v40  ;;  %v550_v43 = vpop.f32.mrb[1].mxu0 }
 0x11a   : > { %v551_v44 = vadd.f32 %v5492_v40, %v550_v43 }
 0x11b   : > { %v560_v46 = vmax.f32 %v556_v42, 0.0 }
 0x11c   : > { %v559_v47 = vmax.f32 %v551_v44, 0.0  ;;  %v4337_v48 = vpop.f32.mrb[2].mxu0 }
 0x11d   : > { %v563_v49 = vmul.f32 0.0, %v560_v46  ;;  %v841_v50 = vadd.f32 %v4337_v48, %v5492_v40  ;;  %v835_v51 = vpop.f32.mrb[3].mxu0 }
 0x11e   : > { %v562_v54 = vmul.f32 0.0, %v559_v47  ;;  %v836_v55 = vadd.f32 %v5492_v40, %v835_v51 }
 0x11f   : > { %565 = vst.msk [vmem:[#allocation2 + $0x9] sm:$0xff] %vm461_vm0, %v563_v49  ;;  %v995_v57 = vmax.f32 %v841_v50, 0.0 }
 0x120   : > { %564 = vst.msk [vmem:[#allocation2 + $0x1] sm:$0xff] %vm461_vm0, %v562_v54  ;;  %v994_v59 = vmax.f32 %v836_v55, 0.0  ;;  %v4340_v60 = vpop.f32.mrb[4].mxu0 }
 0x121   : > { %1028 = vst.msk [vmem:[#allocation2 + $0x21] sm:$0xff] %vm461_vm0, %v995_v57  ;;  %v851_v61 = vadd.f32 %v4340_v60, %v5492_v40  ;;  %v845_v62 = vpop.f32.mrb[5].mxu0 }
 0x122   : > { %1027 = vst.msk [vmem:[#allocation2 + $0x19] sm:$0xff] %vm461_vm0, %v994_v59  ;;  %v846_v63 = vadd.f32 %v5492_v40, %v845_v62 }
 0x123   : > { %v997_v1 = vmax.f32 %v851_v61, 0.0 }
 0x124   : > { %v996_v2 = vmax.f32 %v846_v63, 0.0  ;;  %v4343_v3 = vpop.f32.mrb[6].mxu0 }
 0x125   : > { %1030 = vst.msk [vmem:[#allocation2 + $0x39] sm:$0xff] %vm461_vm0, %v997_v1  ;;  %v861_v4 = vadd.f32 %v4343_v3, %v5492_v40  ;;  %v855_v5 = vpop.f32.mrb[7].mxu0 }
 0x126   : > { %1029 = vst.msk [vmem:[#allocation2 + $0x31] sm:$0xff] %vm461_vm0, %v996_v2  ;;  %v856_v6 = vadd.f32 %v5492_v40, %v855_v5 }
 0x127   : > { %v999_v7 = vmax.f32 %v861_v4, 0.0 }
 0x128   : > { %v998_v8 = vmax.f32 %v856_v6, 0.0  ;;  %v5528_v9 = vld [vmem:[#allocation2 + $0x28] sm:$0xff]  ;;  %v4346_v10 = vpop.f32.mrb[8].mxu0 }
 0x129   : > { %1032 = vst.msk [vmem:[#allocation2 + $0x51] sm:$0xff] %vm461_vm0, %v999_v7  ;;  %v5531_v11 = vld [vmem:[#allocation2 + $0x20] sm:$0xff]  ;;  %v1158_v12 = vrot.slane %v5528_v9, 1  ;;  %v5534_v13 = vld [vmem:[#allocation2 + $0x18] sm:$0xff]  ;;  %v871_v14 = vadd.f32 %v4346_v10, %v5492_v40  ;;  %v865_v15 = vpop.f32.mrb[9].mxu0  ;;  %v1325_v19 = vrot.slane %v5528_v9, 2 }
 0x12a   : > { %1031 = vst.msk [vmem:[#allocation2 + $0x49] sm:$0xff] %vm461_vm0, %v998_v8  ;;  %v1156_v16 = vrot.slane %v5531_v11, 1  ;;  %v1154_v17 = vrot.slane %v5534_v13, 1  ;;  %v866_v20 = vadd.f32 %v5492_v40, %v865_v15  ;;  %v1323_v23 = vrot.slane %v5531_v11, 2 }
 0x12b   : > { %v1001_v18 = vmax.f32 %v871_v14, 0.0  ;;  %v1321_v24 = vrot.slane %v5534_v13, 2 }
 0x12c   : > { %v1159_v21 = vsel %vm1148_vm8, %v1156_v16, %v1158_v12  ;;  %v1157_v22 = vsel %vm1148_vm8, %v1154_v17, %v1156_v16  ;;  %v4349_v25 = vpop.f32.mrb[10].mxu0  ;;  %v1000_v26 = vmax.f32 %v866_v20, 0.0  ;;  %v1326_v32 = vsel %vm1315_vm9, %v1323_v23, %v1325_v19  ;;  %v5574_v49 = vld [vmem:[#allocation2 + $0x40] sm:$0xff] }
 0x12d   : > { %1224 = vrot.lane.b32.xlu1 %v1159_v21, %s5161_s15  ;;  %1222 = vrot.lane.b32.xlu0 %v1157_v22, %s5161_s15  ;;  %1034 = vst.msk [vmem:[#allocation2 + $0x69] sm:$0xff] %vm461_vm0, %v1001_v18  ;;  %v5551_v27 = vld [vmem:[#allocation2 + $0x30] sm:$0xff]  ;;  %v881_v28 = vadd.f32 %v4349_v25, %v5492_v40  ;;  %v875_v29 = vpop.f32.mrb[11].mxu0  ;;  %v1324_v33 = vsel %vm1315_vm9, %v1321_v24, %v1323_v23  ;;  %v5564_v37 = vld [vmem:[#allocation2 + $0x38] sm:$0xff]  ;;  %v1331_v55 = vrot.slane %v5574_v49, 2  ;;  %v1164_v56 = vrot.slane %v5574_v49, 1 }
 0x12e   : > { %1033 = vst.msk [vmem:[#allocation2 + $0x61] sm:$0xff] %vm461_vm0, %v1000_v26  ;;  %v876_v31 = vadd.f32 %v5492_v40, %v875_v29  ;;  %v1327_v34 = vrot.slane %v5551_v27, 2  ;;  %v1160_v35 = vrot.slane %v5551_v27, 1  ;;  %v1329_v47 = vrot.slane %v5564_v37, 2 }
 0x12f   : > { %v1003_v30 = vmax.f32 %v881_v28, 0.0  ;;  %v1162_v48 = vrot.slane %v5564_v37, 1 }
 0x130   : > { %v4352_v36 = vpop.f32.mrb[12].mxu0  ;;  %v1002_v38 = vmax.f32 %v876_v31, 0.0  ;;  %v1328_v44 = vsel %vm1315_vm9, %v1325_v19, %v1327_v34  ;;  %v1161_v46 = vsel %vm1148_vm8, %v1158_v12, %v1160_v35  ;;  %v1330_v57 = vsel %vm1315_vm9, %v1327_v34, %v1329_v47  ;;  %v5607_v21 = vld [vmem:[#allocation2 + $0x58] sm:$0xff] }
 0x131   : > { %1391 = vrot.lane.b32.xlu1 %v1326_v32, %s5162_s17  ;;  %1389 = vrot.lane.b32.xlu0 %v1324_v33, %s5162_s17  ;;  %1036 = vst.msk [vmem:[#allocation2 + $0x81] sm:$0xff] %vm461_vm0, %v1003_v30  ;;  %v891_v39 = vadd.f32 %v4352_v36, %v5492_v40  ;;  %v885_v41 = vpop.f32.mrb[13].mxu0  ;;  %v1163_v59 = vsel %vm1148_vm8, %v1160_v35, %v1162_v48  ;;  %v5588_v63 = vld [vmem:[#allocation2 + $0x48] sm:$0xff]  ;;  %v5597_v7 = vld [vmem:[#allocation2 + $0x50] sm:$0xff]  ;;  %v1337_v29 = vrot.slane %v5607_v21, 2  ;;  %v1170_v33 = vrot.slane %v5607_v21, 1 }
 0x132   : > { %1035 = vst.msk [vmem:[#allocation2 + $0x79] sm:$0xff] %vm461_vm0, %v1002_v38  ;;  %v886_v43 = vadd.f32 %v5492_v40, %v885_v41  ;;  %v1332_v3 = vsel %vm1315_vm9, %v1329_v47, %v1331_v55  ;;  %v1165_v4 = vsel %vm1148_vm8, %v1162_v48, %v1164_v56  ;;  %v1333_v5 = vrot.slane %v5588_v63, 2 }
 0x133   : > { %v1005_v42 = vmax.f32 %v891_v39, 0.0  ;;  %v1166_v6 = vrot.slane %v5588_v63, 1  ;;  %v1335_v16 = vrot.slane %v5597_v7, 2  ;;  %v1168_v18 = vrot.slane %v5597_v7, 1 }
 0x134   : > { %v4355_v50 = vpop.f32.mrb[14].mxu0  ;;  %v1004_v51 = vmax.f32 %v886_v43, 0.0  ;;  %v1334_v19 = vsel %vm1315_vm9, %v1331_v55, %v1333_v5 }
 0x135   : > { %1393 = vrot.lane.b32.xlu1 %v1328_v44, %s5162_s17  ;;  %1226 = vrot.lane.b32.xlu0 %v1161_v46, %s5161_s15  ;;  %1038 = vst.msk [vmem:[#allocation2 + $0x99] sm:$0xff] %vm461_vm0, %v1005_v42  ;;  %v901_v52 = vadd.f32 %v4355_v50, %v5492_v40  ;;  %v895_v53 = vpop.f32.mrb[15].mxu0  ;;  %v1167_v20 = vsel %vm1148_vm8, %v1164_v56, %v1166_v6  ;;  %v5622_v36 = vld [vmem:[#allocation2 + $0x60] sm:$0xff]  ;;  %v5631_v48 = vld [vmem:[#allocation2 + $0x68] sm:$0xff] }
 0x136   : > { %v896_v54 = vadd.f32 %v5492_v40, %v895_v53  ;;  %1037 = vst.msk [vmem:[#allocation2 + $0x91] sm:$0xff] %vm461_vm0, %v1004_v51  ;;  %v1336_v31 = vsel %vm1315_vm9, %v1333_v5, %v1335_v16  ;;  %v1169_v32 = vsel %vm1148_vm8, %v1166_v6, %v1168_v18  ;;  %v1338_v43 = vsel %vm1315_vm9, %v1335_v16, %v1337_v29 }
 0x137   : > { %v1007_v60 = vmax.f32 %v901_v52, 0.0  ;;  %v1171_v44 = vsel %vm1148_vm8, %v1168_v18, %v1170_v33  ;;  %v1339_v46 = vrot.slane %v5622_v36, 2  ;;  %v1172_v47 = vrot.slane %v5622_v36, 1 }
 0x138   : > { %v1006_v61 = vmax.f32 %v896_v54, 0.0  ;;  %v4358_v62 = vpop.f32.mrb[16].mxu0  ;;  %v1341_v56 = vrot.slane %v5631_v48, 2 }
 0x139   : > { %1395 = vrot.lane.b32.xlu1 %v1330_v57, %s5162_s17  ;;  %1228 = vrot.lane.b32.xlu0 %v1163_v59, %s5161_s15  ;;  %v905_v1 = vpop.f32.mrb[17].mxu0  ;;  %1040 = vst.msk [vmem:[#allocation2 + $0xb1] sm:$0xff] %vm461_vm0, %v1007_v60  ;;  %v911_v2 = vadd.f32 %v4358_v62, %v5492_v40  ;;  %v1340_v60 = vsel %vm1315_vm9, %v1337_v29, %v1339_v46  ;;  %v1174_v62 = vrot.slane %v5631_v48, 1 }
 0x13a   : > { %1039 = vst.msk [vmem:[#allocation2 + $0xa9] sm:$0xff] %vm461_vm0, %v1006_v61  ;;  %v906_v10 = vadd.f32 %v5492_v40, %v905_v1  ;;  %v1173_v61 = vsel %vm1148_vm8, %v1170_v33, %v1172_v47  ;;  %v5644_v1 = vld [vmem:[#allocation2 + $0x70] sm:$0xff] }
 0x13b   : > { %v1009_v8 = vmax.f32 %v911_v2, 0.0 }
 0x13c   : > { %v4361_v12 = vpop.f32.mrb[18].mxu0  ;;  %v1008_v15 = vmax.f32 %v906_v10, 0.0  ;;  %v1343_v10 = vrot.slane %v5644_v1, 2 }
 0x13d   : > { %1397 = vrot.lane.b32.xlu1 %v1332_v3, %s5162_s17  ;;  %1230 = vrot.lane.b32.xlu0 %v1165_v4, %s5161_s15  ;;  %v915_v14 = vpop.f32.mrb[19].mxu0  ;;  %1042 = vst.msk [vmem:[#allocation2 + $0xc9] sm:$0xff] %vm461_vm0, %v1009_v8  ;;  %v921_v22 = vadd.f32 %v4361_v12, %v5492_v40  ;;  %v1342_v12 = vsel %vm1315_vm9, %v1339_v46, %v1341_v56 }
 0x13e   : > { %1041 = vst.msk [vmem:[#allocation2 + $0xc1] sm:$0xff] %vm461_vm0, %v1008_v15  ;;  %v916_v23 = vadd.f32 %v5492_v40, %v915_v14  ;;  %v1175_v14 = vsel %vm1148_vm8, %v1172_v47, %v1174_v62  ;;  %v1176_v15 = vrot.slane %v5644_v1, 1 }
 0x13f   : > { %v1011_v28 = vmax.f32 %v921_v22, 0.0 }
 0x140   : > { %v4364_v25 = vpop.f32.mrb[20].mxu0  ;;  %v1010_v30 = vmax.f32 %v916_v23, 0.0 }
 0x141   : > { %1399 = vrot.lane.b32.xlu1 %v1334_v19, %s5162_s17  ;;  %1232 = vrot.lane.b32.xlu0 %v1167_v20, %s5161_s15  ;;  %v925_v26 = vpop.f32.mrb[21].mxu0  ;;  %1044 = vst.msk [vmem:[#allocation2 + $0xe1] sm:$0xff] %vm461_vm0, %v1011_v28  ;;  %v931_v34 = vadd.f32 %v4364_v25, %v5492_v40  ;;  %v5660_v19 = vld [vmem:[#allocation2 + $0x78] sm:$0xff]  ;;  %v4330_v25 = vpop.f32.mrb[0].mxu1  ;;  %v1177_v28 = vsel %vm1148_vm8, %v1174_v62, %v1176_v15 }
 0x142   : > { %1043 = vst.msk [vmem:[#allocation2 + $0xd9] sm:$0xff] %vm461_vm0, %v1010_v30  ;;  %v926_v41 = vadd.f32 %v5492_v40, %v925_v26  ;;  %v1344_v26 = vsel %vm1315_vm9, %v1341_v56, %v1343_v10  ;;  %v1345_v29 = vrot.slane %v5660_v19, 2  ;;  %v1178_v30 = vrot.slane %v5660_v19, 1  ;;  %v647_v33 = vpop.f32.mrb[1].mxu1  ;;  %v5692_v56 = vld [vmem:[#allocation2 + $0x90] sm:$0xff] }
 0x143   : > { %v1013_v39 = vmax.f32 %v931_v34, 0.0  ;;  %v4379_v34 = vpop.f32.mrb[2].mxu1 }
 0x144   : > { %v4367_v35 = vpop.f32.mrb[22].mxu0  ;;  %v1012_v51 = vmax.f32 %v926_v41, 0.0  ;;  %v975_v41 = vpop.f32.mrb[3].mxu1 }
 0x145   : > { %1401 = vrot.lane.b32.xlu1 %v1336_v31, %s5162_s17  ;;  %1234 = vrot.lane.b32.xlu0 %v1169_v32, %s5161_s15  ;;  %v935_v38 = vpop.f32.mrb[23].mxu0  ;;  %v941_v42 = vadd.f32 %v4367_v35, %v5492_v40  ;;  %1046 = vst.msk [vmem:[#allocation2 + $0xf9] sm:$0xff] %vm461_vm0, %v1013_v39  ;;  %v5669_v31 = vld [vmem:[#allocation2 + $0x80] sm:$0xff] }
 0x146   : > { %v936_v53 = vadd.f32 %v5492_v40, %v935_v38  ;;  %1045 = vst.msk [vmem:[#allocation2 + $0xf1] sm:$0xff] %vm461_vm0, %v1012_v51  ;;  %v1347_v35 = vrot.slane %v5669_v31, 2  ;;  %v1180_v38 = vrot.slane %v5669_v31, 1  ;;  %v3835_v39 = vld [vmem:[%s7231_s3] ss:$0 sm:$0xff] }
 0x147   : > { %v1015_v52 = vmax.f32 %v941_v42, 0.0  ;;  %v1346_v42 = vsel %vm1315_vm9, %v1343_v10, %v1345_v29  ;;  %v653_v47 = vadd.f32 %v4330_v25, %v3835_v39  ;;  %v4382_v10 = vpop.f32.mrb[4].mxu1 }
 0x148   : > { %v4370_v50 = vpop.f32.mrb[24].mxu0  ;;  %v1014_v57 = vmax.f32 %v936_v53, 0.0  ;;  %v1181_v53 = vsel %vm1148_vm8, %v1178_v30, %v1180_v38 }
 0x149   : > { %1403 = vrot.lane.b32.xlu1 %v1338_v43, %s5162_s17  ;;  %1236 = vrot.lane.b32.xlu0 %v1171_v44, %s5161_s15  ;;  %v951_v54 = vadd.f32 %v4370_v50, %v5492_v40  ;;  %v945_v55 = vpop.f32.mrb[25].mxu0  ;;  %1048 = vst.msk [vmem:[#allocation2 + $0x111] sm:$0xff] %vm461_vm0, %v1015_v52  ;;  %v1179_v43 = vsel %vm1148_vm8, %v1176_v15, %v1178_v30  ;;  %v5681_v44 = vld [vmem:[#allocation2 + $0x88] sm:$0xff] }
 0x14a   : > { %v946_v2 = vadd.f32 %v5492_v40, %v945_v55  ;;  %1047 = vst.msk [vmem:[#allocation2 + $0x109] sm:$0xff] %vm461_vm0, %v1014_v57  ;;  %v1349_v50 = vrot.slane %v5681_v44, 2  ;;  %v1182_v51 = vrot.slane %v5681_v44, 1  ;;  %v1348_v52 = vsel %vm1315_vm9, %v1345_v29, %v1347_v35  ;;  %v5717_v29 = vld [vmem:[#allocation2 + $0xa0] sm:$0xff] }
 0x14b   : > { %v1017_v59 = vmax.f32 %v951_v54, 0.0  ;;  %v657_v55 = vmax.f32 %v653_v47, 0.0  ;;  %v648_v57 = vadd.f32 %v3835_v39, %v647_v33  ;;  %v991_v15 = vadd.f32 %v4382_v10, %v5492_v40 }
 0x14c   : > { %v4373_v3 = vpop.f32.mrb[26].mxu0  ;;  %v1016_v5 = vmax.f32 %v946_v2, 0.0  ;;  %v976_v2 = vadd.f32 %v5492_v40, %v975_v41  ;;  %v1188_v33 = vrot.slane %v5717_v29, 1 }
 0x14d   : > { %1405 = vrot.lane.b32.xlu1 %v1340_v60, %s5162_s17  ;;  %1238 = vrot.lane.b32.xlu0 %v1173_v61, %s5161_s15  ;;  %1050 = vst.msk [vmem:[#allocation2 + $0x129] sm:$0xff] %vm461_vm0, %v1017_v59  ;;  %v955_v4 = vpop.f32.mrb[27].mxu0  ;;  %v961_v6 = vadd.f32 %v4373_v3, %v5492_v40  ;;  %v660_v59 = vmul.f32 0.0, %v657_v55  ;;  %v981_v60 = vadd.f32 %v4379_v34, %v5492_v40  ;;  %v656_v62 = vmax.f32 %v648_v57, 0.0  ;;  %v5727_v34 = vld [vmem:[#allocation2 + $0xa8] sm:$0xff] }
 0x14e   : > { %v956_v8 = vadd.f32 %v5492_v40, %v955_v4  ;;  %1049 = vst.msk [vmem:[#allocation2 + $0x121] sm:$0xff] %vm461_vm0, %v1016_v5  ;;  %v1350_v61 = vsel %vm1315_vm9, %v1347_v35, %v1349_v50  ;;  %v1183_v3 = vsel %vm1148_vm8, %v1180_v38, %v1182_v51  ;;  %v1351_v4 = vrot.slane %v5692_v56, 2 }
 0x14f   : > { %v1019_v16 = vmax.f32 %v961_v6, 0.0  ;;  %v1184_v5 = vrot.slane %v5692_v56, 1  ;;  %v5701_v6 = vld [vmem:[#allocation2 + $0x98] sm:$0xff]  ;;  %663 = vst.msk [vmem:[#allocation2 + $0x1a1] sm:$0xff] %vm461_vm0, %v660_v59  ;;  %v1357_v39 = vrot.slane %v5727_v34, 2  ;;  %v1190_v41 = vrot.slane %v5727_v34, 1 }
 0x150   : > { %v4376_v18 = vpop.f32.mrb[28].mxu0  ;;  %v1018_v20 = vmax.f32 %v956_v8, 0.0  ;;  %v1023_v8 = vmax.f32 %v981_v60, 0.0 }
 0x151   : > { %1407 = vrot.lane.b32.xlu1 %v1342_v12, %s5162_s17  ;;  %1240 = vrot.lane.b32.xlu0 %v1175_v14, %s5161_s15  ;;  %v971_v22 = vadd.f32 %v4376_v18, %v5492_v40  ;;  %v965_v23 = vpop.f32.mrb[29].mxu0  ;;  %1052 = vst.msk [vmem:[#allocation2 + $0x141] sm:$0xff] %vm461_vm0, %v1019_v16  ;;  %v659_v12 = vmul.f32 0.0, %v656_v62  ;;  %v1022_v14 = vmax.f32 %v976_v2, 0.0  ;;  %v985_v16 = vpop.f32.mrb[5].mxu1  ;;  %v1185_v25 = vsel %vm1148_vm8, %v1182_v51, %v1184_v5  ;;  %v5744_v51 = vld [vmem:[%s7232_s4] sm:$0xff] }
 0x152   : > { %1051 = vst.msk [vmem:[#allocation2 + $0x139] sm:$0xff] %vm461_vm0, %v1018_v20  ;;  %v966_v46 = vadd.f32 %v5492_v40, %v965_v23  ;;  %1056 = vst.msk [vmem:[#allocation2 + $0x171] sm:$0xff] %vm461_vm0, %v1023_v8  ;;  %v986_v18 = vadd.f32 %v5492_v40, %v985_v16  ;;  %v1353_v20 = vrot.slane %v5701_v6, 2  ;;  %v1352_v23 = vsel %vm1315_vm9, %v1349_v50, %v1351_v4 }
 0x153   : > { %v1021_v32 = vmax.f32 %v971_v22, 0.0  ;;  %662 = vst.msk [vmem:[#allocation2 + $0x199] sm:$0xff] %vm461_vm0, %v659_v12  ;;  %1055 = vst.msk [vmem:[#allocation2 + $0x169] sm:$0xff] %vm461_vm0, %v1022_v14  ;;  %v1025_v22 = vmax.f32 %v991_v15, 0.0  ;;  %v5778_v15 = vld [vmem:[#allocation2 + $0xd0] sm:$0xff] }
 0x154   : > { %v1020_v54 = vmax.f32 %v966_v46, 0.0  ;;  %v1354_v40 = vsel %vm1315_vm9, %v1351_v4, %v1353_v20  ;;  %v1191_v46 = vsel %vm1148_vm8, %v1188_v33, %v1190_v41 }
 0x155   : > { %1409 = vrot.lane.b32.xlu1 %v1344_v26, %s5162_s17  ;;  %1242 = vrot.lane.b32.xlu0 %v1177_v28, %s5161_s15  ;;  %1054 = vst.msk [vmem:[#allocation2 + $0x159] sm:$0xff] %vm461_vm0, %v1021_v32  ;;  %v1186_v26 = vrot.slane %v5701_v6, 1  ;;  %v1024_v28 = vmax.f32 %v986_v18, 0.0  ;;  %1058 = vst.msk [vmem:[#allocation2 + $0x189] sm:$0xff] %vm461_vm0, %v1025_v22  ;;  %v1355_v32 = vrot.slane %v5717_v29, 2  ;;  %v1200_v22 = vrot.slane %v5778_v15, 1 }
 0x156   : > { %1053 = vst.msk [vmem:[#allocation2 + $0x151] sm:$0xff] %vm461_vm0, %v1020_v54 }
 0x157   : > { %1057 = vst.msk [vmem:[#allocation2 + $0x181] sm:$0xff] %vm461_vm0, %v1024_v28  ;;  %v1187_v30 = vsel %vm1148_vm8, %v1184_v5, %v1186_v26  ;;  %v1356_v35 = vsel %vm1315_vm9, %v1353_v20, %v1355_v32  ;;  %v1189_v38 = vsel %vm1148_vm8, %v1186_v26, %v1188_v33  ;;  %v5770_v5 = vld [vmem:[#allocation2 + $0xc8] sm:$0xff]  ;;  %v1367_v20 = vrot.slane %v5778_v15, 2 }
 0x158   : > { %v1365_v12 = vrot.slane %v5770_v5, 2  ;;  %v1198_v14 = vrot.slane %v5770_v5, 1 }
 0x159   : > { %1411 = vrot.lane.b32.xlu1 %v1346_v42, %s5162_s17  ;;  %1244 = vrot.lane.b32.xlu0 %v1179_v43, %s5161_s15  ;;  %v5735_v42 = vld [vmem:[#allocation2 + $0xb0] sm:$0xff]  ;;  %v1358_v43 = vsel %vm1315_vm9, %v1355_v32, %v1357_v39 }
 0x15a   : > { %v1359_v47 = vrot.slane %v5735_v42, 2  ;;  %v1192_v50 = vrot.slane %v5735_v42, 1  ;;  %v1201_v26 = vsel %vm1148_vm8, %v1198_v14, %v1200_v22 }
 0x15c   : > { %v1360_v55 = vsel %vm1315_vm9, %v1357_v39, %v1359_v47  ;;  %v1193_v57 = vsel %vm1148_vm8, %v1190_v41, %v1192_v50  ;;  %v5802_v39 = vld [vmem:[#allocation2 + $0xe8] sm:$0xff] }
 0x15d   : > { %1413 = vrot.lane.b32.xlu1 %v1348_v52, %s5162_s17  ;;  %1246 = vrot.lane.b32.xlu0 %v1181_v53, %s5161_s15  ;;  %v1550_v52 = vld [vmem:[%s7232_s4 + $0x8] sm:$0xf]  ;;  %v5751_v53 = vld [vmem:[#allocation2 + $0xb8] sm:$0xff] }
 0x15e   : > { %v4908_v54 = vpack.c.bf16 %v1550_v52, %v5744_v51  ;;  %v1361_v59 = vrot.slane %v5751_v53, 2  ;;  %v1194_v60 = vrot.slane %v5751_v53, 1 }
 0x160   : > { %4910 = vmatpush3.bf16.msk.msra.mxu0 %vm5508_vm6, %v4908_v54  ;;  %v1362_v62 = vsel %vm1315_vm9, %v1359_v47, %v1361_v59  ;;  %v1195_v2 = vsel %vm1148_vm8, %v1192_v50, %v1194_v60  ;;  %v1206_v47 = vrot.slane %v5802_v39, 1  ;;  %v5810_v50 = vld [vmem:[#allocation2 + $0xf0] sm:$0xff] }
 0x161   : > { %1415 = vrot.lane.b32.xlu1 %v1350_v61, %s5162_s17  ;;  %1248 = vrot.lane.b32.xlu0 %v1183_v3, %s5161_s15  ;;  %v5762_v61 = vld [vmem:[#allocation2 + $0xc0] sm:$0xff] }
 0x162   : > { %v1363_v3 = vrot.slane %v5762_v61, 2  ;;  %v1196_v4 = vrot.slane %v5762_v61, 1 }
 0x164   : > { %v1364_v8 = vsel %vm1315_vm9, %v1361_v59, %v1363_v3  ;;  %v1197_v10 = vsel %vm1148_vm8, %v1194_v60, %v1196_v4  ;;  %v1366_v16 = vsel %vm1315_vm9, %v1363_v3, %v1365_v12  ;;  %v1199_v18 = vsel %vm1148_vm8, %v1196_v4, %v1198_v14  ;;  %v5818_v59 = vld [vmem:[#allocation2 + $0xf8] sm:$0xff]  ;;  %v5826_v4 = vld [vmem:[#allocation2 + $0x100] sm:$0xff] }
 0x165   : > { %1417 = vrot.lane.b32.xlu1 %v1352_v23, %s5162_s17  ;;  %1250 = vrot.lane.b32.xlu0 %v1185_v25, %s5161_s15  ;;  %v5786_v23 = vld [vmem:[#allocation2 + $0xd8] sm:$0xff]  ;;  %v1368_v25 = vsel %vm1315_vm9, %v1365_v12, %v1367_v20  ;;  %v1210_v3 = vrot.slane %v5818_v59, 1  ;;  %v1379_v12 = vrot.slane %v5826_v4, 2  ;;  %v1212_v14 = vrot.slane %v5826_v4, 1 }
 0x166   : > { %v1369_v28 = vrot.slane %v5786_v23, 2 }
 0x168   : > { %v1370_v32 = vsel %vm1315_vm9, %v1367_v20, %v1369_v28  ;;  %v1213_v20 = vsel %vm1148_vm8, %v1210_v3, %v1212_v14 }
 0x169   : > { %1419 = vrot.lane.b32.xlu1 %v1354_v40, %s5162_s17  ;;  %1252 = vrot.lane.b32.xlu0 %v1187_v30, %s5161_s15  ;;  %v1202_v40 = vrot.slane %v5786_v23, 1  ;;  %v5794_v30 = vld [vmem:[#allocation2 + $0xe0] sm:$0xff] }
 0x16b   : > { %v1203_v33 = vsel %vm1148_vm8, %v1200_v22, %v1202_v40 }
 0x16d   : > { %1421 = vrot.lane.b32.xlu1 %v1356_v35, %s5162_s17  ;;  %1254 = vrot.lane.b32.xlu0 %v1189_v38, %s5161_s15  ;;  %v1371_v35 = vrot.slane %v5794_v30, 2  ;;  %v1204_v38 = vrot.slane %v5794_v30, 1 }
 0x16f   : > { %v1372_v41 = vsel %vm1315_vm9, %v1369_v28, %v1371_v35  ;;  %v1207_v54 = vsel %vm1148_vm8, %v1204_v38, %v1206_v47 }
 0x171   : > { %1423 = vrot.lane.b32.xlu1 %v1358_v43, %s5162_s17  ;;  %1256 = vrot.lane.b32.xlu0 %v1191_v46, %s5161_s15  ;;  %v1205_v43 = vsel %vm1148_vm8, %v1202_v40, %v1204_v38  ;;  %v1373_v46 = vrot.slane %v5802_v39, 2 }
 0x173   : > { %v1374_v52 = vsel %vm1315_vm9, %v1371_v35, %v1373_v46 }
 0x175   : > { %1425 = vrot.lane.b32.xlu1 %v1360_v55, %s5162_s17  ;;  %1258 = vrot.lane.b32.xlu0 %v1193_v57, %s5161_s15  ;;  %v1375_v55 = vrot.slane %v5810_v50, 2  ;;  %v1208_v57 = vrot.slane %v5810_v50, 1 }
 0x177   : > { %v1376_v60 = vsel %vm1315_vm9, %v1373_v46, %v1375_v55  ;;  %v5854_v46 = vld [vmem:[#allocation2 + $0x118] sm:$0xff] }
 0x179   : > { %1427 = vrot.lane.b32.xlu1 %v1362_v62, %s5162_s17  ;;  %1260 = vrot.lane.b32.xlu0 %v1195_v2, %s5161_s15  ;;  %v1209_v62 = vsel %vm1148_vm8, %v1206_v47, %v1208_v57  ;;  %v1377_v2 = vrot.slane %v5818_v59, 2 }
 0x17d   : > { %1429 = vrot.lane.b32.xlu1 %v1364_v8, %s5162_s17  ;;  %1262 = vrot.lane.b32.xlu0 %v1197_v10, %s5161_s15  ;;  %v1378_v8 = vsel %vm1315_vm9, %v1375_v55, %v1377_v2  ;;  %v1211_v10 = vsel %vm1148_vm8, %v1208_v57, %v1210_v3  ;;  %v1571_v57 = vrot.slane %v5854_v46, 2  ;;  %v1556_v3 = vrot.slane %v5854_v46, 1 }
 0x181   : > { %1431 = vrot.lane.b32.xlu1 %v1366_v16, %s5162_s17  ;;  %1264 = vrot.lane.b32.xlu0 %v1199_v18, %s5161_s15  ;;  %v5834_v16 = vld [vmem:[#allocation2 + $0x108] sm:$0xff]  ;;  %v1380_v18 = vsel %vm1315_vm9, %v1377_v2, %v1379_v12 }
 0x182   : > { %v1381_v22 = vrot.slane %v5834_v16, 2 }
 0x185   : > { %1433 = vrot.lane.b32.xlu1 %v1368_v25, %s5162_s17  ;;  %1266 = vrot.lane.b32.xlu0 %v1201_v26, %s5161_s15  ;;  %v1214_v25 = vrot.slane %v5834_v16, 1  ;;  %v5842_v26 = vld [vmem:[#allocation2 + $0x110] sm:$0xff] }
 0x186   : > { %v1569_v35 = vrot.slane %v5842_v26, 2  ;;  %v1554_v38 = vrot.slane %v5842_v26, 1 }
 0x188   : > { %v1555_v2 = vsel %vm1148_vm8, %v1214_v25, %v1554_v38 }
 0x189   : > { %1435 = vrot.lane.b32.xlu1 %v1370_v32, %s5162_s17  ;;  %1268 = vrot.lane.b32.xlu0 %v1203_v33, %s5161_s15  ;;  %v1382_v32 = vsel %vm1315_vm9, %v1379_v12, %v1381_v22  ;;  %v1215_v33 = vsel %vm1148_vm8, %v1212_v14, %v1214_v25 }
 0x18d   : > { %1437 = vrot.lane.b32.xlu1 %v1372_v41, %s5162_s17  ;;  %1270 = vrot.lane.b32.xlu0 %v1205_v43, %s5161_s15  ;;  %v3941_v41 = vld [vmem:[%s7232_s4 + $0x20] sm:$0xff]  ;;  %v3942_v43 = vld [vmem:[%s7232_s4 + $0x28] sm:$0xf] }
 0x18e   : > { %v4912_v55 = vpack.c.bf16 %v3942_v43, %v3941_v41 }
 0x191   : > { %1439 = vrot.lane.b32.xlu1 %v1374_v52, %s5162_s17  ;;  %1272 = vrot.lane.b32.xlu0 %v1207_v54, %s5161_s15 }
 0x195   : > { %1441 = vrot.lane.b32.xlu1 %v1376_v60, %s5162_s17  ;;  %1274 = vrot.lane.b32.xlu0 %v1209_v62, %s5161_s15  ;;  %v1570_v62 = vsel %vm1315_vm9, %v1381_v22, %v1569_v35  ;;  %v1557_v22 = vsel %vm1148_vm8, %v1554_v38, %v1556_v3 }
 0x199   : > { %1443 = vrot.lane.b32.xlu1 %v1378_v8, %s5162_s17  ;;  %1276 = vrot.lane.b32.xlu0 %v1211_v10, %s5161_s15  ;;  %v5867_v8 = vld [vmem:[#allocation2 + $0x120] sm:$0xff] }
 0x19a   : > { %v1573_v14 = vrot.slane %v5867_v8, 2  ;;  %v1558_v25 = vrot.slane %v5867_v8, 1 }
 0x19c   : > { %v1574_v43 = vsel %vm1315_vm9, %v1571_v57, %v1573_v14 }
 0x19d   : > { %1445 = vrot.lane.b32.xlu1 %v1380_v18, %s5162_s17  ;;  %1278 = vrot.lane.b32.xlu0 %v1213_v20, %s5161_s15  ;;  %v1572_v20 = vsel %vm1315_vm9, %v1569_v35, %v1571_v57 }
 0x19f   : > { %v1225_v28 = vpop.permute.xlu1 %1224  ;;  %v1223_v40 = vpop.permute.xlu0 %1222 }
 0x1a0   : > { %v1485_v47 = vsel %vm461_vm0, %v5534_v13, %v1223_v40  ;;  %v1486_v18 = vsel %vm461_vm0, %v5531_v11, %v1225_v28  ;;  %v5883_v40 = vld [vmem:[#allocation2] sm:$0xff] }
 0x1a1   : > { %1447 = vrot.lane.b32.xlu1 %v1382_v32, %s5162_s17  ;;  %1280 = vrot.lane.b32.xlu0 %v1215_v33, %s5161_s15  ;;  %v5885_v32 = vld [vmem:[#allocation2 + $0x8] sm:$0xff]  ;;  %v1316_v38 = vrot.slane %v5883_v40, 2 }
 0x1a2   : > { %v1317_v41 = vrot.slane %v5885_v32, 2 }
 0x1a3   : > { %v1392_v52 = vpop.permute.xlu1 %1391  ;;  %v1390_v54 = vpop.permute.xlu0 %1389 }
 0x1a4   : > { %v5862_v60 = vsel %vm1515_vm10, %v1485_v47, %v1390_v54  ;;  %v5889_v33 = vsel %vm1515_vm10, %v1486_v18, %v1392_v52  ;;  %v1149_v47 = vrot.slane %v5883_v40, 1  ;;  %v1150_v52 = vrot.slane %v5885_v32, 1 }
 0x1a5   : > { %1575 = vrot.lane.b32.xlu1 %v1570_v62, %s5162_s17  ;;  %1560 = vrot.lane.b32.xlu0 %v1555_v2, %s5161_s15 }
 0x1a6   : > { %4388 = vmatmul.mubr.msk.f32.vlgmr.msra.gmra.mrb[6].mxu1 %vm1593_vm11, %v5862_v60 }
 0x1a7   : > { %4914 = vmatpush3.bf16.msk.msra.mxu1 %vm5508_vm6, %v4912_v55  ;;  %v1394_v10 = vpop.permute.xlu1 %1393  ;;  %v1227_v12 = vpop.permute.xlu0 %1226  ;;  %4390 = vmatprep.mubr.msk.f32.mxu1 %vm5160_vm7, %v7240_v0  ;;  %v5914_v55 = vld [vmem:[#allocation2 + $0x10] sm:$0xff] }
 0x1a8   : > { %4919 = vmatprep.subr.bf16.mxu1 %v7238_v45  ;;  %v1487_v11 = vsel %vm461_vm0, %v5528_v9, %v1227_v12  ;;  %v1559_v9 = vsel %vm1148_vm8, %v1556_v3, %v1558_v25  ;;  %v1318_v3 = vsel %vm1315_vm9, %v1316_v38, %v1317_v41  ;;  %v1151_v12 = vsel %vm1148_vm8, %v1149_v47, %v1150_v52 }
 0x1a9   : > { %1577 = vrot.lane.b32.xlu1 %v1572_v20, %s5162_s17  ;;  %1562 = vrot.lane.b32.xlu0 %v1557_v22, %s5161_s15  ;;  %v5912_v54 = vsel %vm1515_vm10, %v1487_v11, %v1394_v10  ;;  %v1319_v10 = vrot.slane %v5914_v55, 2  ;;  %v1152_v18 = vrot.slane %v5914_v55, 1 }
 0x1aa   : > { %4391 = vmatmul.mubr.msk.f32.gmra.mrb[8].mxu1 %vm1593_vm11, %v5889_v33 }
 0x1ab   : > { %v1396_v28 = vpop.permute.xlu1 %1395  ;;  %v1229_v35 = vpop.permute.xlu0 %1228  ;;  %4393 = vmatprep.mubr.msk.f32.mxu1 %vm5160_vm7, %v7240_v0  ;;  %v1153_v38 = vsel %vm1148_vm8, %v1150_v52, %v1152_v18  ;;  %v1155_v52 = vsel %vm1148_vm8, %v1152_v18, %v1154_v17 }
 0x1ac   : > { %v1488_v57 = vsel %vm461_vm0, %v5551_v27, %v1229_v35  ;;  %v1320_v35 = vsel %vm1315_vm9, %v1317_v41, %v1319_v10  ;;  %v1322_v41 = vsel %vm1315_vm9, %v1319_v10, %v1321_v24 }
 0x1ad   : > { %1579 = vrot.lane.b32.xlu1 %v1574_v43, %s5162_s17  ;;  %1564 = vrot.lane.b32.xlu0 %v1559_v9, %s5161_s15  ;;  %v5929_v27 = vsel %vm1515_vm10, %v1488_v57, %v1396_v28 }
 0x1ae   : > { %4394 = vmatmul.mubr.msk.f32.gmra.mrb[10].mxu1 %vm1593_vm11, %v5912_v54 }
 0x1af   : > { %v1398_v62 = vpop.permute.xlu1 %1397  ;;  %v1231_v2 = vpop.permute.xlu0 %1230  ;;  %4396 = vmatprep.mubr.msk.f32.mxu1 %vm5160_vm7, %v7240_v0 }
 0x1b0   : > { %v1489_v20 = vsel %vm461_vm0, %v5564_v37, %v1231_v2  ;;  %v5944_v37 = vld [vmem:[#allocation2 + $0x128] sm:$0xff]  ;;  %v5965_v2 = vld [vmem:[#allocation2 + $0x130] sm:$0xff] }
 0x1b1   : > { %1383 = vrot.lane.b32.xlu1 %v1318_v3, %s5162_s17  ;;  %1216 = vrot.lane.b32.xlu0 %v1151_v12, %s5161_s15  ;;  %v5942_v28 = vsel %vm1515_vm10, %v1489_v20, %v1398_v62  ;;  %v2165_v57 = vrot.slane %v5944_v37, 2  ;;  %v2167_v10 = vrot.slane %v5965_v2, 2  ;;  %v5986_v20 = vld [vmem:[#allocation2 + $0x138] sm:$0xff] }
 0x1b2   : > { %4397 = vmatmul.mubr.msk.f32.gmra.mrb[12].mxu1 %vm1593_vm11, %v5929_v27 }
 0x1b3   : > { %v1400_v22 = vpop.permute.xlu1 %1399  ;;  %v1233_v11 = vpop.permute.xlu0 %1232  ;;  %4399 = vmatprep.mubr.msk.f32.mxu1 %vm5160_vm7, %v7240_v0  ;;  %v2166_v3 = vsel %vm1315_vm9, %v1573_v14, %v2165_v57 }
 0x1b4   : > { %v1490_v43 = vsel %vm461_vm0, %v5574_v49, %v1233_v11  ;;  %v2150_v49 = vrot.slane %v5944_v37, 1  ;;  %v2168_v11 = vsel %vm1315_vm9, %v2165_v57, %v2167_v10 }
 0x1b5   : > { %1385 = vrot.lane.b32.xlu1 %v1320_v35, %s5162_s17  ;;  %1218 = vrot.lane.b32.xlu0 %v1153_v38, %s5161_s15  ;;  %v5962_v62 = vsel %vm1515_vm10, %v1490_v43, %v1400_v22  ;;  %v5994_v22 = vld [vmem:[#allocation2 + $0x140] sm:$0xff]  ;;  %v2169_v38 = vrot.slane %v5986_v20, 2  ;;  %v2154_v43 = vrot.slane %v5986_v20, 1 }
 0x1b6   : > { %4400 = vmatmul.mubr.msk.f32.gmra.mrb[14].mxu1 %vm1593_vm11, %v5942_v28  ;;  %v2151_v12 = vsel %vm1148_vm8, %v1558_v25, %v2150_v49 }
 0x1b7   : > { %v1402_v9 = vpop.permute.xlu1 %1401  ;;  %v1235_v47 = vpop.permute.xlu0 %1234  ;;  %4402 = vmatprep.mubr.msk.f32.mxu1 %vm5160_vm7, %v7240_v0 }
 0x1b8   : > { %v1491_v24 = vsel %vm461_vm0, %v5588_v63, %v1235_v47  ;;  %v2152_v63 = vrot.slane %v5965_v2, 1  ;;  %v2820_v47 = vrot.slane %v5994_v22, 1 }
 0x1b9   : > { %1387 = vrot.lane.b32.xlu1 %v1322_v41, %s5162_s17  ;;  %1220 = vrot.lane.b32.xlu0 %v1155_v52, %s5161_s15  ;;  %v5983_v18 = vsel %vm1515_vm10, %v1491_v24, %v1402_v9  ;;  %v2865_v41 = vrot.slane %v5994_v22, 2  ;;  %v6011_v52 = vld [vmem:[#allocation2 + $0x148] sm:$0xff]  ;;  %v2170_v24 = vsel %vm1315_vm9, %v2167_v10, %v2169_v38 }
 0x1ba   : > { %4403 = vmatmul.mubr.msk.f32.gmra.mrb[16].mxu1 %vm1593_vm11, %v5962_v62  ;;  %v2153_v35 = vsel %vm1148_vm8, %v2150_v49, %v2152_v63 }
 0x1bb   : > { %v1404_v13 = vpop.permute.xlu1 %1403  ;;  %v1237_v17 = vpop.permute.xlu0 %1236  ;;  %4405 = vmatprep.mubr.msk.f32.mxu1 %vm5160_vm7, %v7240_v0  ;;  %v2866_v10 = vsel %vm1315_vm9, %v2169_v38, %v2865_v41 }
 0x1bc   : > { %v1492_v14 = vsel %vm461_vm0, %v5597_v7, %v1237_v17  ;;  %v2822_v17 = vrot.slane %v6011_v52, 1 }
 0x1bd   : > { %2171 = vrot.lane.b32.xlu1 %v2166_v3, %s5162_s17  ;;  %2156 = vrot.lane.b32.xlu0 %v2151_v12, %s5161_s15  ;;  %v6002_v7 = vsel %vm1515_vm10, %v1492_v14, %v1404_v13  ;;  %v2155_v13 = vsel %vm1148_vm8, %v2152_v63, %v2154_v43  ;;  %v2821_v12 = vsel %vm1148_vm8, %v2154_v43, %v2820_v47  ;;  %v2867_v63 = vrot.slane %v6011_v52, 2 }
 0x1be   : > { %4406 = vmatmul.mubr.msk.f32.gmra.mrb[18].mxu1 %vm1593_vm11, %v5983_v18 }
 0x1bf   : > { %v1406_v8 = vpop.permute.xlu1 %1405  ;;  %v1239_v25 = vpop.permute.xlu0 %1238  ;;  %4408 = vmatprep.mubr.msk.f32.mxu1 %vm5160_vm7, %v7240_v0  ;;  %v2868_v38 = vsel %vm1315_vm9, %v2865_v41, %v2867_v63 }
 0x1c0   : > { %v1493_v9 = vsel %vm461_vm0, %v5607_v21, %v1239_v25 }
 0x1c1   : > { %2173 = vrot.lane.b32.xlu1 %v2168_v11, %s5162_s17  ;;  %2158 = vrot.lane.b32.xlu0 %v2153_v35, %s5161_s15  ;;  %v6019_v21 = vsel %vm1515_vm10, %v1493_v9, %v1406_v8  ;;  %v6032_v8 = vld [vmem:[#allocation2 + $0x150] sm:$0xff] }
 0x1c2   : > { %4409 = vmatmul.mubr.msk.f32.gmra.mrb[20].mxu1 %vm1593_vm11, %v6002_v7  ;;  %v2824_v43 = vrot.slane %v6032_v8, 1  ;;  %v2869_v9 = vrot.slane %v6032_v8, 2 }
 0x1c3   : > { %v1408_v57 = vpop.permute.xlu1 %1407  ;;  %v1241_v49 = vpop.permute.xlu0 %1240  ;;  %4411 = vmatprep.mubr.msk.f32.mxu1 %vm5160_vm7, %v7240_v0 }
 0x1c4   : > { %v1494_v3 = vsel %vm461_vm0, %v5622_v36, %v1241_v49  ;;  %v2823_v36 = vsel %vm1148_vm8, %v2820_v47, %v2822_v17 }
 0x1c5   : > { %2175 = vrot.lane.b32.xlu1 %v2170_v24, %s5162_s17  ;;  %2160 = vrot.lane.b32.xlu0 %v2155_v13, %s5161_s15  ;;  %v6035_v11 = vsel %vm1515_vm10, %v1494_v3, %v1408_v57  ;;  %v6047_v57 = vld [vmem:[#allocation2 + $0x158] sm:$0xff]  ;;  %v2825_v13 = vsel %vm1148_vm8, %v2822_v17, %v2824_v43  ;;  %v2870_v3 = vsel %vm1315_vm9, %v2867_v63, %v2869_v9 }
 0x1c6   : > { %4412 = vmatmul.mubr.msk.f32.gmra.mrb[22].mxu1 %vm1593_vm11, %v6019_v21 }
 0x1c7   : > { %v1410_v14 = vpop.permute.xlu1 %1409  ;;  %v1243_v25 = vpop.permute.xlu0 %1242  ;;  %4414 = vmatprep.mubr.msk.f32.mxu1 %vm5160_vm7, %v7240_v0 }
 0x1c8   : > { %v1495_v35 = vsel %vm461_vm0, %v5631_v48, %v1243_v25  ;;  %v2826_v48 = vrot.slane %v6047_v57, 1 }
 0x1c9   : > { %2838 = vrot.lane.b32.xlu0 %v2821_v12, %s5161_s15  ;;  %2883 = vrot.lane.b32.xlu1 %v2866_v10, %s5162_s17  ;;  %v6052_v47 = vsel %vm1515_vm10, %v1495_v35, %v1410_v14  ;;  %v2871_v12 = vrot.slane %v6047_v57, 2  ;;  %v6064_v10 = vld [vmem:[#allocation2 + $0x160] sm:$0xff] }
 0x1ca   : > { %4415 = vmatmul.mubr.msk.f32.gmra.mrb[24].mxu1 %vm1593_vm11, %v6035_v11  ;;  %7254 = vst [vmem:[#allocation9_spill] sm:$0xff] %v6064_v10  ;;  %v2827_v63 = vsel %vm1148_vm8, %v2824_v43, %v2826_v48 }
 0x1cb   : > { %v1412_v49 = vpop.permute.xlu1 %1411  ;;  %v1245_v24 = vpop.permute.xlu0 %1244  ;;  %4417 = vmatprep.mubr.msk.f32.mxu1 %vm5160_vm7, %v7240_v0  ;;  %v2872_v35 = vsel %vm1315_vm9, %v2869_v9, %v2871_v12 }
 0x1cc   : > { %v1496_v41 = vsel %vm461_vm0, %v5644_v1, %v1245_v24  ;;  %v2828_v1 = vrot.slane %v6064_v10, 1 }
 0x1cd   : > { %2840 = vrot.lane.b32.xlu0 %v2823_v36, %s5161_s15  ;;  %2885 = vrot.lane.b32.xlu1 %v2868_v38, %s5162_s17  ;;  %v6069_v36 = vsel %vm1515_vm10, %v1496_v41, %v1412_v49  ;;  %v2873_v38 = vrot.slane %v6064_v10, 2  ;;  %v6083_v41 = vld [vmem:[#allocation2 + $0x168] sm:$0xff] }
 0x1ce   : > { %4418 = vmatmul.mubr.msk.f32.gmra.mrb[26].mxu1 %vm1593_vm11, %v6052_v47  ;;  %7255 = vst [vmem:[#allocation10_spill] sm:$0xff] %v6083_v41 }
 0x1cf   : > { %v1414_v14 = vpop.permute.xlu1 %1413  ;;  %v1247_v25 = vpop.permute.xlu0 %1246  ;;  %4420 = vmatprep.mubr.msk.f32.mxu1 %vm5160_vm7, %v7240_v0  ;;  %v2874_v9 = vsel %vm1315_vm9, %v2871_v12, %v2873_v38 }
 0x1d0   : > { %v1497_v17 = vsel %vm461_vm0, %v5660_v19, %v1247_v25  ;;  %v2829_v19 = vsel %vm1148_vm8, %v2826_v48, %v2828_v1  ;;  %v2875_v25 = vrot.slane %v6083_v41, 2 }
 0x1d1   : > { %2842 = vrot.lane.b32.xlu0 %v2825_v13, %s5161_s15  ;;  %2887 = vrot.lane.b32.xlu1 %v2870_v3, %s5162_s17  ;;  %v6086_v13 = vsel %vm1515_vm10, %v1497_v17, %v1414_v14  ;;  %v2830_v3 = vrot.slane %v6083_v41, 1  ;;  %v6098_v14 = vld [vmem:[#allocation2 + $0x170] sm:$0xff]  ;;  %v1108_v41 = vld [vmem:[#allocation2 + $0x188] sm:$0xff] }
 0x1d2   : > { %4421 = vmatmul.mubr.msk.f32.gmra.mrb[28].mxu1 %vm1593_vm11, %v6069_v36  ;;  %7256 = vst [vmem:[#allocation11_spill] sm:$0xff] %v6098_v14  ;;  %v2877_v45 = vrot.slane %v6098_v14, 2 }
 0x1d3   : > { %v1416_v49 = vpop.permute.xlu1 %1415  ;;  %v1249_v24 = vpop.permute.xlu0 %1248  ;;  %4423 = vmatprep.mubr.msk.f32.mxu1 %vm5160_vm7, %v7240_v0 }
 0x1d4   : > { %v1498_v43 = vsel %vm461_vm0, %v5669_v31, %v1249_v24  ;;  %v2832_v31 = vrot.slane %v6098_v14, 1  ;;  %v2876_v24 = vsel %vm1315_vm9, %v2873_v38, %v2875_v25  ;;  %v7258_v14 = vmov 0.0  }
 0x1d5   : > { %2844 = vrot.lane.b32.xlu0 %v2827_v63, %s5161_s15  ;;  %2889 = vrot.lane.b32.xlu1 %v2872_v35, %s5162_s17  ;;  %v6103_v48 = vsel %vm1515_vm10, %v1498_v43, %v1416_v49  ;;  %v2831_v35 = vsel %vm1148_vm8, %v2828_v1, %v2830_v3  ;;  %v6115_v49 = vld [vmem:[#allocation2 + $0x178] sm:$0xff] }
 0x1d6   : > { %4424 = vmatmul.mubr.msk.f32.gmra.mrb[30].mxu1 %vm1593_vm11, %v6086_v13  ;;  %7257 = vst [vmem:[#allocation12_spill] sm:$0xff] %v6115_v49  ;;  %v2833_v38 = vsel %vm1148_vm8, %v2830_v3, %v2832_v31 }
 0x1d7   : > { %v1418_v17 = vpop.permute.xlu1 %1417  ;;  %v1251_v63 = vpop.permute.xlu0 %1250  ;;  %4426 = vmatprep.mubr.msk.f32.mxu1 %vm5160_vm7, %v7240_v0 }
 0x1d8   : > { %v1499_v12 = vsel %vm461_vm0, %v5681_v44, %v1251_v63  ;;  %v2834_v44 = vrot.slane %v6115_v49, 1  ;;  %v2878_v63 = vsel %vm1315_vm9, %v2875_v25, %v2877_v45 }
 0x1d9   : > { %2846 = vrot.lane.b32.xlu0 %v2829_v19, %s5161_s15  ;;  %2891 = vrot.lane.b32.xlu1 %v2874_v9, %s5162_s17  ;;  %v6120_v9 = vsel %vm1515_vm10, %v1499_v12, %v1418_v17 }
 0x1da   : > { %4427 = vmatmul.mubr.msk.f32.gmra.mrb[32].mxu1 %vm1593_vm11, %v6103_v48 }
 0x1db   : > { %v1420_v43 = vpop.permute.xlu1 %1419  ;;  %v1253_v19 = vpop.permute.xlu0 %1252  ;;  %4429 = vmatprep.mubr.msk.f32.mxu1 %vm5160_vm7, %v7240_v0  ;;  %v2879_v0 = vrot.slane %v6115_v49, 2 }
 0x1dc   : > { %v1500_v1 = vsel %vm461_vm0, %v5692_v56, %v1253_v19  ;;  %v2835_v56 = vsel %vm1148_vm8, %v2832_v31, %v2834_v44 }
 0x1dd   : > { %2848 = vrot.lane.b32.xlu0 %v2831_v35, %s5161_s15  ;;  %2893 = vrot.lane.b32.xlu1 %v2876_v24, %s5162_s17  ;;  %v1107_v35 = vld [vmem:[#allocation2 + $0x180] sm:$0xff]  ;;  %v6135_v24 = vsel %vm1515_vm10, %v1500_v1, %v1420_v43  ;;  %v2880_v25 = vsel %vm1315_vm9, %v2877_v45, %v2879_v0 }
 0x1de   : > { %4430 = vmatmul.mubr.msk.f32.gmra.mrb[34].mxu1 %vm1593_vm11, %v6120_v9  ;;  %v2836_v19 = vrot.slane %v1107_v35, 1  ;;  %v2881_v49 = vrot.slane %v1107_v35, 2 }
 0x1df   : > { %v1422_v17 = vpop.permute.xlu1 %1421  ;;  %v1255_v12 = vpop.permute.xlu0 %1254  ;;  %4432 = vmatprep.mubr.msk.f32.mxu1 %vm5160_vm7, %v7258_v14 }
 0x1e0   : > { %v1501_v3 = vsel %vm461_vm0, %v5701_v6, %v1255_v12  ;;  %v2933_v6 = vrot.slane %v1108_v41, 1  ;;  %v2837_v45 = vsel %vm1148_vm8, %v2834_v44, %v2836_v19 }
 0x1e1   : > { %2850 = vrot.lane.b32.xlu0 %v2833_v38, %s5161_s15  ;;  %2895 = vrot.lane.b32.xlu1 %v2878_v63, %s5162_s17  ;;  %v6148_v1 = vsel %vm1515_vm10, %v1501_v3, %v1422_v17  ;;  %v2882_v38 = vsel %vm1315_vm9, %v2879_v0, %v2881_v49  ;;  %v2948_v63 = vrot.slane %v1108_v41, 2  ;;  %v1109_v17 = vld [vmem:[#allocation2 + $0x190] sm:$0xff] }
 0x1e2   : > { %4433 = vmatmul.mubr.msk.f32.gmra.mrb[36].mxu1 %vm1593_vm11, %v6135_v24  ;;  %v2935_v41 = vrot.slane %v1109_v17, 1  ;;  %v2950_v3 = vrot.slane %v1109_v17, 2 }
 0x1e3   : > { %v1424_v10 = vpop.permute.xlu1 %1423  ;;  %v1257_v43 = vpop.permute.xlu0 %1256  ;;  %4435 = vmatprep.mubr.msk.f32.mxu1 %vm5160_vm7, %v7258_v14  ;;  %v2949_v0 = vsel %vm1315_vm9, %v2881_v49, %v2948_v63 }
 0x1e4   : > { %v1502_v31 = vsel %vm461_vm0, %v5717_v29, %v1257_v43  ;;  %v2934_v29 = vsel %vm1148_vm8, %v2836_v19, %v2933_v6  ;;  %v2936_v49 = vsel %vm1148_vm8, %v2933_v6, %v2935_v41 }
 0x1e5   : > { %2852 = vrot.lane.b32.xlu0 %v2835_v56, %s5161_s15  ;;  %2897 = vrot.lane.b32.xlu1 %v2880_v25, %s5162_s17  ;;  %v6161_v56 = vsel %vm1515_vm10, %v1502_v31, %v1424_v10  ;;  %v1110_v25 = vld [vmem:[#allocation2 + $0x198] sm:$0xff] }
 0x1e6   : > { %4436 = vmatmul.mubr.msk.f32.gmra.mrb[38].mxu1 %vm1593_vm11, %v6148_v1 }
 0x1e7   : > { %v1426_v12 = vpop.permute.xlu1 %1425  ;;  %v1259_v35 = vpop.permute.xlu0 %1258  ;;  %4438 = vmatprep.mubr.msk.f32.mxu1 %vm5160_vm7, %v7258_v14 }
 0x1e8   : > { %v1503_v44 = vsel %vm461_vm0, %v5727_v34, %v1259_v35  ;;  %v2937_v34 = vrot.slane %v1110_v25, 1 }
 0x1e9   : > { %2854 = vrot.lane.b32.xlu0 %v2837_v45, %s5161_s15  ;;  %2899 = vrot.lane.b32.xlu1 %v2882_v38, %s5162_s17  ;;  %v6174_v31 = vsel %vm1515_vm10, %v1503_v44, %v1426_v12  ;;  %v2951_v45 = vsel %vm1315_vm9, %v2948_v63, %v2950_v3  ;;  %v2952_v38 = vrot.slane %v1110_v25, 2  ;;  %v1111_v12 = vld [vmem:[#allocation2 + $0x1a0] sm:$0xff]  ;;  %v1112_v25 = vld [vmem:[#allocation2 + $0x1a8] sm:$0xff] }
 0x1ea   : > { %4439 = vmatmul.mubr.msk.f32.gmra.mrb[40].mxu1 %vm1593_vm11, %v6161_v56  ;;  %v3286_v44 = vrot.slane %v1111_v12, 1 }
 0x1eb   : > { %v1428_v43 = vpop.permute.xlu1 %1427  ;;  %v1261_v10 = vpop.permute.xlu0 %1260  ;;  %4441 = vmatprep.mubr.msk.f32.mxu1 %vm5160_vm7, %v7258_v14  ;;  %v2953_v63 = vsel %vm1315_vm9, %v2950_v3, %v2952_v38 }
 0x1ec   : > { %v1504_v19 = vsel %vm461_vm0, %v5735_v42, %v1261_v10  ;;  %v2938_v42 = vsel %vm1148_vm8, %v2935_v41, %v2937_v34  ;;  %v3287_v3 = vsel %vm1148_vm8, %v2937_v34, %v3286_v44 }
 0x1ed   : > { %2939 = vrot.lane.b32.xlu0 %v2934_v29, %s5161_s15  ;;  %2954 = vrot.lane.b32.xlu1 %v2949_v0, %s5162_s17  ;;  %v6187_v29 = vsel %vm1515_vm10, %v1504_v19, %v1428_v43  ;;  %v3301_v0 = vrot.slane %v1111_v12, 2 }
 0x1ee   : > { %4442 = vmatmul.mubr.msk.f32.gmra.mrb[42].mxu1 %vm1593_vm11, %v6174_v31 }
 0x1ef   : > { %v1430_v35 = vpop.permute.xlu1 %1429  ;;  %v1263_v17 = vpop.permute.xlu0 %1262  ;;  %4444 = vmatprep.mubr.msk.f32.mxu1 %vm5160_vm7, %v7258_v14 }
 0x1f0   : > { %v1505_v6 = vsel %vm461_vm0, %v5751_v53, %v1263_v17  ;;  %v3288_v53 = vrot.slane %v1112_v25, 1 }
 0x1f1   : > { %2941 = vrot.lane.b32.xlu0 %v2936_v49, %s5161_s15  ;;  %2956 = vrot.lane.b32.xlu1 %v2951_v45, %s5162_s17  ;;  %v6200_v19 = vsel %vm1515_vm10, %v1505_v6, %v1430_v35  ;;  %v3302_v49 = vsel %vm1315_vm9, %v2952_v38, %v3301_v0  ;;  %v3303_v45 = vrot.slane %v1112_v25, 2  ;;  %v1113_v35 = vld [vmem:[#allocation2 + $0x1b0] sm:$0xff] }
 0x1f2   : > { %4445 = vmatmul.mubr.msk.f32.gmra.mrb[44].mxu1 %vm1593_vm11, %v6187_v29  ;;  %v3290_v6 = vrot.slane %v1113_v35, 1 }
 0x1f3   : > { %v1432_v10 = vpop.permute.xlu1 %1431  ;;  %v1265_v43 = vpop.permute.xlu0 %1264  ;;  %4447 = vmatprep.mubr.msk.f32.mxu1 %vm5160_vm7, %v7258_v14  ;;  %v3304_v38 = vsel %vm1315_vm9, %v3301_v0, %v3303_v45 }
 0x1f4   : > { %v1506_v41 = vsel %vm461_vm0, %v5762_v61, %v1265_v43  ;;  %v3289_v61 = vsel %vm1148_vm8, %v3286_v44, %v3288_v53  ;;  %v3291_v44 = vsel %vm1148_vm8, %v3288_v53, %v3290_v6 }
 0x1f5   : > { %2943 = vrot.lane.b32.xlu0 %v2938_v42, %s5161_s15  ;;  %2958 = vrot.lane.b32.xlu1 %v2953_v63, %s5162_s17  ;;  %v6213_v42 = vsel %vm1515_vm10, %v1506_v41, %v1432_v10  ;;  %v3305_v63 = vrot.slane %v1113_v35, 2 }
 0x1f6   : > { %4448 = vmatmul.mubr.msk.f32.gmra.mrb[46].mxu1 %vm1593_vm11, %v6200_v19 }
 0x1f7   : > { %v1434_v17 = vpop.permute.xlu1 %1433  ;;  %v1267_v12 = vpop.permute.xlu0 %1266  ;;  %4450 = vmatprep.mubr.msk.f32.mxu1 %vm5160_vm7, %v7258_v14  ;;  %v3306_v0 = vsel %vm1315_vm9, %v3303_v45, %v3305_v63 }
 0x1f8   : > { %v1507_v34 = vsel %vm461_vm0, %v5770_v5, %v1267_v12 }
 0x1f9   : > { %3292 = vrot.lane.b32.xlu0 %v3287_v3, %s5161_s15  ;;  %3307 = vrot.lane.b32.xlu1 %v3302_v49, %s5162_s17  ;;  %v6226_v10 = vsel %vm1515_vm10, %v1507_v34, %v1434_v17 }
 0x1fa   : > { %4451 = vmatmul.mubr.msk.f32.gmra.mrb[48].mxu1 %vm1593_vm11, %v6213_v42 }
 0x1fb   : > { %v1436_v25 = vpop.permute.xlu1 %1435  ;;  %v1269_v43 = vpop.permute.xlu0 %1268  ;;  %4453 = vmatprep.mubr.msk.f32.mxu1 %vm5160_vm7, %v7258_v14 }
 0x1fc   : > { %v1508_v5 = vsel %vm461_vm0, %v5778_v15, %v1269_v43 }
 0x1fd   : > { %3294 = vrot.lane.b32.xlu0 %v3289_v61, %s5161_s15  ;;  %3309 = vrot.lane.b32.xlu1 %v3304_v38, %s5162_s17  ;;  %v6239_v49 = vsel %vm1515_vm10, %v1508_v5, %v1436_v25 }
 0x1fe   : > { %4454 = vmatmul.mubr.msk.f32.gmra.mrb[50].mxu1 %vm1593_vm11, %v6226_v10 }
 0x1ff   : > { %v1438_v41 = vpop.permute.xlu1 %1437  ;;  %v1271_v3 = vpop.permute.xlu0 %1270  ;;  %4456 = vmatprep.mubr.msk.f32.mxu1 %vm5160_vm7, %v7258_v14 }
 0x200   : > { %v1509_v15 = vsel %vm461_vm0, %v5786_v23, %v1271_v3 }
 0x201   : > { %3296 = vrot.lane.b32.xlu0 %v3291_v44, %s5161_s15  ;;  %3311 = vrot.lane.b32.xlu1 %v3306_v0, %s5162_s17  ;;  %v6250_v17 = vsel %vm1515_vm10, %v1509_v15, %v1438_v41  ;;  %s6989_s15 = scalar_lea.vmem [#allocation6], %s3828_s21  ;;  %s7172_s21 = scalar_lea.hbm %s7236_s8, %s4084_s23 }
 0x202   : > { %4457 = vmatmul.mubr.msk.f32.gmra.mrb[52].mxu1 %vm1593_vm11, %v6239_v49  ;;  %s3712_s22 = sshll.u32 %s6989_s15, 4  ;;  %s7174_s22 = int_to_ptr.vmem [resolvable:$true] %s3712_s22 }
 0x203   : > { %v1440_v53 = vpop.permute.xlu1 %1439  ;;  %v1273_v45 = vpop.permute.xlu0 %1272  ;;  %4459 = vmatprep.mubr.msk.f32.mxu1 %vm5160_vm7, %v7258_v14  ;;  %s5070_s14 = scalar_lea.vmem %s7174_s22, 4096 }
 0x204   : > { %v1510_v12 = vsel %vm461_vm0, %v5794_v30, %v1273_v45  ;;  %p5071_p8 = scmp.ne.s32.totalorder %s7174_s22, %s5070_s14 }
 0x205   : > { %v6259_v23 = vsel %vm1515_vm10, %v1510_v12, %v1440_v53 }
 0x206   : > { %4460 = vmatmul.mubr.msk.f32.gmra.mrb[54].mxu1 %vm1593_vm11, %v6250_v17  ;;  %p5072_p0 = pnand %p5071_p8, %p7264_p11 }
 0x207   : > { %v1442_v35 = vpop.permute.xlu1 %1441  ;;  %v1275_v61 = vpop.permute.xlu0 %1274  ;;  %4462 = vmatprep.mubr.msk.f32.mxu1 %vm5160_vm7, %v7258_v14 }
 0x208   : > { %v1511_v34 = vsel %vm461_vm0, %v5802_v39, %v1275_v61  ;;  %p5073_p6 = pneg %p5072_p0 }
 0x209   : > { %v6268_v30 = vsel %vm1515_vm10, %v1511_v34, %v1442_v35 }
 0x20a   : > { %4463 = vmatmul.mubr.msk.f32.gmra.mrb[56].mxu1 %vm1593_vm11, %v6259_v23 }
 0x20b   : > { %v1444_v38 = vpop.permute.xlu1 %1443  ;;  %v1277_v6 = vpop.permute.xlu0 %1276  ;;  %4465 = vmatprep.mubr.msk.f32.mxu1 %vm5160_vm7, %v7258_v14 }
 0x20c   : > { %v1512_v63 = vsel %vm461_vm0, %v5810_v50, %v1277_v6 }
 0x20d   : > { %v6277_v39 = vsel %vm1515_vm10, %v1512_v63, %v1444_v38 }
 0x20e   : > { %4466 = vmatmul.mubr.msk.f32.gmra.mrb[58].mxu1 %vm1593_vm11, %v6268_v30 }
 0x20f   : > { %v1446_v25 = vpop.permute.xlu1 %1445  ;;  %v1279_v43 = vpop.permute.xlu0 %1278  ;;  %4468 = vmatprep.mubr.msk.f32.mxu1 %vm5160_vm7, %v7258_v14 }
 0x210   : > { %v1513_v5 = vsel %vm461_vm0, %v5818_v59, %v1279_v43 }
 0x211   : > { %v6286_v50 = vsel %vm1515_vm10, %v1513_v5, %v1446_v25 }
 0x212   : > { %4469 = vmatmul.mubr.msk.f32.gmra.mrb[60].mxu1 %vm1593_vm11, %v6277_v39 }
 0x213   : > { %v1448_v44 = vpop.permute.xlu1 %1447  ;;  %v1281_v0 = vpop.permute.xlu0 %1280  ;;  %4471 = vmatprep.mubr.msk.f32.mxu1 %vm5160_vm7, %v7258_v14 }
 0x214   : > { %v1514_v41 = vsel %vm461_vm0, %v5826_v4, %v1281_v0  ;;  %v2929_v0 = vld [vmem:[%s7232_s4 + $0x8] sm:$0xf] }
 0x215   : > { %v6295_v59 = vsel %vm1515_vm10, %v1514_v41, %v1448_v44 }
 0x216   : > { %4472 = vmatmul.mubr.msk.f32.gmra.mrb[62].mxu1 %vm1593_vm11, %v6286_v50 }
 0x217   : > { %v1576_v3 = vpop.permute.xlu1 %1575  ;;  %v1561_v15 = vpop.permute.xlu0 %1560  ;;  %4474 = vmatprep.mubr.msk.f32.mxu1 %vm5160_vm7, %v7258_v14 }
 0x218   : > { %v1584_v53 = vsel %vm461_vm0, %v5834_v16, %v1561_v15 }
 0x219   : > { %v6304_v4 = vsel %vm1515_vm10, %v1584_v53, %v1576_v3 }
 0x21a   : > { %4475 = vmatmul.mubr.msk.f32.gmra.mrb[64].mxu1 %vm1593_vm11, %v6295_v59 }
 0x21b   : > { %v1578_v45 = vpop.permute.xlu1 %1577  ;;  %v1563_v12 = vpop.permute.xlu0 %1562  ;;  %4477 = vmatprep.mubr.msk.f32.mxu1 %vm5160_vm7, %v7258_v14 }
 0x21c   : > { %v1585_v35 = vsel %vm461_vm0, %v5842_v26, %v1563_v12 }
 0x21d   : > { %v6313_v16 = vsel %vm1515_vm10, %v1585_v35, %v1578_v45 }
 0x21e   : > { %4478 = vmatmul.mubr.msk.f32.gmra.mrb[66].mxu1 %vm1593_vm11, %v6304_v4 }
 0x21f   : > { %v1580_v61 = vpop.permute.xlu1 %1579  ;;  %v1565_v34 = vpop.permute.xlu0 %1564  ;;  %4480 = vmatprep.mubr.msk.f32.mxu1 %vm5160_vm7, %v7258_v14 }
 0x220   : > { %v1586_v38 = vsel %vm461_vm0, %v5854_v46, %v1565_v34 }
 0x221   : > { %v6325_v43 = vsel %vm1515_vm10, %v1586_v38, %v1580_v61 }
 0x222   : > { %4481 = vmatmul.mubr.msk.f32.gmra.mrb[68].mxu1 %vm1593_vm11, %v6313_v16 }
 0x223   : > { %v1384_v6 = vpop.permute.xlu1 %1383  ;;  %v1217_v63 = vpop.permute.xlu0 %1216  ;;  %4483 = vmatprep.mubr.msk.f32.mxu1 %vm5160_vm7, %v7258_v14 }
 0x224   : > { %v1482_v26 = vsel %vm461_vm0, %v5883_v40, %v1217_v63 }
 0x225   : > { %v1516_v25 = vsel %vm1515_vm10, %v1482_v26, %v1384_v6 }
 0x226   : > { %4484 = vmatmul.mubr.msk.f32.gmra.mrb[70].mxu1 %vm1593_vm11, %v6325_v43  ;;  %4491 = vmatmul.mubr.msk.f32.vlgmr.msra.gmra.mrb[30].mxu0 %vm1593_vm11, %v1516_v25 }
 0x227   : > { %v1386_v46 = vpop.permute.xlu1 %1385  ;;  %v1219_v5 = vpop.permute.xlu0 %1218  ;;  %4593 = vmatprep.mubr.msk.f32.mxu1 %vm5160_vm7, %v7258_v14  ;;  %4493 = vmatprep.mubr.msk.f32.mxu0 %vm5160_vm7, %v7258_v14 }
 0x228   : > { %v1483_v40 = vsel %vm461_vm0, %v5885_v32, %v1219_v5  ;;  %v4920_v32 = vpack.c.bf16 %v2929_v0, %v5744_v51  ;;  %v2493_v51 = vld [vmem:[%s7234_s6] sm:$0xf] }
 0x229   : > { %v1517_v44 = vsel %vm1515_vm10, %v1483_v40, %v1386_v46  ;;  %4692 = vmatprep.subr.msk.mxu0 %vm1693_vm4, %v2493_v51 }
 0x22a   : > { %4594 = vmatmul.mubr.msk.f32.vlgmr.msra.gmra.mrb[72].mxu1 %vm1593_vm11, %v5929_v27  ;;  %4494 = vmatmul.mubr.msk.f32.gmra.mrb[32].mxu0 %vm1593_vm11, %v1517_v44 }
 0x22b   : > { %v1388_v41 = vpop.permute.xlu1 %1387  ;;  %v1221_v3 = vpop.permute.xlu0 %1220  ;;  %4596 = vmatprep.mubr.msk.f32.mxu1 %vm5160_vm7, %v7258_v14  ;;  %4496 = vmatprep.mubr.msk.f32.mxu0 %vm5160_vm7, %v7258_v14 }
 0x22c   : > { %v1484_v15 = vsel %vm461_vm0, %v5914_v55, %v1221_v3  ;;  %4922 = vmatpush3.bf16.msk.msra.mxu1 %vm5508_vm6, %v4920_v32  ;;  %4693 = vmatpush3.msk.msra.mxu0 %vm1693_vm4, %v2493_v51 }
 0x22d   : > { %v1518_v53 = vsel %vm1515_vm10, %v1484_v15, %v1388_v41 }
 0x22e   : > { %4597 = vmatmul.mubr.msk.f32.gmra.mrb[74].mxu1 %vm1593_vm11, %v5942_v28  ;;  %4497 = vmatmul.mubr.msk.f32.gmra.mrb[34].mxu0 %vm1593_vm11, %v1518_v53 }
 0x22f   : > { %4599 = vmatprep.mubr.msk.f32.mxu1 %vm5160_vm7, %v7258_v14  ;;  %4499 = vmatprep.mubr.msk.f32.mxu0 %vm5160_vm7, %v7258_v14 }
 0x232   : > { %4600 = vmatmul.mubr.msk.f32.gmra.mrb[76].mxu1 %vm1593_vm11, %v5962_v62  ;;  %4500 = vmatmul.mubr.msk.f32.gmra.mrb[36].mxu0 %vm1593_vm11, %v5862_v60  ;;  %v7259_v60 = vmov 0.0|0.0  }
 0x233   : > { %4602 = vmatprep.mubr.msk.f32.mxu1 %vm5160_vm7, %v7258_v14  ;;  %4502 = vmatprep.mubr.msk.f32.mxu0 %vm5160_vm7, %v7258_v14 }
 0x234   : > { %4915 = vmatprep.subr.bf16.mxu0 %v7259_v60 }
 0x236   : > { %4603 = vmatmul.mubr.msk.f32.gmra.mrb[78].mxu1 %vm1593_vm11, %v5983_v18  ;;  %4503 = vmatmul.mubr.msk.f32.gmra.mrb[38].mxu0 %vm1593_vm11, %v5889_v33 }
 0x237   : > { %4605 = vmatprep.mubr.msk.f32.mxu1 %vm5160_vm7, %v7258_v14  ;;  %4505 = vmatprep.mubr.msk.f32.mxu0 %vm5160_vm7, %v7258_v14 }
 0x23a   : > { %4606 = vmatmul.mubr.msk.f32.gmra.mrb[80].mxu1 %vm1593_vm11, %v6002_v7  ;;  %4506 = vmatmul.mubr.msk.f32.gmra.mrb[40].mxu0 %vm1593_vm11, %v5912_v54 }
 0x23b   : > { %4608 = vmatprep.mubr.msk.f32.mxu1 %vm5160_vm7, %v7258_v14  ;;  %4508 = vmatprep.mubr.msk.f32.mxu0 %vm5160_vm7, %v7258_v14 }
 0x23e   : > { %4609 = vmatmul.mubr.msk.f32.gmra.mrb[82].mxu1 %vm1593_vm11, %v6019_v21  ;;  %4509 = vmatmul.mubr.msk.f32.gmra.mrb[42].mxu0 %vm1593_vm11, %v5929_v27 }
 0x23f   : > { %4611 = vmatprep.mubr.msk.f32.mxu1 %vm5160_vm7, %v7258_v14  ;;  %4511 = vmatprep.mubr.msk.f32.mxu0 %vm5160_vm7, %v7258_v14 }
 0x242   : > { %4612 = vmatmul.mubr.msk.f32.gmra.mrb[84].mxu1 %vm1593_vm11, %v6035_v11  ;;  %4512 = vmatmul.mubr.msk.f32.gmra.mrb[44].mxu0 %vm1593_vm11, %v5942_v28 }
 0x243   : > { %4614 = vmatprep.mubr.msk.f32.mxu1 %vm5160_vm7, %v7258_v14  ;;  %4514 = vmatprep.mubr.msk.f32.mxu0 %vm5160_vm7, %v7258_v14 }
 0x246   : > { %4615 = vmatmul.mubr.msk.f32.gmra.mrb[86].mxu1 %vm1593_vm11, %v6052_v47  ;;  %4515 = vmatmul.mubr.msk.f32.gmra.mrb[46].mxu0 %vm1593_vm11, %v5962_v62 }
 0x247   : > { %4617 = vmatprep.mubr.msk.f32.mxu1 %vm5160_vm7, %v7258_v14  ;;  %4517 = vmatprep.mubr.msk.f32.mxu0 %vm5160_vm7, %v7258_v14 }
 0x24a   : > { %4618 = vmatmul.mubr.msk.f32.gmra.mrb[88].mxu1 %vm1593_vm11, %v6069_v36  ;;  %4518 = vmatmul.mubr.msk.f32.gmra.mrb[48].mxu0 %vm1593_vm11, %v5983_v18 }
 0x24b   : > { %4620 = vmatprep.mubr.msk.f32.mxu1 %vm5160_vm7, %v7258_v14  ;;  %4520 = vmatprep.mubr.msk.f32.mxu0 %vm5160_vm7, %v7258_v14 }
 0x24e   : > { %4621 = vmatmul.mubr.msk.f32.gmra.mrb[90].mxu1 %vm1593_vm11, %v6086_v13  ;;  %4521 = vmatmul.mubr.msk.f32.gmra.mrb[50].mxu0 %vm1593_vm11, %v6002_v7 }
 0x24f   : > { %4623 = vmatprep.mubr.msk.f32.mxu1 %vm5160_vm7, %v7258_v14  ;;  %4523 = vmatprep.mubr.msk.f32.mxu0 %vm5160_vm7, %v7258_v14 }
 0x252   : > { %4624 = vmatmul.mubr.msk.f32.gmra.mrb[92].mxu1 %vm1593_vm11, %v6103_v48  ;;  %4524 = vmatmul.mubr.msk.f32.gmra.mrb[52].mxu0 %vm1593_vm11, %v6019_v21 }
 0x253   : > { %4626 = vmatprep.mubr.msk.f32.mxu1 %vm5160_vm7, %v7258_v14  ;;  %4526 = vmatprep.mubr.msk.f32.mxu0 %vm5160_vm7, %v7258_v14 }
 0x256   : > { %4627 = vmatmul.mubr.msk.f32.gmra.mrb[94].mxu1 %vm1593_vm11, %v6120_v9  ;;  %4527 = vmatmul.mubr.msk.f32.gmra.mrb[54].mxu0 %vm1593_vm11, %v6035_v11 }
 0x257   : > { %4629 = vmatprep.mubr.msk.f32.mxu1 %vm5160_vm7, %v7258_v14  ;;  %4529 = vmatprep.mubr.msk.f32.mxu0 %vm5160_vm7, %v7258_v14 }
 0x25a   : > { %4630 = vmatmul.mubr.msk.f32.gmra.mrb[96].mxu1 %vm1593_vm11, %v6135_v24  ;;  %4530 = vmatmul.mubr.msk.f32.gmra.mrb[56].mxu0 %vm1593_vm11, %v6052_v47 }
 0x25b   : > { %4632 = vmatprep.mubr.msk.f32.mxu1 %vm5160_vm7, %v7258_v14  ;;  %4532 = vmatprep.mubr.msk.f32.mxu0 %vm5160_vm7, %v7258_v14 }
 0x25e   : > { %4633 = vmatmul.mubr.msk.f32.gmra.mrb[98].mxu1 %vm1593_vm11, %v6148_v1  ;;  %4533 = vmatmul.mubr.msk.f32.gmra.mrb[58].mxu0 %vm1593_vm11, %v6069_v36 }
 0x25f   : > { %4635 = vmatprep.mubr.msk.f32.mxu1 %vm5160_vm7, %v7258_v14  ;;  %4535 = vmatprep.mubr.msk.f32.mxu0 %vm5160_vm7, %v7258_v14 }
 0x262   : > { %4636 = vmatmul.mubr.msk.f32.gmra.mrb[100].mxu1 %vm1593_vm11, %v6161_v56  ;;  %4536 = vmatmul.mubr.msk.f32.gmra.mrb[60].mxu0 %vm1593_vm11, %v6086_v13 }
 0x263   : > { %4638 = vmatprep.mubr.msk.f32.mxu1 %vm5160_vm7, %v7258_v14  ;;  %4538 = vmatprep.mubr.msk.f32.mxu0 %vm5160_vm7, %v7258_v14 }
 0x266   : > { %4639 = vmatmul.mubr.msk.f32.gmra.mrb[102].mxu1 %vm1593_vm11, %v6174_v31  ;;  %4539 = vmatmul.mubr.msk.f32.gmra.mrb[62].mxu0 %vm1593_vm11, %v6103_v48 }
 0x267   : > { %4641 = vmatprep.mubr.msk.f32.mxu1 %vm5160_vm7, %v7258_v14  ;;  %4541 = vmatprep.mubr.msk.f32.mxu0 %vm5160_vm7, %v7258_v14 }
 0x26a   : > { %4642 = vmatmul.mubr.msk.f32.gmra.mrb[104].mxu1 %vm1593_vm11, %v6187_v29  ;;  %4542 = vmatmul.mubr.msk.f32.gmra.mrb[64].mxu0 %vm1593_vm11, %v6120_v9 }
 0x26b   : > { %4644 = vmatprep.mubr.msk.f32.mxu1 %vm5160_vm7, %v7258_v14  ;;  %4544 = vmatprep.mubr.msk.f32.mxu0 %vm5160_vm7, %v7258_v14 }
 0x26e   : > { %4645 = vmatmul.mubr.msk.f32.gmra.mrb[106].mxu1 %vm1593_vm11, %v6200_v19  ;;  %4545 = vmatmul.mubr.msk.f32.gmra.mrb[66].mxu0 %vm1593_vm11, %v6135_v24 }
 0x26f   : > { %4647 = vmatprep.mubr.msk.f32.mxu1 %vm5160_vm7, %v7258_v14  ;;  %4547 = vmatprep.mubr.msk.f32.mxu0 %vm5160_vm7, %v7258_v14 }
 0x272   : > { %4648 = vmatmul.mubr.msk.f32.gmra.mrb[108].mxu1 %vm1593_vm11, %v6213_v42  ;;  %4548 = vmatmul.mubr.msk.f32.gmra.mrb[68].mxu0 %vm1593_vm11, %v6148_v1  ;;  %v2157_v1 = vpop.permute.xlu0 %2156 }
 0x273   : > { %4650 = vmatprep.mubr.msk.f32.mxu1 %vm5160_vm7, %v7258_v14  ;;  %4550 = vmatprep.mubr.msk.f32.mxu0 %vm5160_vm7, %v7258_v14 }
 0x276   : > { %4651 = vmatmul.mubr.msk.f32.gmra.mrb[110].mxu1 %vm1593_vm11, %v6226_v10  ;;  %4551 = vmatmul.mubr.msk.f32.gmra.mrb[70].mxu0 %vm1593_vm11, %v6161_v56 }
 0x277   : > { %4653 = vmatprep.mubr.msk.f32.mxu1 %vm5160_vm7, %v7258_v14  ;;  %4553 = vmatprep.mubr.msk.f32.mxu0 %vm5160_vm7, %v7258_v14 }
 0x279   : > { %v6510_v33 = vpop.f32.mrb[6].mxu1 }
 0x27a   : > { %v4389_v54 = vpop.f32.mrb[7].mxu1  ;;  %4654 = vmatmul.mubr.msk.f32.gmra.mrb[112].mxu1 %vm1593_vm11, %v6239_v49  ;;  %4554 = vmatmul.mubr.msk.f32.gmra.mrb[72].mxu0 %vm1593_vm11, %v6174_v31  ;;  %v2172_v31 = vpop.permute.xlu1 %2171 }
 0x27b   : > { %4656 = vmatprep.mubr.msk.f32.mxu1 %vm5160_vm7, %v7258_v14  ;;  %4556 = vmatprep.mubr.msk.f32.mxu0 %vm5160_vm7, %v7258_v14 }
 0x27d   : > { %v6520_v55 = vpop.f32.mrb[8].mxu1 }
 0x27e   : > { %v4392_v27 = vpop.f32.mrb[9].mxu1  ;;  %4657 = vmatmul.mubr.msk.f32.gmra.mrb[114].mxu1 %vm1593_vm11, %v6250_v17  ;;  %4557 = vmatmul.mubr.msk.f32.gmra.mrb[74].mxu0 %vm1593_vm11, %v6187_v29 }
 0x27f   : > { %4659 = vmatprep.mubr.msk.f32.mxu1 %vm5160_vm7, %v7258_v14  ;;  %4559 = vmatprep.mubr.msk.f32.mxu0 %vm5160_vm7, %v7258_v14 }
 0x281   : > { %v1773_v28 = vpop.f32.mrb[10].mxu1 }
 0x282   : > { %v4395_v62 = vpop.f32.mrb[11].mxu1  ;;  %4660 = vmatmul.mubr.msk.f32.gmra.mrb[116].mxu1 %vm1593_vm11, %v6259_v23  ;;  %4560 = vmatmul.mubr.msk.f32.gmra.mrb[76].mxu0 %vm1593_vm11, %v6200_v19  ;;  %v2159_v19 = vpop.permute.xlu0 %2158 }
 0x283   : > { %4662 = vmatprep.mubr.msk.f32.mxu1 %vm5160_vm7, %v7258_v14  ;;  %4562 = vmatprep.mubr.msk.f32.mxu0 %vm5160_vm7, %v7258_v14  ;;  %v2181_v12 = vsel %vm461_vm0, %v5944_v37, %v2159_v19 }
 0x285   : > { %v6538_v18 = vpop.f32.mrb[12].mxu1 }
 0x286   : > { %v4398_v7 = vpop.f32.mrb[13].mxu1  ;;  %4663 = vmatmul.mubr.msk.f32.gmra.mrb[118].mxu1 %vm1593_vm11, %v6268_v30  ;;  %4563 = vmatmul.mubr.msk.f32.gmra.mrb[78].mxu0 %vm1593_vm11, %v6213_v42 }
 0x287   : > { %4665 = vmatprep.mubr.msk.f32.mxu1 %vm5160_vm7, %v7258_v14  ;;  %4565 = vmatprep.mubr.msk.f32.mxu0 %vm5160_vm7, %v7258_v14 }
 0x289   : > { %v6548_v21 = vpop.f32.mrb[14].mxu1 }
 0x28a   : > { %v4401_v11 = vpop.f32.mrb[15].mxu1  ;;  %4666 = vmatmul.mubr.msk.f32.gmra.mrb[120].mxu1 %vm1593_vm11, %v6277_v39  ;;  %4566 = vmatmul.mubr.msk.f32.gmra.mrb[80].mxu0 %vm1593_vm11, %v6226_v10  ;;  %v5000_v10 = vld [vmem:[#allocation2 + $0x120] sm:$0xff] }
 0x28b   : > { %4668 = vmatprep.mubr.msk.f32.mxu1 %vm5160_vm7, %v7258_v14  ;;  %4568 = vmatprep.mubr.msk.f32.mxu0 %vm5160_vm7, %v7258_v14 }
 0x28d   : > { %v1787_v47 = vpop.f32.mrb[16].mxu1 }
 0x28e   : > { %v4404_v36 = vpop.f32.mrb[17].mxu1  ;;  %4669 = vmatmul.mubr.msk.f32.gmra.mrb[122].mxu1 %vm1593_vm11, %v6286_v50  ;;  %4569 = vmatmul.mubr.msk.f32.gmra.mrb[82].mxu0 %vm1593_vm11, %v6239_v49  ;;  %v2180_v49 = vsel %vm461_vm0, %v5000_v10, %v2157_v1 }
 0x28f   : > { %4671 = vmatprep.mubr.msk.f32.mxu1 %vm5160_vm7, %v7258_v14  ;;  %4571 = vmatprep.mubr.msk.f32.mxu0 %vm5160_vm7, %v7258_v14  ;;  %v6608_v45 = vsel %vm1515_vm10, %v2180_v49, %v2172_v31 }
 0x291   : > { %v6566_v13 = vpop.f32.mrb[18].mxu1 }
 0x292   : > { %v4407_v48 = vpop.f32.mrb[19].mxu1  ;;  %4672 = vmatmul.mubr.msk.f32.gmra.mrb[124].mxu1 %vm1593_vm11, %v6295_v59  ;;  %4572 = vmatmul.mubr.msk.f32.gmra.mrb[84].mxu0 %vm1593_vm11, %v6250_v17 }
 0x293   : > { %4674 = vmatprep.mubr.msk.f32.mxu1 %vm5160_vm7, %v7258_v14  ;;  %4574 = vmatprep.mubr.msk.f32.mxu0 %vm5160_vm7, %v7258_v14 }
 0x295   : > { %v6576_v9 = vpop.f32.mrb[20].mxu1 }
 0x296   : > { %v4410_v24 = vpop.f32.mrb[21].mxu1  ;;  %4675 = vmatmul.mubr.msk.f32.gmra.mrb[126].mxu1 %vm1593_vm11, %v6304_v4  ;;  %4575 = vmatmul.mubr.msk.f32.gmra.mrb[86].mxu0 %vm1593_vm11, %v6259_v23  ;;  %v2174_v23 = vpop.permute.xlu1 %2173 }
 0x297   : > { %4677 = vmatprep.mubr.msk.f32.mxu1 %vm5160_vm7, %v7258_v14  ;;  %4577 = vmatprep.mubr.msk.f32.mxu0 %vm5160_vm7, %v7258_v14  ;;  %v6621_v34 = vsel %vm1515_vm10, %v2181_v12, %v2174_v23 }
 0x299   : > { %v1801_v56 = vpop.f32.mrb[22].mxu1 }
 0x29a   : > { %v4413_v29 = vpop.f32.mrb[23].mxu1  ;;  %4678 = vmatmul.mubr.msk.f32.gmra.mrb[128].mxu1 %vm1593_vm11, %v6313_v16  ;;  %4578 = vmatmul.mubr.msk.f32.gmra.mrb[88].mxu0 %vm1593_vm11, %v6268_v30  ;;  %v2176_v38 = vpop.permute.xlu1 %2175 }
 0x29b   : > { %4680 = vmatprep.mubr.msk.f32.mxu1 %vm5160_vm7, %v7258_v14  ;;  %4580 = vmatprep.mubr.msk.f32.mxu0 %vm5160_vm7, %v7258_v14 }
 0x29d   : > { %v6594_v42 = vpop.f32.mrb[24].mxu1 }
 0x29e   : > { %v4416_v17 = vpop.f32.mrb[25].mxu1  ;;  %4681 = vmatmul.mubr.msk.f32.gmra.mrb[130].mxu1 %vm1593_vm11, %v6325_v43  ;;  %4581 = vmatmul.mubr.msk.f32.gmra.mrb[90].mxu0 %vm1593_vm11, %v6277_v39  ;;  %v2161_v39 = vpop.permute.xlu0 %2160 }
 0x29f   : > { %4683 = vmatprep.mubr.msk.f32.mxu1 %vm5160_vm7, %v7258_v14  ;;  %4583 = vmatprep.mubr.msk.f32.mxu0 %vm5160_vm7, %v7258_v14  ;;  %v2182_v37 = vsel %vm461_vm0, %v5965_v2, %v2161_v39  ;;  %v2884_v40 = vpop.permute.xlu1 %2883  ;;  %v7260_v39 = vld [vmem:[#allocation9_spill] sm:$0xff] }
 0x2a0   : > { %v6634_v63 = vsel %vm1515_vm10, %v2182_v37, %v2176_v38 }
 0x2a1   : > { %v6605_v30 = vpop.f32.mrb[26].mxu1 }
 0x2a2   : > { %v4419_v35 = vpop.f32.mrb[27].mxu1  ;;  %4684 = vmatmul.mubr.msk.f32.gmra.mrb[132].mxu1 %vm1593_vm11, %v6608_v45  ;;  %4584 = vmatmul.mubr.msk.f32.gmra.mrb[92].mxu0 %vm1593_vm11, %v6286_v50 }
 0x2a3   : > { %4686 = vmatprep.mubr.msk.f32.mxu1 %vm5160_vm7, %v7258_v14  ;;  %4586 = vmatprep.mubr.msk.f32.mxu0 %vm5160_vm7, %v7258_v14  ;;  %v2886_v3 = vpop.permute.xlu1 %2885 }
 0x2a5   : > { %v1815_v61 = vpop.f32.mrb[28].mxu1 }
 0x2a6   : > { %v4422_v6 = vpop.f32.mrb[29].mxu1  ;;  %4687 = vmatmul.mubr.msk.f32.gmra.mrb[134].mxu1 %vm1593_vm11, %v6621_v34  ;;  %4587 = vmatmul.mubr.msk.f32.gmra.mrb[94].mxu0 %vm1593_vm11, %v6295_v59  ;;  %v2839_v59 = vpop.permute.xlu0 %2838 }
 0x2a7   : > { %4689 = vmatprep.mubr.msk.f32.mxu1 %vm5160_vm7, %v7258_v14  ;;  %v2888_v51 = vpop.permute.xlu1 %2887 }
 0x2a9   : > { %v6631_v50 = vpop.f32.mrb[30].mxu1 }
 0x2aa   : > { %v4425_v26 = vpop.f32.mrb[31].mxu1  ;;  %4690 = vmatmul.mubr.msk.f32.gmra.mrb[136].mxu1 %vm1593_vm11, %v6634_v63 }
 0x2ab   : > { %4780 = vmatprep.mubr.msk.f32.mxu1 %vm5160_vm7, %v7258_v14 }
 0x2ad   : > { %v6640_v2 = vpop.f32.mrb[32].mxu1 }
 0x2ae   : > { %v4428_v25 = vpop.f32.mrb[33].mxu1  ;;  %4781 = vmatmul.mubr.msk.f32.vlgmr.msra.gmra.mrb[138].mxu1 %vm1593_vm11, %v6304_v4  ;;  %v2841_v4 = vpop.permute.xlu0 %2840 }
 0x2af   : > { %4783 = vmatprep.mubr.msk.f32.mxu1 %vm5160_vm7, %v7258_v14  ;;  %v2911_v7 = vsel %vm461_vm0, %v5994_v22, %v2841_v4 }
 0x2b0   : > { %v6684_v36 = vsel %vm1515_vm10, %v2911_v7, %v2886_v3  ;;  %v7262_v3 = vld [vmem:[#allocation11_spill] sm:$0xff] }
 0x2b1   : > { %v1829_v46 = vpop.f32.mrb[34].mxu1 }
 0x2b2   : > { %v4431_v5 = vpop.f32.mrb[35].mxu1  ;;  %4784 = vmatmul.mubr.msk.f32.gmra.mrb[140].mxu1 %vm1593_vm11, %v6313_v16  ;;  %v2843_v16 = vpop.permute.xlu0 %2842 }
 0x2b3   : > { %4786 = vmatprep.mubr.msk.f32.mxu1 %vm5160_vm7, %v7258_v14  ;;  %v2912_v48 = vsel %vm461_vm0, %v6011_v52, %v2843_v16 }
 0x2b4   : > { %v6693_v22 = vsel %vm1515_vm10, %v2912_v48, %v2888_v51 }
 0x2b5   : > { %v6650_v44 = vpop.f32.mrb[36].mxu1 }
 0x2b6   : > { %v4434_v0 = vpop.f32.mrb[37].mxu1  ;;  %4787 = vmatmul.mubr.msk.f32.gmra.mrb[142].mxu1 %vm1593_vm11, %v6325_v43  ;;  %v2910_v43 = vsel %vm461_vm0, %v5986_v20, %v2839_v59  ;;  %v2845_v62 = vpop.permute.xlu0 %2844  ;;  %v7261_v59 = vld [vmem:[#allocation10_spill] sm:$0xff] }
 0x2b7   : > { %4789 = vmatprep.mubr.msk.f32.mxu1 %vm5160_vm7, %v7258_v14  ;;  %v6673_v28 = vsel %vm1515_vm10, %v2910_v43, %v2884_v40  ;;  %v2890_v20 = vpop.permute.xlu1 %2889  ;;  %v2913_v31 = vsel %vm461_vm0, %v6032_v8, %v2845_v62 }
 0x2b8   : > { %v6704_v52 = vsel %vm1515_vm10, %v2913_v31, %v2890_v20 }
 0x2b9   : > { %v6656_v41 = vpop.f32.mrb[38].mxu1 }
 0x2ba   : > { %v4437_v32 = vpop.f32.mrb[39].mxu1  ;;  %4790 = vmatmul.mubr.msk.f32.gmra.mrb[144].mxu1 %vm1593_vm11, %v6608_v45  ;;  %v2847_v24 = vpop.permute.xlu0 %2846 }
 0x2bb   : > { %4792 = vmatprep.mubr.msk.f32.mxu1 %vm5160_vm7, %v7258_v14  ;;  %v2892_v29 = vpop.permute.xlu1 %2891  ;;  %v2914_v17 = vsel %vm461_vm0, %v6047_v57, %v2847_v24 }
 0x2bc   : > { %v6715_v35 = vsel %vm1515_vm10, %v2914_v17, %v2892_v29 }
 0x2bd   : > { %v1843_v15 = vpop.f32.mrb[40].mxu1 }
 0x2be   : > { %v4440_v53 = vpop.f32.mrb[41].mxu1  ;;  %4793 = vmatmul.mubr.msk.f32.gmra.mrb[146].mxu1 %vm1593_vm11, %v6621_v34  ;;  %v2849_v49 = vpop.permute.xlu0 %2848 }
 0x2bf   : > { %4795 = vmatprep.mubr.msk.f32.mxu1 %vm5160_vm7, %v7258_v14  ;;  %v2894_v8 = vpop.permute.xlu1 %2893  ;;  %v2915_v61 = vsel %vm461_vm0, %v7260_v39, %v2849_v49 }
 0x2c0   : > { %v6724_v57 = vsel %vm1515_vm10, %v2915_v61, %v2894_v8 }
 0x2c1   : > { %v6668_v54 = vpop.f32.mrb[42].mxu1 }
 0x2c2   : > { %v4443_v27 = vpop.f32.mrb[43].mxu1  ;;  %4796 = vmatmul.mubr.msk.f32.gmra.mrb[148].mxu1 %vm1593_vm11, %v6634_v63  ;;  %v2851_v38 = vpop.permute.xlu0 %2850 }
 0x2c3   : > { %4798 = vmatprep.mubr.msk.f32.mxu1 %vm5160_vm7, %v7258_v14  ;;  %v2896_v26 = vpop.permute.xlu1 %2895  ;;  %v2916_v46 = vsel %vm461_vm0, %v7261_v59, %v2851_v38  ;;  %v7263_v27 = vld [vmem:[#allocation12_spill] sm:$0xff] }
 0x2c4   : > { %v6737_v0 = vsel %vm1515_vm10, %v2916_v46, %v2896_v26  ;;  %v6773_v26 = vld [vmem:[%s7233_s5] ss:$0 sm:$0xff] }
 0x2c5   : > { %v6679_v11 = vpop.f32.mrb[44].mxu1 }
 0x2c6   : > { %v4446_v47 = vpop.f32.mrb[45].mxu1  ;;  %4799 = vmatmul.mubr.msk.f32.gmra.mrb[150].mxu1 %vm1593_vm11, %v6673_v28  ;;  %v2853_v40 = vpop.permute.xlu0 %2852 }
 0x2c7   : > { %4801 = vmatprep.mubr.msk.f32.mxu1 %vm5160_vm7, %v7258_v14  ;;  %v2917_v32 = vsel %vm461_vm0, %v7262_v3, %v2853_v40  ;;  %v2898_v16 = vpop.permute.xlu1 %2897 }
 0x2c8   : > { %v6748_v53 = vsel %vm1515_vm10, %v2917_v32, %v2898_v16 }
 0x2c9   : > { %v1857_v1 = vpop.f32.mrb[46].mxu1 }
 0x2ca   : > { %v4449_v56 = vpop.f32.mrb[47].mxu1  ;;  %4802 = vmatmul.mubr.msk.f32.gmra.mrb[152].mxu1 %vm1593_vm11, %v6684_v36  ;;  %v2855_v43 = vpop.permute.xlu0 %2854 }
 0x2cb   : > { %4804 = vmatprep.mubr.msk.f32.mxu1 %vm5160_vm7, %v7258_v14  ;;  %v2918_v62 = vsel %vm461_vm0, %v7263_v27, %v2855_v43  ;;  %v2900_v20 = vpop.permute.xlu1 %2899 }
 0x2cc   : > { %v6757_v47 = vsel %vm1515_vm10, %v2918_v62, %v2900_v20  ;;  %v4002_v62 = vld [vmem:[%s7232_s4 + $0x10] sm:$0xff] }
 0x2cd   : > { %v6699_v19 = vpop.f32.mrb[48].mxu1 }
 0x2ce   : > { %v4452_v10 = vpop.f32.mrb[49].mxu1  ;;  %4805 = vmatmul.mubr.msk.f32.gmra.mrb[154].mxu1 %vm1593_vm11, %v6693_v22 }
 0x2cf   : > { %4807 = vmatprep.mubr.msk.f32.mxu1 %vm5160_vm7, %v7258_v14 }
 0x2d1   : > { %v6710_v23 = vpop.f32.mrb[50].mxu1 }
 0x2d2   : > { %v4455_v12 = vpop.f32.mrb[51].mxu1  ;;  %4808 = vmatmul.mubr.msk.f32.gmra.mrb[156].mxu1 %vm1593_vm11, %v6704_v52 }
 0x2d3   : > { %4810 = vmatprep.mubr.msk.f32.mxu1 %vm5160_vm7, %v7258_v14 }
 0x2d5   : > { %v1871_v37 = vpop.f32.mrb[52].mxu1 }
 0x2d6   : > { %v4458_v6 = vpop.f32.mrb[53].mxu1  ;;  %4811 = vmatmul.mubr.msk.f32.gmra.mrb[158].mxu1 %vm1593_vm11, %v6715_v35 }
 0x2d7   : > { %4813 = vmatprep.mubr.msk.f32.mxu1 %vm5160_vm7, %v7258_v14 }
 0x2d9   : > { %v6728_v25 = vpop.f32.mrb[54].mxu1 }
 0x2da   : > { %v4461_v5 = vpop.f32.mrb[55].mxu1  ;;  %4814 = vmatmul.mubr.msk.f32.gmra.mrb[160].mxu1 %vm1593_vm11, %v6724_v57 }
 0x2db   : > { %4816 = vmatprep.mubr.msk.f32.mxu1 %vm5160_vm7, %v7258_v14 }
 0x2dd   : > { %v6739_v4 = vpop.f32.mrb[56].mxu1 }
 0x2de   : > { %v4464_v15 = vpop.f32.mrb[57].mxu1  ;;  %4817 = vmatmul.mubr.msk.f32.gmra.mrb[162].mxu1 %vm1593_vm11, %v6737_v0 }
 0x2df   : > { %4819 = vmatprep.mubr.msk.f32.mxu1 %vm5160_vm7, %v7258_v14 }
 0x2e1   : > { %v1885_v51 = vpop.f32.mrb[58].mxu1 }
 0x2e2   : > { %v4467_v7 = vpop.f32.mrb[59].mxu1  ;;  %4820 = vmatmul.mubr.msk.f32.gmra.mrb[164].mxu1 %vm1593_vm11, %v6748_v53 }
 0x2e3   : > { %4822 = vmatprep.mubr.msk.f32.mxu1 %vm5160_vm7, %v7258_v14  ;;  %v4003_v7 = vld [vmem:[%s7232_s4 + $0x18] sm:$0xf] }
 0x2e5   : > { %v6759_v48 = vpop.f32.mrb[60].mxu1 }
 0x2e6   : > { %v4470_v24 = vpop.f32.mrb[61].mxu1  ;;  %4823 = vmatmul.mubr.msk.f32.gmra.mrb[166].mxu1 %vm1593_vm11, %v6757_v47 }
 0x2e9   : > { %v6763_v1 = vpop.f32.mrb[62].mxu1 }
 0x2ea   : > { %v4473_v56 = vpop.f32.mrb[63].mxu1 }
 0x2eb   : > { %v4916_v56 = vpack.c.bf16 %v4003_v7, %v4002_v62 }
 0x2ed   : > { %v1899_v31 = vpop.f32.mrb[64].mxu1 }
 0x2ee   : > { %v4476_v29 = vpop.f32.mrb[65].mxu1 }
 0x2f1   : > { %v6765_v10 = vpop.f32.mrb[66].mxu1 }
 0x2f2   : > { %v4479_v49 = vpop.f32.mrb[67].mxu1 }
 0x2f5   : > { %v6767_v17 = vpop.f32.mrb[68].mxu1 }
 0x2f6   : > { %v4482_v8 = vpop.f32.mrb[69].mxu1 }
 0x2f9   : > { %v1913_v12 = vpop.f32.mrb[70].mxu1  ;;  %v1994_v39 = vpop.f32.mrb[30].mxu0 }
 0x2fa   : > { %v4485_v61 = vpop.f32.mrb[71].mxu1  ;;  %v1995_v38 = vadd.f32 %v1994_v39, %v6510_v33  ;;  %v4492_v37 = vpop.f32.mrb[31].mxu0 }
 0x2fd   : > { %v2267_v6 = vpop.f32.mrb[72].mxu1  ;;  %v1999_v59 = vpop.f32.mrb[32].mxu0 }
 0x2fe   : > { %v2420_v46 = vadd.f32 %v2267_v6, %v1995_v38  ;;  %v2000_v5 = vadd.f32 %v1999_v59, %v6520_v55  ;;  %v4595_v40 = vpop.f32.mrb[73].mxu1  ;;  %v4495_v3 = vpop.f32.mrb[33].mxu0 }
 0x300   : > { %v2449_v32 = vadd.f32 %v6773_v26, %v2420_v46 }
 0x301   : > { %v2272_v16 = vpop.f32.mrb[74].mxu1  ;;  %v2004_v15 = vpop.f32.mrb[34].mxu0 }
 0x302   : > { %v2471_v43 = vmax.f32 %v2449_v32, 0.0  ;;  %v2421_v51 = vadd.f32 %v2272_v16, %v2000_v5  ;;  %v4598_v33 = vpop.f32.mrb[75].mxu1  ;;  %v4498_v27 = vpop.f32.mrb[35].mxu0 }
 0x304   : > { %v2450_v55 = vadd.f32 %v6773_v26, %v2421_v51  ;;  %4694 = vmatprep.mubr.msk.f32.mxu0 %vm461_vm0, %v2471_v43 }
 0x305   : > { %v2277_v20 = vpop.f32.mrb[76].mxu1  ;;  %v2008_v24 = vpop.f32.mrb[36].mxu0 }
 0x306   : > { %v2472_v31 = vmax.f32 %v2450_v55, 0.0  ;;  %v2009_v29 = vadd.f32 %v2008_v24, %v6538_v18  ;;  %v4601_v49 = vpop.f32.mrb[77].mxu1  ;;  %v4501_v8 = vpop.f32.mrb[37].mxu0 }
 0x308   : > { %4695 = vmatmul.mubr.msk.f32.vlgmr.msra.gmra.mrb[96].mxu0 %vm461_vm0, %v2472_v31 }
 0x309   : > { %v2281_v12 = vpop.f32.mrb[78].mxu1  ;;  %v2013_v39 = vpop.f32.mrb[38].mxu0  ;;  %4918 = vmatpush3.bf16.msk.msra.mxu0 %vm5508_vm6, %v4916_v56 }
 0x30a   : > { %v2422_v61 = vadd.f32 %v2281_v12, %v2009_v29  ;;  %v2014_v38 = vadd.f32 %v2013_v39, %v6548_v21  ;;  %v4604_v37 = vpop.f32.mrb[79].mxu1  ;;  %v4504_v6 = vpop.f32.mrb[39].mxu0  ;;  %4923 = vmatprep.subr.bf16.mxu0 %v7259_v60 }
 0x30c   : > { %v2451_v59 = vadd.f32 %v6773_v26, %v2422_v61 }
 0x30d   : > { %v2286_v46 = vpop.f32.mrb[80].mxu1  ;;  %v2018_v18 = vpop.f32.mrb[40].mxu0 }
 0x30e   : > { %v2473_v5 = vmax.f32 %v2451_v59, 0.0  ;;  %v2423_v40 = vadd.f32 %v2286_v46, %v2014_v38  ;;  %v4607_v3 = vpop.f32.mrb[81].mxu1  ;;  %v4507_v32 = vpop.f32.mrb[41].mxu0 }
 0x310   : > { %v2452_v16 = vadd.f32 %v6773_v26, %v2423_v40  ;;  %4697 = vmatprep.mubr.msk.f32.mxu0 %vm461_vm0, %v2473_v5 }
 0x311   : > { %v2291_v15 = vpop.f32.mrb[82].mxu1  ;;  %v2022_v43 = vpop.f32.mrb[42].mxu0 }
 0x312   : > { %v2474_v51 = vmax.f32 %v2452_v16, 0.0  ;;  %v2023_v21 = vadd.f32 %v2022_v43, %v6566_v13  ;;  %v4610_v33 = vpop.f32.mrb[83].mxu1  ;;  %v4510_v27 = vpop.f32.mrb[43].mxu0 }
 0x314   : > { %4698 = vmatmul.mubr.msk.f32.gmra.mrb[98].mxu0 %vm461_vm0, %v2474_v51 }
 0x315   : > { %v2295_v60 = vpop.f32.mrb[84].mxu1  ;;  %v2027_v62 = vpop.f32.mrb[44].mxu0 }
 0x316   : > { %v2424_v7 = vadd.f32 %v2295_v60, %v2023_v21  ;;  %v2028_v55 = vadd.f32 %v2027_v62, %v6576_v9  ;;  %v4613_v20 = vpop.f32.mrb[85].mxu1  ;;  %v4513_v24 = vpop.f32.mrb[45].mxu0 }
 0x318   : > { %v2453_v56 = vadd.f32 %v6773_v26, %v2424_v7 }
 0x319   : > { %v2300_v31 = vpop.f32.mrb[86].mxu1  ;;  %v2032_v29 = vpop.f32.mrb[46].mxu0 }
 0x31a   : > { %v2475_v49 = vmax.f32 %v2453_v56, 0.0  ;;  %v2425_v8 = vadd.f32 %v2300_v31, %v2028_v55  ;;  %v4616_v12 = vpop.f32.mrb[87].mxu1  ;;  %v4516_v39 = vpop.f32.mrb[47].mxu0 }
 0x31c   : > { %v2454_v13 = vadd.f32 %v6773_v26, %v2425_v8  ;;  %4700 = vmatprep.mubr.msk.f32.mxu0 %vm461_vm0, %v2475_v49 }
 0x31d   : > { %v2305_v61 = vpop.f32.mrb[88].mxu1  ;;  %v2036_v38 = vpop.f32.mrb[48].mxu0 }
 0x31e   : > { %v2476_v37 = vmax.f32 %v2454_v13, 0.0  ;;  %v2037_v6 = vadd.f32 %v2036_v38, %v6594_v42  ;;  %v4619_v9 = vpop.f32.mrb[89].mxu1  ;;  %v4519_v59 = vpop.f32.mrb[49].mxu0 }
 0x320   : > { %4701 = vmatmul.mubr.msk.f32.gmra.mrb[100].mxu0 %vm461_vm0, %v2476_v37 }
 0x321   : > { %v2309_v46 = vpop.f32.mrb[90].mxu1  ;;  %v2041_v18 = vpop.f32.mrb[50].mxu0 }
 0x322   : > { %v2426_v5 = vadd.f32 %v2309_v46, %v2037_v6  ;;  %v2042_v40 = vadd.f32 %v2041_v18, %v6605_v30  ;;  %v4622_v3 = vpop.f32.mrb[91].mxu1  ;;  %v4522_v32 = vpop.f32.mrb[51].mxu0 }
 0x324   : > { %v2455_v16 = vadd.f32 %v6773_v26, %v2426_v5 }
 0x325   : > { %v2314_v15 = vpop.f32.mrb[92].mxu1  ;;  %v2046_v43 = vpop.f32.mrb[52].mxu0 }
 0x326   : > { %v2477_v51 = vmax.f32 %v2455_v16, 0.0  ;;  %v2427_v21 = vadd.f32 %v2314_v15, %v2042_v40  ;;  %v4625_v33 = vpop.f32.mrb[93].mxu1  ;;  %v4525_v27 = vpop.f32.mrb[53].mxu0 }
 0x328   : > { %v2456_v42 = vadd.f32 %v6773_v26, %v2427_v21  ;;  %4703 = vmatprep.mubr.msk.f32.mxu0 %vm461_vm0, %v2477_v51 }
 0x329   : > { %v2319_v60 = vpop.f32.mrb[94].mxu1  ;;  %v2050_v62 = vpop.f32.mrb[54].mxu0 }
 0x32a   : > { %v2478_v7 = vmax.f32 %v2456_v42, 0.0  ;;  %v2051_v55 = vadd.f32 %v2050_v62, %v6631_v50  ;;  %v4628_v30 = vpop.f32.mrb[95].mxu1  ;;  %v4528_v20 = vpop.f32.mrb[55].mxu0 }
 0x32c   : > { %4704 = vmatmul.mubr.msk.f32.gmra.mrb[102].mxu0 %vm461_vm0, %v2478_v7 }
 0x32d   : > { %v2323_v24 = vpop.f32.mrb[96].mxu1  ;;  %v2055_v56 = vpop.f32.mrb[56].mxu0 }
 0x32e   : > { %v2428_v31 = vadd.f32 %v2323_v24, %v2051_v55  ;;  %v2056_v29 = vadd.f32 %v2055_v56, %v6640_v2  ;;  %v4631_v49 = vpop.f32.mrb[97].mxu1  ;;  %v4531_v8 = vpop.f32.mrb[57].mxu0 }
 0x330   : > { %v2457_v12 = vadd.f32 %v6773_v26, %v2428_v31 }
 0x331   : > { %v2328_v39 = vpop.f32.mrb[98].mxu1  ;;  %v2060_v13 = vpop.f32.mrb[58].mxu0 }
 0x332   : > { %v2479_v61 = vmax.f32 %v2457_v12, 0.0  ;;  %v2429_v38 = vadd.f32 %v2328_v39, %v2056_v29  ;;  %v4634_v37 = vpop.f32.mrb[99].mxu1  ;;  %v4534_v6 = vpop.f32.mrb[59].mxu0 }
 0x334   : > { %v2458_v50 = vadd.f32 %v6773_v26, %v2429_v38  ;;  %4706 = vmatprep.mubr.msk.f32.mxu0 %vm461_vm0, %v2479_v61 }
 0x335   : > { %v2333_v9 = vpop.f32.mrb[100].mxu1  ;;  %v2064_v59 = vpop.f32.mrb[60].mxu0 }
 0x336   : > { %v2480_v46 = vmax.f32 %v2458_v50, 0.0  ;;  %v2065_v18 = vadd.f32 %v2064_v59, %v6650_v44  ;;  %v4637_v2 = vpop.f32.mrb[101].mxu1  ;;  %v4537_v5 = vpop.f32.mrb[61].mxu0 }
 0x338   : > { %4707 = vmatmul.mubr.msk.f32.gmra.mrb[104].mxu0 %vm461_vm0, %v2480_v46 }
 0x339   : > { %v2337_v40 = vpop.f32.mrb[102].mxu1  ;;  %v2069_v3 = vpop.f32.mrb[62].mxu0 }
 0x33a   : > { %v2430_v32 = vadd.f32 %v2337_v40, %v2065_v18  ;;  %v2070_v16 = vadd.f32 %v2069_v3, %v6656_v41  ;;  %v4640_v15 = vpop.f32.mrb[103].mxu1  ;;  %v4540_v43 = vpop.f32.mrb[63].mxu0 }
 0x33c   : > { %v2459_v51 = vadd.f32 %v6773_v26, %v2430_v32 }
 0x33d   : > { %v2342_v21 = vpop.f32.mrb[104].mxu1  ;;  %v2074_v33 = vpop.f32.mrb[64].mxu0 }
 0x33e   : > { %v2481_v27 = vmax.f32 %v2459_v51, 0.0  ;;  %v2431_v42 = vadd.f32 %v2342_v21, %v2070_v16  ;;  %v4643_v60 = vpop.f32.mrb[105].mxu1  ;;  %v4543_v62 = vpop.f32.mrb[65].mxu0 }
 0x340   : > { %v2460_v44 = vadd.f32 %v6773_v26, %v2431_v42  ;;  %4709 = vmatprep.mubr.msk.f32.mxu0 %vm461_vm0, %v2481_v27 }
 0x341   : > { %v2347_v7 = vpop.f32.mrb[106].mxu1  ;;  %v2078_v55 = vpop.f32.mrb[66].mxu0 }
 0x342   : > { %v2482_v30 = vmax.f32 %v2460_v44, 0.0  ;;  %v2079_v20 = vadd.f32 %v2078_v55, %v6668_v54  ;;  %v4646_v41 = vpop.f32.mrb[107].mxu1  ;;  %v4546_v24 = vpop.f32.mrb[67].mxu0 }
 0x344   : > { %4710 = vmatmul.mubr.msk.f32.gmra.mrb[106].mxu0 %vm461_vm0, %v2482_v30 }
 0x345   : > { %v2351_v56 = vpop.f32.mrb[108].mxu1  ;;  %v2083_v31 = vpop.f32.mrb[68].mxu0 }
 0x346   : > { %v2432_v29 = vadd.f32 %v2351_v56, %v2079_v20  ;;  %v2084_v49 = vadd.f32 %v2083_v31, %v6679_v11  ;;  %v4649_v8 = vpop.f32.mrb[109].mxu1  ;;  %v4549_v12 = vpop.f32.mrb[69].mxu0 }
 0x348   : > { %v2461_v39 = vadd.f32 %v6773_v26, %v2432_v29 }
 0x349   : > { %v2356_v13 = vpop.f32.mrb[110].mxu1  ;;  %v2088_v61 = vpop.f32.mrb[70].mxu0 }
 0x34a   : > { %v2483_v38 = vmax.f32 %v2461_v39, 0.0  ;;  %v2433_v37 = vadd.f32 %v2356_v13, %v2084_v49  ;;  %v4652_v6 = vpop.f32.mrb[111].mxu1  ;;  %v4552_v50 = vpop.f32.mrb[71].mxu0 }
 0x34c   : > { %v2462_v54 = vadd.f32 %v6773_v26, %v2433_v37  ;;  %4712 = vmatprep.mubr.msk.f32.mxu0 %vm461_vm0, %v2483_v38 }
 0x34d   : > { %v2361_v9 = vpop.f32.mrb[112].mxu1  ;;  %v2092_v59 = vpop.f32.mrb[72].mxu0 }
 0x34e   : > { %v2484_v46 = vmax.f32 %v2462_v54, 0.0  ;;  %v2093_v18 = vadd.f32 %v2092_v59, %v6699_v19  ;;  %v4655_v11 = vpop.f32.mrb[113].mxu1  ;;  %v4555_v2 = vpop.f32.mrb[73].mxu0 }
 0x350   : > { %4713 = vmatmul.mubr.msk.f32.gmra.mrb[108].mxu0 %vm461_vm0, %v2484_v46 }
 0x351   : > { %v2365_v5 = vpop.f32.mrb[114].mxu1  ;;  %v2097_v40 = vpop.f32.mrb[74].mxu0 }
 0x352   : > { %v2434_v3 = vadd.f32 %v2365_v5, %v2093_v18  ;;  %v2098_v32 = vadd.f32 %v2097_v40, %v6710_v23  ;;  %v4658_v16 = vpop.f32.mrb[115].mxu1  ;;  %v4558_v15 = vpop.f32.mrb[75].mxu0 }
 0x354   : > { %v2463_v43 = vadd.f32 %v6773_v26, %v2434_v3 }
 0x355   : > { %v2370_v51 = vpop.f32.mrb[116].mxu1  ;;  %v2102_v21 = vpop.f32.mrb[76].mxu0 }
 0x356   : > { %v2485_v33 = vmax.f32 %v2463_v43, 0.0  ;;  %v2435_v27 = vadd.f32 %v2370_v51, %v2098_v32  ;;  %v4661_v42 = vpop.f32.mrb[117].mxu1  ;;  %v4561_v60 = vpop.f32.mrb[77].mxu0 }
 0x358   : > { %v2464_v19 = vadd.f32 %v6773_v26, %v2435_v27  ;;  %4715 = vmatprep.mubr.msk.f32.mxu0 %vm461_vm0, %v2485_v33 }
 0x359   : > { %v2375_v62 = vpop.f32.mrb[118].mxu1  ;;  %v2106_v44 = vpop.f32.mrb[78].mxu0 }
 0x35a   : > { %v2486_v7 = vmax.f32 %v2464_v19, 0.0  ;;  %v2107_v55 = vadd.f32 %v2106_v44, %v6728_v25  ;;  %v4664_v23 = vpop.f32.mrb[119].mxu1  ;;  %v4564_v30 = vpop.f32.mrb[79].mxu0 }
 0x35c   : > { %4716 = vmatmul.mubr.msk.f32.gmra.mrb[110].mxu0 %vm461_vm0, %v2486_v7 }
 0x35d   : > { %v2379_v20 = vpop.f32.mrb[120].mxu1  ;;  %v2111_v41 = vpop.f32.mrb[80].mxu0 }
 0x35e   : > { %v2436_v24 = vadd.f32 %v2379_v20, %v2107_v55  ;;  %v2112_v56 = vadd.f32 %v2111_v41, %v6739_v4  ;;  %v4667_v31 = vpop.f32.mrb[121].mxu1  ;;  %v4567_v29 = vpop.f32.mrb[81].mxu0 }
 0x360   : > { %v2465_v49 = vadd.f32 %v6773_v26, %v2436_v24 }
 0x361   : > { %v2384_v8 = vpop.f32.mrb[122].mxu1  ;;  %v2116_v12 = vpop.f32.mrb[82].mxu0 }
 0x362   : > { %v2487_v39 = vmax.f32 %v2465_v49, 0.0  ;;  %v2437_v13 = vadd.f32 %v2384_v8, %v2112_v56  ;;  %v4670_v61 = vpop.f32.mrb[123].mxu1  ;;  %v4570_v38 = vpop.f32.mrb[83].mxu0 }
 0x364   : > { %v2466_v25 = vadd.f32 %v6773_v26, %v2437_v13  ;;  %4718 = vmatprep.mubr.msk.f32.mxu0 %vm461_vm0, %v2487_v39  ;;  %v4037_v39 = vld [vmem:[%s7232_s4 + $0x28] sm:$0xf] }
 0x365   : > { %v2389_v37 = vpop.f32.mrb[124].mxu1  ;;  %v2120_v6 = vpop.f32.mrb[84].mxu0 }
 0x366   : > { %v2488_v50 = vmax.f32 %v2466_v25, 0.0  ;;  %v2121_v54 = vadd.f32 %v2120_v6, %v6759_v48  ;;  %v4673_v4 = vpop.f32.mrb[125].mxu1  ;;  %v4573_v9 = vpop.f32.mrb[85].mxu0 }
 0x368   : > { %4719 = vmatmul.mubr.msk.f32.gmra.mrb[112].mxu0 %vm461_vm0, %v2488_v50 }
 0x369   : > { %v2393_v59 = vpop.f32.mrb[126].mxu1  ;;  %v2125_v46 = vpop.f32.mrb[86].mxu0 }
 0x36a   : > { %v2438_v18 = vadd.f32 %v2393_v59, %v2121_v54  ;;  %v2126_v11 = vadd.f32 %v2125_v46, %v6763_v1  ;;  %v4676_v2 = vpop.f32.mrb[127].mxu1  ;;  %v4576_v5 = vpop.f32.mrb[87].mxu0 }
 0x36c   : > { %v2467_v40 = vadd.f32 %v6773_v26, %v2438_v18 }
 0x36d   : > { %v2398_v3 = vpop.f32.mrb[128].mxu1  ;;  %v2130_v32 = vpop.f32.mrb[88].mxu0 }
 0x36e   : > { %v2489_v16 = vmax.f32 %v2467_v40, 0.0  ;;  %v2439_v15 = vadd.f32 %v2398_v3, %v2126_v11  ;;  %v4679_v43 = vpop.f32.mrb[129].mxu1  ;;  %v4579_v51 = vpop.f32.mrb[89].mxu0 }
 0x36f   : > { %v2940_v32 = vpop.permute.xlu0 %2939  ;;  %v5001_v51 = vld [vmem:[#allocation2 + $0x180] sm:$0xff] }
 0x370   : > { %v2468_v48 = vadd.f32 %v6773_v26, %v2439_v15  ;;  %4721 = vmatprep.mubr.msk.f32.mxu0 %vm461_vm0, %v2489_v16  ;;  %v2955_v15 = vpop.permute.xlu1 %2954 }
 0x371   : > { %v2403_v21 = vpop.f32.mrb[130].mxu1  ;;  %v2134_v33 = vpop.f32.mrb[90].mxu0 }
 0x372   : > { %v2490_v27 = vmax.f32 %v2468_v48, 0.0  ;;  %v2135_v42 = vadd.f32 %v2134_v33, %v6765_v10  ;;  %v4682_v1 = vpop.f32.mrb[131].mxu1  ;;  %v4582_v60 = vpop.f32.mrb[91].mxu0  ;;  %v2963_v48 = vsel %vm461_vm0, %v5001_v51, %v2940_v32 }
 0x373   : > { %v2942_v21 = vpop.permute.xlu0 %2941  ;;  %v5002_v1 = vld [vmem:[#allocation2 + $0x188] sm:$0xff] }
 0x374   : > { %4722 = vmatmul.mubr.msk.f32.gmra.mrb[114].mxu0 %vm461_vm0, %v2490_v27  ;;  %v2964_v60 = vsel %vm461_vm0, %v5002_v1, %v2942_v21 }
 0x375   : > { %v2407_v19 = vpop.f32.mrb[132].mxu1  ;;  %v2139_v62 = vpop.f32.mrb[92].mxu0 }
 0x376   : > { %v2440_v44 = vadd.f32 %v2407_v19, %v2135_v42  ;;  %v2140_v7 = vadd.f32 %v2139_v62, %v6767_v17  ;;  %v4685_v55 = vpop.f32.mrb[133].mxu1  ;;  %v4585_v23 = vpop.f32.mrb[93].mxu0  ;;  %v4036_v17 = vld [vmem:[%s7232_s4 + $0x20] sm:$0xff]  ;;  %v2966_v42 = vsel %vm1515_vm10, %v2963_v48, %v2955_v15 }
 0x377   : > { %v2957_v19 = vpop.permute.xlu1 %2956  ;;  %v2944_v55 = vpop.permute.xlu0 %2943  ;;  %v5003_v23 = vld [vmem:[#allocation2 + $0x190] sm:$0xff] }
 0x378   : > { %v2469_v30 = vadd.f32 %v6773_v26, %v2440_v44 }
 0x379   : > { %v2412_v20 = vpop.f32.mrb[134].mxu1  ;;  %v2144_v41 = vpop.f32.mrb[94].mxu0 }
 0x37a   : > { %v2491_v24 = vmax.f32 %v2469_v30, 0.0  ;;  %v2441_v56 = vadd.f32 %v2412_v20, %v2140_v7  ;;  %v4688_v31 = vpop.f32.mrb[135].mxu1  ;;  %v4588_v29 = vpop.f32.mrb[95].mxu0  ;;  %v2967_v7 = vsel %vm1515_vm10, %v2964_v60, %v2957_v19  ;;  %v2965_v30 = vsel %vm461_vm0, %v5003_v23, %v2944_v55  ;;  %v5012_v60 = vld [vmem:[%s5328_s24 + $0x20] sm:$0xff] }
 0x37b   : > { %v2959_v41 = vpop.permute.xlu1 %2958  ;;  %v5005_v31 = vld [vmem:[%s5328_s24] sm:$0xff] }
 0x37c   : > { %v2470_v10 = vadd.f32 %v6773_v26, %v2441_v56  ;;  %4724 = vmatprep.mubr.msk.f32.mxu0 %vm461_vm0, %v2491_v24  ;;  %v4924_v26 = vpack.c.bf16 %v4037_v39, %v4036_v17  ;;  %v2968_v56 = vsel %vm1515_vm10, %v2965_v30, %v2959_v41  ;;  %v3508_v30 = vld [vmem:[%s7234_s6] sm:$0xf] }
 0x37d   : > { %v2417_v49 = vpop.f32.mrb[136].mxu1  ;;  %4874 = vmatprep.subr.msk.mxu1 %vm1693_vm4, %v3508_v30  ;;  %v5013_v41 = vld [vmem:[%s5328_s24 + $0x38] sm:$0xff] }
 0x37e   : > { %v2492_v8 = vmax.f32 %v2470_v10, 0.0  ;;  %v4691_v12 = vpop.f32.mrb[137].mxu1  ;;  %4875 = vmatpush3.msk.msra.mxu1 %vm1693_vm4, %v3508_v30 }
 0x380   : > { %4725 = vmatmul.mubr.msk.f32.gmra.mrb[116].mxu0 %vm461_vm0, %v2492_v8  ;;  %v3308_v8 = vpop.permute.xlu1 %3307 }
 0x381   : > { %v6855_v13 = vpop.f32.mrb[138].mxu1  ;;  %4731 = vmatprep.mubr.msk.f32.mxu0 %vm5160_vm7, %v7258_v14 }
 0x382   : > { %v4782_v61 = vpop.f32.mrb[139].mxu1 }
 0x384   : > { %4732 = vmatmul.mubr.msk.f32.vlgmr.msra.gmra.mrb[118].mxu0 %vm1593_vm11, %v6608_v45 }
 0x385   : > { %v6861_v38 = vpop.f32.mrb[140].mxu1  ;;  %4926 = vmatpush3.bf16.msk.msra.mxu0 %vm5508_vm6, %v4924_v26  ;;  %4734 = vmatprep.mubr.msk.f32.mxu0 %vm5160_vm7, %v7258_v14  ;;  %v5006_v26 = vld [vmem:[%s5328_s24 + $0x18] sm:$0xff] }
 0x386   : > { %v4785_v25 = vpop.f32.mrb[141].mxu1 }
 0x388   : > { %4735 = vmatmul.mubr.msk.f32.gmra.mrb[120].mxu0 %vm1593_vm11, %v6621_v34 }
 0x389   : > { %v3224_v37 = vpop.f32.mrb[142].mxu1  ;;  %4737 = vmatprep.mubr.msk.f32.mxu0 %vm5160_vm7, %v7258_v14 }
 0x38a   : > { %v4788_v6 = vpop.f32.mrb[143].mxu1  ;;  %v5007_v37 = vld [vmem:[%s5328_s24 + $0x10] sm:$0xff] }
 0x38c   : > { %4738 = vmatmul.mubr.msk.f32.gmra.mrb[122].mxu0 %vm1593_vm11, %v6634_v63 }
 0x38d   : > { %v6873_v45 = vpop.f32.mrb[144].mxu1  ;;  %4740 = vmatprep.mubr.msk.f32.mxu0 %vm5160_vm7, %v7258_v14 }
 0x38e   : > { %v4791_v58 = vpop.f32.mrb[145].mxu1 }
 0x38f   : > { %v5008_v58 = vld [vmem:[#allocation2 + $0x198] sm:$0xff] }
 0x390   : > { %4741 = vmatmul.mubr.msk.f32.gmra.mrb[124].mxu0 %vm1593_vm11, %v6673_v28 }
 0x391   : > { %v6879_v50 = vpop.f32.mrb[146].mxu1  ;;  %4743 = vmatprep.mubr.msk.f32.mxu0 %vm5160_vm7, %v7258_v14 }
 0x392   : > { %v4794_v34 = vpop.f32.mrb[147].mxu1 }
 0x394   : > { %4744 = vmatmul.mubr.msk.f32.gmra.mrb[126].mxu0 %vm1593_vm11, %v6684_v36 }
 0x395   : > { %v3238_v54 = vpop.f32.mrb[148].mxu1  ;;  %4746 = vmatprep.mubr.msk.f32.mxu0 %vm5160_vm7, %v7258_v14 }
 0x396   : > { %v4797_v63 = vpop.f32.mrb[149].mxu1 }
 0x398   : > { %4747 = vmatmul.mubr.msk.f32.gmra.mrb[128].mxu0 %vm1593_vm11, %v6693_v22 }
 0x399   : > { %4749 = vmatprep.mubr.msk.f32.mxu0 %vm5160_vm7, %v7258_v14  ;;  %v6891_v4 = vpop.f32.mrb[150].mxu1 }
 0x39a   : > { %v4800_v9 = vpop.f32.mrb[151].mxu1 }
 0x39b   : > { %v3310_v9 = vpop.permute.xlu1 %3309 }
 0x39c   : > { %4750 = vmatmul.mubr.msk.f32.gmra.mrb[130].mxu0 %vm1593_vm11, %v6704_v52 }
 0x39d   : > { %4752 = vmatprep.mubr.msk.f32.mxu0 %vm5160_vm7, %v7258_v14  ;;  %v6897_v59 = vpop.f32.mrb[152].mxu1 }
 0x39e   : > { %v4803_v46 = vpop.f32.mrb[153].mxu1 }
 0x3a0   : > { %4753 = vmatmul.mubr.msk.f32.gmra.mrb[132].mxu0 %vm1593_vm11, %v6715_v35 }
 0x3a1   : > { %4755 = vmatprep.mubr.msk.f32.mxu0 %vm5160_vm7, %v7258_v14  ;;  %v3252_v18 = vpop.f32.mrb[154].mxu1 }
 0x3a2   : > { %v4806_v11 = vpop.f32.mrb[155].mxu1  ;;  %v5009_v18 = vld [vmem:[#allocation2 + $0x1a0] sm:$0xff] }
 0x3a4   : > { %4756 = vmatmul.mubr.msk.f32.gmra.mrb[134].mxu0 %vm1593_vm11, %v6724_v57 }
 0x3a5   : > { %4758 = vmatprep.mubr.msk.f32.mxu0 %vm5160_vm7, %v7258_v14  ;;  %v6907_v2 = vpop.f32.mrb[156].mxu1 }
 0x3a6   : > { %v4809_v5 = vpop.f32.mrb[157].mxu1 }
 0x3a8   : > { %4759 = vmatmul.mubr.msk.f32.gmra.mrb[136].mxu0 %vm1593_vm11, %v6737_v0 }
 0x3a9   : > { %4761 = vmatprep.mubr.msk.f32.mxu0 %vm5160_vm7, %v7258_v14  ;;  %v6913_v40 = vpop.f32.mrb[158].mxu1 }
 0x3aa   : > { %v4812_v3 = vpop.f32.mrb[159].mxu1 }
 0x3ac   : > { %4762 = vmatmul.mubr.msk.f32.gmra.mrb[138].mxu0 %vm1593_vm11, %v6748_v53 }
 0x3ad   : > { %4764 = vmatprep.mubr.msk.f32.mxu0 %vm5160_vm7, %v7258_v14  ;;  %v3266_v16 = vpop.f32.mrb[160].mxu1 }
 0x3ae   : > { %v4815_v43 = vpop.f32.mrb[161].mxu1  ;;  %v5010_v16 = vld [vmem:[#allocation2 + $0x1a8] sm:$0xff] }
 0x3af   : > { %v3312_v43 = vpop.permute.xlu1 %3311 }
 0x3b0   : > { %4765 = vmatmul.mubr.msk.f32.gmra.mrb[140].mxu0 %vm1593_vm11, %v6757_v47 }
 0x3b1   : > { %v6922_v33 = vpop.f32.mrb[162].mxu1  ;;  %4767 = vmatprep.mubr.msk.f32.mxu0 %vm5160_vm7, %v7258_v14 }
 0x3b2   : > { %v4818_v27 = vpop.f32.mrb[163].mxu1 }
 0x3b3   : > { %v5011_v27 = vld [vmem:[%s5328_s24 + $0x28] sm:$0xff] }
 0x3b4   : > { %4768 = vmatmul.mubr.msk.f32.gmra.mrb[142].mxu0 %vm1593_vm11, %v2966_v42 }
 0x3b5   : > { %v6929_v62 = vpop.f32.mrb[164].mxu1  ;;  %4770 = vmatprep.mubr.msk.f32.mxu0 %vm5160_vm7, %v7258_v14 }
 0x3b6   : > { %v4821_v44 = vpop.f32.mrb[165].mxu1 }
 0x3b8   : > { %4771 = vmatmul.mubr.msk.f32.gmra.mrb[144].mxu0 %vm1593_vm11, %v2967_v7 }
 0x3b9   : > { %v3280_v20 = vpop.f32.mrb[166].mxu1  ;;  %4773 = vmatprep.mubr.msk.f32.mxu0 %vm5160_vm7, %v7258_v14 }
 0x3ba   : > { %v4824_v24 = vpop.f32.mrb[167].mxu1 }
 0x3bc   : > { %4774 = vmatmul.mubr.msk.f32.gmra.mrb[146].mxu0 %vm1593_vm11, %v2968_v56 }
 0x3bd   : > { %4829 = vmatprep.mubr.msk.f32.mxu0 %vm5160_vm7, %v7258_v14 }
 0x3c0   : > { %4830 = vmatmul.mubr.msk.f32.vlgmr.msra.gmra.mrb[148].mxu0 %vm1593_vm11, %v6673_v28  ;;  %v6971_v28 = vld [vmem:[%s7235_s7] ss:$0 sm:$0xff] }
 0x3c1   : > { %4832 = vmatprep.mubr.msk.f32.mxu0 %vm5160_vm7, %v7258_v14 }
 0x3c4   : > { %4833 = vmatmul.mubr.msk.f32.gmra.mrb[150].mxu0 %vm1593_vm11, %v6684_v36 }
 0x3c5   : > { %4835 = vmatprep.mubr.msk.f32.mxu0 %vm5160_vm7, %v7258_v14 }
 0x3c8   : > { %4836 = vmatmul.mubr.msk.f32.gmra.mrb[152].mxu0 %vm1593_vm11, %v6693_v22 }
 0x3c9   : > { %4838 = vmatprep.mubr.msk.f32.mxu0 %vm5160_vm7, %v7258_v14 }
 0x3cc   : > { %4839 = vmatmul.mubr.msk.f32.gmra.mrb[154].mxu0 %vm1593_vm11, %v6704_v52 }
 0x3cd   : > { %4841 = vmatprep.mubr.msk.f32.mxu0 %vm5160_vm7, %v7258_v14 }
 0x3d0   : > { %4842 = vmatmul.mubr.msk.f32.gmra.mrb[156].mxu0 %vm1593_vm11, %v6715_v35 }
 0x3d1   : > { %4844 = vmatprep.mubr.msk.f32.mxu0 %vm5160_vm7, %v7258_v14 }
 0x3d4   : > { %4845 = vmatmul.mubr.msk.f32.gmra.mrb[158].mxu0 %vm1593_vm11, %v6724_v57  ;;  %v5004_v57 = vld [vmem:[%s5328_s24 + $0x8] sm:$0xff] }
 0x3d5   : > { %4847 = vmatprep.mubr.msk.f32.mxu0 %vm5160_vm7, %v7258_v14 }
 0x3d8   : > { %4848 = vmatmul.mubr.msk.f32.gmra.mrb[160].mxu0 %vm1593_vm11, %v6737_v0 }
 0x3d9   : > { %4850 = vmatprep.mubr.msk.f32.mxu0 %vm5160_vm7, %v7258_v14 }
 0x3db   : > { %v4696_v36 = vpop.f32.mrb[96].mxu0 }
 0x3dc   : > { %v2642_v22 = vadd.f32 %v4696_v36, %v6971_v28  ;;  %v2636_v52 = vpop.f32.mrb[97].mxu0  ;;  %4851 = vmatmul.mubr.msk.f32.gmra.mrb[162].mxu0 %vm1593_vm11, %v6748_v53  ;;  %v3293_v53 = vpop.permute.xlu0 %3292 }
 0x3dd   : > { %v2637_v35 = vadd.f32 %v6971_v28, %v2636_v52  ;;  %4853 = vmatprep.mubr.msk.f32.mxu0 %vm5160_vm7, %v7258_v14  ;;  %v3316_v34 = vsel %vm461_vm0, %v5008_v58, %v3293_v53 }
 0x3de   : > { %v2746_v0 = vadd.f32 %v5004_v57, %v2642_v22  ;;  %v3319_v46 = vsel %vm1515_vm10, %v3316_v34, %v3308_v8 }
 0x3df   : > { %v2745_v29 = vadd.f32 %v5005_v31, %v2637_v35 }
 0x3e0   : > { %v2768_v10 = vmax.f32 %v2746_v0, 0.0  ;;  %4854 = vmatmul.mubr.msk.f32.gmra.mrb[164].mxu0 %vm1593_vm11, %v6757_v47  ;;  %v3295_v25 = vpop.permute.xlu0 %3294 }
 0x3e1   : > { %v2767_v49 = vmax.f32 %v2745_v29, 0.0  ;;  %4856 = vmatprep.mubr.msk.f32.mxu0 %vm5160_vm7, %v7258_v14  ;;  %v3317_v11 = vsel %vm461_vm0, %v5009_v18, %v3295_v25  ;;  %v5015_v29 = vld [vmem:[%s5328_s24 + $0x48] sm:$0xff] }
 0x3e2   : > { %2790 = vst.msk [vmem:[%s6989_s15 + $0x8] sm:$0xff] %vm477_vm1, %v2768_v10  ;;  %v3320_v3 = vsel %vm1515_vm10, %v3317_v11, %v3310_v9  ;;  %v5019_v18 = vld [vmem:[%s5328_s24 + $0x68] sm:$0xff] }
 0x3e3   : > { %2789 = vst.msk [vmem:[%s6989_s15] sm:$0xff] %vm477_vm1, %v2767_v49  ;;  %v5016_v49 = vld [vmem:[%s5328_s24 + $0x40] sm:$0xff] }
 0x3e4   : > { %4857 = vmatmul.mubr.msk.f32.gmra.mrb[166].mxu0 %vm1593_vm11, %v2966_v42  ;;  %v3297_v5 = vpop.permute.xlu0 %3296 }
 0x3e5   : > { %4859 = vmatprep.mubr.msk.f32.mxu0 %vm5160_vm7, %v7258_v14  ;;  %v3318_v15 = vsel %vm461_vm0, %v5010_v16, %v3297_v5  ;;  %v5020_v5 = vld [vmem:[%s5328_s24 + $0x60] sm:$0xff] }
 0x3e6   : > { %v3321_v1 = vsel %vm1515_vm10, %v3318_v15, %v3312_v43 }
 0x3e7   : > { %v4699_v47 = vpop.f32.mrb[98].mxu0 }
 0x3e8   : > { %v2652_v12 = vadd.f32 %v4699_v47, %v6971_v28  ;;  %v2646_v17 = vpop.f32.mrb[99].mxu0  ;;  %4860 = vmatmul.mubr.msk.f32.gmra.mrb[168].mxu0 %vm1593_vm11, %v2967_v7 }
 0x3e9   : > { %v2647_v39 = vadd.f32 %v6971_v28, %v2646_v17  ;;  %4862 = vmatprep.mubr.msk.f32.mxu0 %vm5160_vm7, %v7258_v14 }
 0x3ea   : > { %v2748_v61 = vadd.f32 %v5006_v26, %v2652_v12 }
 0x3eb   : > { %v2747_v6 = vadd.f32 %v5007_v37, %v2647_v39  ;;  %v5018_v37 = vld [vmem:[%s5328_s24 + $0x50] sm:$0xff] }
 0x3ec   : > { %v2770_v54 = vmax.f32 %v2748_v61, 0.0  ;;  %4863 = vmatmul.mubr.msk.f32.gmra.mrb[170].mxu0 %vm1593_vm11, %v2968_v56  ;;  %v5014_v56 = vld [vmem:[%s5328_s24 + $0x30] sm:$0xff]  ;;  %v5017_v61 = vld [vmem:[%s5328_s24 + $0x58] sm:$0xff] }
 0x3ed   : > { %v2769_v63 = vmax.f32 %v2747_v6, 0.0  ;;  %4865 = vmatprep.mubr.msk.f32.mxu0 %vm5160_vm7, %v7258_v14 }
 0x3ee   : > { %2792 = vst.msk [vmem:[%s6989_s15 + $0x18] sm:$0xff] %vm477_vm1, %v2770_v54 }
 0x3ef   : > { %2791 = vst.msk [vmem:[%s6989_s15 + $0x10] sm:$0xff] %vm477_vm1, %v2769_v63 }
 0x3f0   : > { %4866 = vmatmul.mubr.msk.f32.gmra.mrb[172].mxu0 %vm1593_vm11, %v3319_v46 }
 0x3f1   : > { %4868 = vmatprep.mubr.msk.f32.mxu0 %vm5160_vm7, %v7258_v14 }
 0x3f3   : > { %v4702_v32 = vpop.f32.mrb[100].mxu0 }
 0x3f4   : > { %v2662_v51 = vadd.f32 %v4702_v32, %v6971_v28  ;;  %v2656_v48 = vpop.f32.mrb[101].mxu0  ;;  %4869 = vmatmul.mubr.msk.f32.gmra.mrb[174].mxu0 %vm1593_vm11, %v3320_v3 }
 0x3f5   : > { %v2657_v21 = vadd.f32 %v6971_v28, %v2656_v48  ;;  %4871 = vmatprep.mubr.msk.f32.mxu0 %vm5160_vm7, %v7258_v14 }
 0x3f6   : > { %v2750_v42 = vadd.f32 %v5011_v27, %v2662_v51 }
 0x3f7   : > { %v2749_v19 = vadd.f32 %v5012_v60, %v2657_v21  ;;  %v5021_v21 = vld [vmem:[%s5328_s24 + $0x78] sm:$0xff] }
 0x3f8   : > { %v2772_v44 = vmax.f32 %v2750_v42, 0.0  ;;  %4872 = vmatmul.mubr.msk.f32.gmra.mrb[176].mxu0 %vm1593_vm11, %v3321_v1  ;;  %v5022_v42 = vld [vmem:[%s5328_s24 + $0x70] sm:$0xff] }
 0x3f9   : > { %v2771_v7 = vmax.f32 %v2749_v19, 0.0 }
 0x3fa   : > { %2794 = vst.msk [vmem:[%s6989_s15 + $0x28] sm:$0xff] %vm477_vm1, %v2772_v44 }
 0x3fb   : > { %2793 = vst.msk [vmem:[%s6989_s15 + $0x20] sm:$0xff] %vm477_vm1, %v2771_v7 }
 0x3ff   : > { %v4705_v55 = vpop.f32.mrb[102].mxu0 }
 0x400   : > { %v2672_v14 = vadd.f32 %v4705_v55, %v6971_v28  ;;  %v2666_v23 = vpop.f32.mrb[103].mxu0 }
 0x401   : > { %v2667_v20 = vadd.f32 %v6971_v28, %v2666_v23  ;;  %v5023_v23 = vld [vmem:[%s5328_s24 + $0x88] sm:$0xff] }
 0x402   : > { %v2752_v24 = vadd.f32 %v5013_v41, %v2672_v14 }
 0x403   : > { %v2751_v36 = vadd.f32 %v5014_v56, %v2667_v20  ;;  %v5024_v20 = vld [vmem:[%s5328_s24 + $0x80] sm:$0xff] }
 0x404   : > { %v2774_v22 = vmax.f32 %v2752_v24, 0.0 }
 0x405   : > { %v2773_v52 = vmax.f32 %v2751_v36, 0.0 }
 0x406   : > { %2796 = vst.msk [vmem:[%s6989_s15 + $0x38] sm:$0xff] %vm477_vm1, %v2774_v22 }
 0x407   : > { %2795 = vst.msk [vmem:[%s6989_s15 + $0x30] sm:$0xff] %vm477_vm1, %v2773_v52 }
 0x40b   : > { %v4708_v35 = vpop.f32.mrb[104].mxu0 }
 0x40c   : > { %v2682_v57 = vadd.f32 %v4708_v35, %v6971_v28  ;;  %v2676_v0 = vpop.f32.mrb[105].mxu0 }
 0x40d   : > { %v2677_v31 = vadd.f32 %v6971_v28, %v2676_v0 }
 0x40e   : > { %v2754_v10 = vadd.f32 %v5015_v29, %v2682_v57  ;;  %v5025_v57 = vld [vmem:[%s5328_s24 + $0x98] sm:$0xff] }
 0x40f   : > { %v2753_v53 = vadd.f32 %v5016_v49, %v2677_v31  ;;  %v5026_v31 = vld [vmem:[%s5328_s24 + $0x90] sm:$0xff] }
 0x410   : > { %v2776_v47 = vmax.f32 %v2754_v10, 0.0 }
 0x411   : > { %v2775_v8 = vmax.f32 %v2753_v53, 0.0 }
 0x412   : > { %2798 = vst.msk [vmem:[%s6989_s15 + $0x48] sm:$0xff] %vm477_vm1, %v2776_v47 }
 0x413   : > { %2797 = vst.msk [vmem:[%s6989_s15 + $0x40] sm:$0xff] %vm477_vm1, %v2775_v8 }
 0x417   : > { %v4711_v12 = vpop.f32.mrb[106].mxu0 }
 0x418   : > { %v2692_v17 = vadd.f32 %v4711_v12, %v6971_v28  ;;  %v2686_v39 = vpop.f32.mrb[107].mxu0 }
 0x419   : > { %v2687_v26 = vadd.f32 %v6971_v28, %v2686_v39 }
 0x41a   : > { %v2756_v25 = vadd.f32 %v5017_v61, %v2692_v17  ;;  %v5027_v17 = vld [vmem:[%s5328_s24 + $0xa8] sm:$0xff] }
 0x41b   : > { %v2755_v6 = vadd.f32 %v5018_v37, %v2687_v26  ;;  %v5028_v26 = vld [vmem:[%s5328_s24 + $0xa0] sm:$0xff] }
 0x41c   : > { %v2778_v58 = vmax.f32 %v2756_v25, 0.0 }
 0x41d   : > { %v2777_v34 = vmax.f32 %v2755_v6, 0.0 }
 0x41e   : > { %2800 = vst.msk [vmem:[%s6989_s15 + $0x58] sm:$0xff] %vm477_vm1, %v2778_v58 }
 0x41f   : > { %2799 = vst.msk [vmem:[%s6989_s15 + $0x50] sm:$0xff] %vm477_vm1, %v2777_v34 }
 0x423   : > { %v4714_v54 = vpop.f32.mrb[108].mxu0 }
 0x424   : > { %v2702_v63 = vadd.f32 %v4714_v54, %v6971_v28  ;;  %v2696_v9 = vpop.f32.mrb[109].mxu0 }
 0x425   : > { %v2697_v46 = vadd.f32 %v6971_v28, %v2696_v9 }
 0x426   : > { %v2758_v11 = vadd.f32 %v5019_v18, %v2702_v63 }
 0x427   : > { %v2757_v3 = vadd.f32 %v5020_v5, %v2697_v46 }
 0x428   : > { %v2780_v32 = vmax.f32 %v2758_v11, 0.0 }
 0x429   : > { %v2779_v16 = vmax.f32 %v2757_v3, 0.0 }
 0x42a   : > { %2802 = vst.msk [vmem:[%s6989_s15 + $0x68] sm:$0xff] %vm477_vm1, %v2780_v32 }
 0x42b   : > { %2801 = vst.msk [vmem:[%s6989_s15 + $0x60] sm:$0xff] %vm477_vm1, %v2779_v16 }
 0x42f   : > { %v4717_v15 = vpop.f32.mrb[110].mxu0 }
 0x430   : > { %v2712_v43 = vadd.f32 %v4717_v15, %v6971_v28  ;;  %v2706_v51 = vpop.f32.mrb[111].mxu0 }
 0x431   : > { %v2707_v48 = vadd.f32 %v6971_v28, %v2706_v51 }
 0x432   : > { %v2760_v27 = vadd.f32 %v5021_v21, %v2712_v43 }
 0x433   : > { %v2759_v1 = vadd.f32 %v5022_v42, %v2707_v48 }
 0x434   : > { %v2782_v60 = vmax.f32 %v2760_v27, 0.0 }
 0x435   : > { %v2781_v19 = vmax.f32 %v2759_v1, 0.0 }
 0x436   : > { %2804 = vst.msk [vmem:[%s6989_s15 + $0x78] sm:$0xff] %vm477_vm1, %v2782_v60 }
 0x437   : > { %2803 = vst.msk [vmem:[%s6989_s15 + $0x70] sm:$0xff] %vm477_vm1, %v2781_v19 }
 0x43b   : > { %v4720_v44 = vpop.f32.mrb[112].mxu0 }
 0x43c   : > { %v2722_v7 = vadd.f32 %v4720_v44, %v6971_v28  ;;  %v2716_v55 = vpop.f32.mrb[113].mxu0 }
 0x43d   : > { %v2717_v14 = vadd.f32 %v6971_v28, %v2716_v55 }
 0x43e   : > { %v2762_v30 = vadd.f32 %v5023_v23, %v2722_v7 }
 0x43f   : > { %v2761_v41 = vadd.f32 %v5024_v20, %v2717_v14 }
 0x440   : > { %v2784_v24 = vmax.f32 %v2762_v30, 0.0 }
 0x441   : > { %v2783_v56 = vmax.f32 %v2761_v41, 0.0 }
 0x442   : > { %2806 = vst.msk [vmem:[%s6989_s15 + $0x88] sm:$0xff] %vm477_vm1, %v2784_v24 }
 0x443   : > { %2805 = vst.msk [vmem:[%s6989_s15 + $0x80] sm:$0xff] %vm477_vm1, %v2783_v56 }
 0x447   : > { %v4723_v36 = vpop.f32.mrb[114].mxu0 }
 0x448   : > { %v2732_v22 = vadd.f32 %v4723_v36, %v6971_v28  ;;  %v2726_v52 = vpop.f32.mrb[115].mxu0 }
 0x449   : > { %v2727_v35 = vadd.f32 %v6971_v28, %v2726_v52 }
 0x44a   : > { %v2764_v0 = vadd.f32 %v5025_v57, %v2732_v22 }
 0x44b   : > { %v2763_v29 = vadd.f32 %v5026_v31, %v2727_v35 }
 0x44c   : > { %v2786_v10 = vmax.f32 %v2764_v0, 0.0 }
 0x44d   : > { %v2785_v49 = vmax.f32 %v2763_v29, 0.0 }
 0x44e   : > { %2808 = vst.msk [vmem:[%s6989_s15 + $0x98] sm:$0xff] %vm477_vm1, %v2786_v10 }
 0x44f   : > { %2807 = vst.msk [vmem:[%s6989_s15 + $0x90] sm:$0xff] %vm477_vm1, %v2785_v49 }
 0x453   : > { %v4726_v53 = vpop.f32.mrb[116].mxu0 }
 0x454   : > { %v2742_v47 = vadd.f32 %v4726_v53, %v6971_v28  ;;  %v2736_v8 = vpop.f32.mrb[117].mxu0 }
 0x455   : > { %v2737_v12 = vadd.f32 %v6971_v28, %v2736_v8 }
 0x456   : > { %v2766_v39 = vadd.f32 %v5027_v17, %v2742_v47 }
 0x457   : > { %v2765_v61 = vadd.f32 %v5028_v26, %v2737_v12  ;;  %v3076_v25 = vpop.f32.mrb[118].mxu0 }
 0x458   : > { %v2788_v37 = vmax.f32 %v2766_v39, 0.0  ;;  %v3215_v6 = vadd.f32 %v6855_v13, %v3076_v25  ;;  %v4733_v58 = vpop.f32.mrb[119].mxu0 }
 0x459   : > { %v2787_v34 = vmax.f32 %v2765_v61, 0.0 }
 0x45a   : > { %2810 = vst.msk [vmem:[%s6989_s15 + $0xa8] sm:$0xff] %vm477_vm1, %v2788_v37 }
 0x45b   : > { %2809 = vst.msk [vmem:[%s6989_s15 + $0xa0] sm:$0xff] %vm477_vm1, %v2787_v34  ;;  %v3081_v54 = vpop.f32.mrb[120].mxu0 }
 0x45c   : > { %v3220_v63 = vadd.f32 %v6861_v38, %v3081_v54  ;;  %v4736_v9 = vpop.f32.mrb[121].mxu0 }
 0x45f   : > { %v3086_v46 = vpop.f32.mrb[122].mxu0 }
 0x460   : > { %v4739_v18 = vpop.f32.mrb[123].mxu0 }
 0x463   : > { %v3090_v11 = vpop.f32.mrb[124].mxu0 }
 0x464   : > { %v3229_v5 = vadd.f32 %v6873_v45, %v3090_v11  ;;  %v4742_v3 = vpop.f32.mrb[125].mxu0 }
 0x467   : > { %v3095_v32 = vpop.f32.mrb[126].mxu0 }
 0x468   : > { %v3234_v16 = vadd.f32 %v6879_v50, %v3095_v32  ;;  %v4745_v13 = vpop.f32.mrb[127].mxu0 }
 0x46b   : > { %v3100_v15 = vpop.f32.mrb[128].mxu0 }
 0x46c   : > { %v4748_v43 = vpop.f32.mrb[129].mxu0 }
 0x46f   : > { %v3104_v51 = vpop.f32.mrb[130].mxu0 }
 0x470   : > { %v3243_v48 = vadd.f32 %v6891_v4, %v3104_v51  ;;  %v4751_v21 = vpop.f32.mrb[131].mxu0 }
 0x473   : > { %v3109_v27 = vpop.f32.mrb[132].mxu0 }
 0x474   : > { %v3248_v38 = vadd.f32 %v6897_v59, %v3109_v27  ;;  %v4754_v42 = vpop.f32.mrb[133].mxu0 }
 0x477   : > { %v3114_v1 = vpop.f32.mrb[134].mxu0 }
 0x478   : > { %v4757_v60 = vpop.f32.mrb[135].mxu0 }
 0x47b   : > { %v3118_v19 = vpop.f32.mrb[136].mxu0 }
 0x47c   : > { %v3257_v45 = vadd.f32 %v6907_v2, %v3118_v19  ;;  %v4760_v44 = vpop.f32.mrb[137].mxu0 }
 0x47f   : > { %v3123_v7 = vpop.f32.mrb[138].mxu0 }
 0x480   : > { %v3262_v50 = vadd.f32 %v6913_v40, %v3123_v7  ;;  %v4763_v55 = vpop.f32.mrb[139].mxu0  ;;  %v5029_v40 = vld [vmem:[%s7233_s5] ss:$0 sm:$0xff] }
 0x483   : > { %v3128_v14 = vpop.f32.mrb[140].mxu0 }
 0x484   : > { %v4766_v23 = vpop.f32.mrb[141].mxu0 }
 0x487   : > { %v3132_v30 = vpop.f32.mrb[142].mxu0 }
 0x488   : > { %v7111_v4 = vadd.f32 %v6922_v33, %v3132_v30  ;;  %v4769_v20 = vpop.f32.mrb[143].mxu0 }
 0x48b   : > { %v3137_v41 = vpop.f32.mrb[144].mxu0 }
 0x48c   : > { %v7114_v59 = vadd.f32 %v6929_v62, %v3137_v41  ;;  %v4772_v24 = vpop.f32.mrb[145].mxu0 }
 0x48f   : > { %v3142_v56 = vpop.f32.mrb[146].mxu0 }
 0x490   : > { %v4775_v36 = vpop.f32.mrb[147].mxu0 }
 0x493   : > { %v3402_v2 = vpop.f32.mrb[148].mxu0 }
 0x494   : > { %v3471_v22 = vadd.f32 %v3402_v2, %v3215_v6  ;;  %v4831_v52 = vpop.f32.mrb[149].mxu0 }
 0x496   : > { %v3488_v35 = vadd.f32 %v5029_v40, %v3471_v22 }
 0x497   : > { %v3407_v57 = vpop.f32.mrb[150].mxu0 }
 0x498   : > { %v3498_v0 = vmax.f32 %v3488_v35, 0.0  ;;  %v3472_v33 = vadd.f32 %v3407_v57, %v3220_v63  ;;  %v4834_v31 = vpop.f32.mrb[151].mxu0 }
 0x49a   : > { %v3489_v29 = vadd.f32 %v5029_v40, %v3472_v33  ;;  %4876 = vmatprep.mubr.msk.f32.mxu1 %vm461_vm0, %v3498_v0 }
 0x49b   : > { %v3412_v62 = vpop.f32.mrb[152].mxu0 }
 0x49c   : > { %v3499_v10 = vmax.f32 %v3489_v29, 0.0  ;;  %v4837_v49 = vpop.f32.mrb[153].mxu0 }
 0x49d   : > { %v5032_v49 = vld [vmem:[%s5328_s24 + $0xc8] sm:$0xff] }
 0x49e   : > { %4877 = vmatmul.mubr.msk.f32.vlgmr.msra.gmra.mrb[168].mxu1 %vm461_vm0, %v3499_v10 }
 0x49f   : > { %v3416_v53 = vpop.f32.mrb[154].mxu0 }
 0x4a0   : > { %v3473_v47 = vadd.f32 %v3416_v53, %v3229_v5  ;;  %v4840_v8 = vpop.f32.mrb[155].mxu0 }
 0x4a2   : > { %v3490_v12 = vadd.f32 %v5029_v40, %v3473_v47  ;;  %v5033_v47 = vld [vmem:[%s5328_s24 + $0xc0] sm:$0xff] }
 0x4a3   : > { %v3421_v17 = vpop.f32.mrb[156].mxu0 }
 0x4a4   : > { %v3500_v39 = vmax.f32 %v3490_v12, 0.0  ;;  %v3474_v26 = vadd.f32 %v3421_v17, %v3234_v16  ;;  %v4843_v61 = vpop.f32.mrb[157].mxu0 }
 0x4a6   : > { %v3491_v25 = vadd.f32 %v5029_v40, %v3474_v26  ;;  %4879 = vmatprep.mubr.msk.f32.mxu1 %vm461_vm0, %v3500_v39 }
 0x4a7   : > { %v3426_v37 = vpop.f32.mrb[158].mxu0 }
 0x4a8   : > { %v3501_v6 = vmax.f32 %v3491_v25, 0.0  ;;  %v4846_v58 = vpop.f32.mrb[159].mxu0  ;;  %v5034_v37 = vld [vmem:[%s5328_s24 + $0xd8] sm:$0xff] }
 0x4a9   : > { %v5035_v58 = vld [vmem:[%s5328_s24 + $0xd0] sm:$0xff] }
 0x4aa   : > { %4880 = vmatmul.mubr.msk.f32.gmra.mrb[170].mxu1 %vm461_vm0, %v3501_v6 }
 0x4ab   : > { %v3430_v34 = vpop.f32.mrb[160].mxu0 }
 0x4ac   : > { %v3475_v54 = vadd.f32 %v3430_v34, %v3243_v48  ;;  %v4849_v63 = vpop.f32.mrb[161].mxu0 }
 0x4ae   : > { %v3492_v9 = vadd.f32 %v5029_v40, %v3475_v54 }
 0x4af   : > { %v3435_v46 = vpop.f32.mrb[162].mxu0 }
 0x4b0   : > { %v3502_v18 = vmax.f32 %v3492_v9, 0.0  ;;  %v3476_v11 = vadd.f32 %v3435_v46, %v3248_v38  ;;  %v4852_v5 = vpop.f32.mrb[163].mxu0 }
 0x4b1   : > { %v5036_v5 = vld [vmem:[%s5328_s24 + $0xe8] sm:$0xff] }
 0x4b2   : > { %v3493_v3 = vadd.f32 %v5029_v40, %v3476_v11  ;;  %4882 = vmatprep.mubr.msk.f32.mxu1 %vm461_vm0, %v3502_v18 }
 0x4b3   : > { %v3440_v32 = vpop.f32.mrb[164].mxu0 }
 0x4b4   : > { %v3503_v16 = vmax.f32 %v3493_v3, 0.0  ;;  %v4855_v13 = vpop.f32.mrb[165].mxu0  ;;  %v5037_v32 = vld [vmem:[%s5328_s24 + $0xe0] sm:$0xff] }
 0x4b6   : > { %4883 = vmatmul.mubr.msk.f32.gmra.mrb[172].mxu1 %vm461_vm0, %v3503_v16 }
 0x4b7   : > { %v3444_v15 = vpop.f32.mrb[166].mxu0 }
 0x4b8   : > { %v3477_v43 = vadd.f32 %v3444_v15, %v3257_v45  ;;  %v4858_v51 = vpop.f32.mrb[167].mxu0 }
 0x4ba   : > { %v3494_v21 = vadd.f32 %v5029_v40, %v3477_v43 }
 0x4bb   : > { %v3449_v27 = vpop.f32.mrb[168].mxu0 }
 0x4bc   : > { %v3504_v48 = vmax.f32 %v3494_v21, 0.0  ;;  %v3478_v42 = vadd.f32 %v3449_v27, %v3262_v50  ;;  %v4861_v1 = vpop.f32.mrb[169].mxu0 }
 0x4bd   : > { %v5039_v1 = vld [vmem:[%s5328_s24 + $0xf0] sm:$0xff] }
 0x4be   : > { %v3495_v60 = vadd.f32 %v5029_v40, %v3478_v42  ;;  %4885 = vmatprep.mubr.msk.f32.mxu1 %vm461_vm0, %v3504_v48  ;;  %v5038_v48 = vld [vmem:[%s5328_s24 + $0xf8] sm:$0xff] }
 0x4bf   : > { %v3454_v38 = vpop.f32.mrb[170].mxu0 }
 0x4c0   : > { %v3505_v19 = vmax.f32 %v3495_v60, 0.0  ;;  %v4864_v44 = vpop.f32.mrb[171].mxu0 }
 0x4c2   : > { %4886 = vmatmul.mubr.msk.f32.gmra.mrb[174].mxu1 %vm461_vm0, %v3505_v19 }
 0x4c3   : > { %v3458_v7 = vpop.f32.mrb[172].mxu0 }
 0x4c4   : > { %v3479_v55 = vadd.f32 %v3458_v7, %v7111_v4  ;;  %v4867_v14 = vpop.f32.mrb[173].mxu0 }
 0x4c6   : > { %v3496_v45 = vadd.f32 %v5029_v40, %v3479_v55 }
 0x4c7   : > { %v3463_v23 = vpop.f32.mrb[174].mxu0 }
 0x4c8   : > { %v3506_v30 = vmax.f32 %v3496_v45, 0.0  ;;  %v3480_v50 = vadd.f32 %v3463_v23, %v7114_v59  ;;  %v4870_v20 = vpop.f32.mrb[175].mxu0  ;;  %v5030_v59 = vld [vmem:[%s5328_s24 + $0xb8] sm:$0xff] }
 0x4ca   : > { %v3497_v41 = vadd.f32 %v5029_v40, %v3480_v50  ;;  %4888 = vmatprep.mubr.msk.f32.mxu1 %vm461_vm0, %v3506_v30  ;;  %v5031_v40 = vld [vmem:[%s5328_s24 + $0xb0] sm:$0xff]  ;;  %s5163_s24 = smov [#allocation6]  }
 0x4cb   : > { %v3468_v24 = vpop.f32.mrb[176].mxu0  ;;  %s5074_s16 = sshll.u32 %s5163_s24, 4  ;;  %s5075_s16 = int_to_ptr.vmem [resolvable:$false] %s5074_s16 }
 0x4cc   : > { %v3507_v56 = vmax.f32 %v3497_v41, 0.0  ;;  %v4873_v36 = vpop.f32.mrb[177].mxu0  ;;  %s5076_s25 = scalar_lea.vmem %s5075_s16, 8192  ;;  %p5077_p13 = scmp.lt.s32.totalorder %s7174_s22, %s5075_s16 }
 0x4cd   : > { %p5078_p2 = scmp.lt.s32.totalorder %s5076_s25, %s5070_s14 }
 0x4ce   : > { %4889 = vmatmul.mubr.msk.f32.gmra.mrb[176].mxu1 %vm461_vm0, %v3507_v56 }
 0x4cf   : > { %p5079_p5 = por %p5078_p2, %p5077_p13 }
 0x4d1   : > { %p5080_p4 = pnand %p5079_p5, %p5073_p6 }
 0x571   : > { %v4878_v4 = vpop.f32.mrb[168].mxu1 }
 0x572   : > { %v3621_v2 = vadd.f32 %v4878_v4, %v6971_v28  ;;  %v3615_v22 = vpop.f32.mrb[169].mxu1 }
 0x573   : > { %v3616_v52 = vadd.f32 %v6971_v28, %v3615_v22 }
 0x574   : > { %v3665_v35 = vadd.f32 %v5030_v59, %v3621_v2 }
 0x575   : > { %v3664_v57 = vadd.f32 %v5031_v40, %v3616_v52 }
 0x576   : > { %v3675_v0 = vmax.f32 %v3665_v35, 0.0 }
 0x577   : > { %v3674_v33 = vmax.f32 %v3664_v57, 0.0 }
 0x578   : > { %4068 = vst.msk [vmem:[%s6989_s15 + $0xb8] sm:$0xff] %vm477_vm1, %v3675_v0 }
 0x579   : > { %4067 = vst.msk [vmem:[%s6989_s15 + $0xb0] sm:$0xff] %vm477_vm1, %v3674_v33 }
 0x57d   : > { %v4881_v31 = vpop.f32.mrb[170].mxu1 }
 0x57e   : > { %v3631_v29 = vadd.f32 %v4881_v31, %v6971_v28  ;;  %v3625_v62 = vpop.f32.mrb[171].mxu1 }
 0x57f   : > { %v3626_v10 = vadd.f32 %v6971_v28, %v3625_v62 }
 0x580   : > { %v3667_v53 = vadd.f32 %v5032_v49, %v3631_v29 }
 0x581   : > { %v3666_v8 = vadd.f32 %v5033_v47, %v3626_v10 }
 0x582   : > { %v3677_v12 = vmax.f32 %v3667_v53, 0.0 }
 0x583   : > { %v3676_v17 = vmax.f32 %v3666_v8, 0.0 }
 0x584   : > { %4070 = vst.msk [vmem:[%s6989_s15 + $0xc8] sm:$0xff] %vm477_vm1, %v3677_v12 }
 0x585   : > { %4069 = vst.msk [vmem:[%s6989_s15 + $0xc0] sm:$0xff] %vm477_vm1, %v3676_v17 }
 0x589   : > { %v4884_v39 = vpop.f32.mrb[172].mxu1 }
 0x58a   : > { %v3641_v26 = vadd.f32 %v4884_v39, %v6971_v28  ;;  %v3635_v61 = vpop.f32.mrb[173].mxu1 }
 0x58b   : > { %v3636_v25 = vadd.f32 %v6971_v28, %v3635_v61 }
 0x58c   : > { %v3669_v6 = vadd.f32 %v5034_v37, %v3641_v26 }
 0x58d   : > { %v3668_v34 = vadd.f32 %v5035_v58, %v3636_v25 }
 0x58e   : > { %v3679_v54 = vmax.f32 %v3669_v6, 0.0 }
 0x58f   : > { %v3678_v63 = vmax.f32 %v3668_v34, 0.0 }
 0x590   : > { %4072 = vst.msk [vmem:[%s6989_s15 + $0xd8] sm:$0xff] %vm477_vm1, %v3679_v54 }
 0x591   : > { %4071 = vst.msk [vmem:[%s6989_s15 + $0xd0] sm:$0xff] %vm477_vm1, %v3678_v63 }
 0x595   : > { %v4887_v9 = vpop.f32.mrb[174].mxu1 }
 0x596   : > { %v3651_v46 = vadd.f32 %v4887_v9, %v6971_v28  ;;  %v3645_v18 = vpop.f32.mrb[175].mxu1 }
 0x597   : > { %v3646_v11 = vadd.f32 %v6971_v28, %v3645_v18 }
 0x598   : > { %v3671_v3 = vadd.f32 %v5036_v5, %v3651_v46 }
 0x599   : > { %v3670_v16 = vadd.f32 %v5037_v32, %v3646_v11 }
 0x59a   : > { %v3681_v13 = vmax.f32 %v3671_v3, 0.0 }
 0x59b   : > { %v3680_v15 = vmax.f32 %v3670_v16, 0.0 }
 0x59c   : > { %4074 = vst.msk [vmem:[%s6989_s15 + $0xe8] sm:$0xff] %vm477_vm1, %v3681_v13 }
 0x59d   : > { %4073 = vst.msk [vmem:[%s6989_s15 + $0xe0] sm:$0xff] %vm477_vm1, %v3680_v15 }
 0x5a1   : > { %v4890_v43 = vpop.f32.mrb[176].mxu1 }
 0x5a2   : > { %v3661_v51 = vadd.f32 %v4890_v43, %v6971_v28  ;;  %v3655_v21 = vpop.f32.mrb[177].mxu1 }
 0x5a3   : > { %v3656_v27 = vadd.f32 %v6971_v28, %v3655_v21 }
 0x5a4   : > { %v3673_v42 = vadd.f32 %v5038_v48, %v3661_v51 }
 0x5a5   : > { %v3672_v60 = vadd.f32 %v5039_v1, %v3656_v27 }
 0x5a6   : > { %v3683_v38 = vmax.f32 %v3673_v42, 0.0 }
 0x5a7   : > { %v3682_v19 = vmax.f32 %v3672_v60, 0.0 }
 0x5a8   : > { %4076 = vst.msk [vmem:[%s6989_s15 + $0xf8] sm:$0xff] %vm477_vm1, %v3683_v38 }
 0x5a9   : > { %4075 = vst.msk [vmem:[%s6989_s15 + $0xf0] sm:$0xff] %vm477_vm1, %v3682_v19 }
 0x5aa   : > { %5083 = shalt.err (!%p5080_p4)
}
 0x5ab   : > { %s5084_s15 = scalar_lea.hbm %s7172_s21, 4096  ;;  %s5088_s12 = scalar_lea.hbm %s7236_s8, 8192 }
 0x5ac   : > { %p5085_p7 = scmp.ne.s32.totalorder %s7172_s21, %s5084_s15  ;;  %p5089_p1 = scmp.lt.u32.totalorder %s7172_s21, %s7236_s8 }
 0x5ad   : > { %p5090_p3 = scmp.lt.u32.totalorder %s5088_s12, %s5084_s15  ;;  %p5092_p8 = scmp.lt.u32.totalorder %s5084_s15, %s7172_s21 }
 0x5ae   : > { %p5086_p10 = pnand %p5085_p7, %p7264_p11 }
 0x5af   : > { %p5091_p9 = por %p5090_p3, %p5089_p1 }
 0x5b0   : > { %p5087_p12 = pneg %p5086_p10 }
 0x5b1   : > { %p5093_p0 = por %p5092_p8, %p5091_p9 }
 0x5b3   : > { %p5094_p6 = pnand %p5093_p0, %p5087_p12 }
 0x5b5   : > { %5097 = shalt.err (!%p5094_p6)
}
 0x5b6   : > { %s5164_s14 = smov 128  }
 0x5b7   : > { %4931 = dma.vmem_to_hbm [thread:$0]  (%p7264_p11), %s7174_s22, 4096, %s7172_s21, %s3696_s30, %s5164_s14, %s5164_s14, %s5162_s17  }
 0x5b8 PF: > { %s3727_s25 = sand.u32 1, %s5132_s27   ;;  %p7265_p13 = scmp.ne.s32.totalorder %s7249_s20, 0 }
 0x5b9   : > { %p7266_p2 = scmp.ge.s32.totalorder %s5152_s10, 2  ;;  %s3728_s15 = scalar_lea.sflag [#allocation5], %s3727_s25 }
 0x5bb   : > { %p4938_p5 = pnand %p7266_p2, %p7265_p13 }
 0x5bd   : > { %5127 = dma.done.wait (!%p4938_p5), %s3728_s15, 4096  }
 0x5be   : > { %5129 = vsyncadd (!%p4938_p5), %s3728_s15, 4294963200  ;;  %s24_s10 = sadd.s32 1, %s5152_s10   ;;  %s7267_s27 = smov %s5136_s28 }
 0x5bf   : > { %p21_p4 = scmp.ge.s32.totalorder %s24_s10, 4   ;;  %s7268_s28 = smov %s5140_s29 }
 0x5c0   : > { %s7269_s29 = smov %s5266_s19  ;;  %s7270_s30 = smov %s5148_s9 }
 0x5c1   : > { %s7271_s9 = smov %s7273_s13  ;;  %23 = sbr.rel (!%p21_p4) target bundleno = 6 (0x6), region = 106 }
 0x5c8   :  { %3733 = vsyncpa [#allocation4], 1 }
 0x5c9   :  { %3735 = vsyncpa [#allocation4 + $0x1], 1 }
 0x5ca   :  { %3736 = vsyncpa [#allocation5], 1 }
 0x5cb   :  { %3738 = vsyncpa [#allocation5 + $0x1], 1 }

</bundles_post_ra>
